<compile_context>
chip_gen: v5e
topology: v5e:2x2
jax: 0.10.0
libtpu: 0.0.40
codegen_flags: <defaults>
</compile_context>

<pallas_src>
import functools
import math

import jax
import jax.numpy as jnp
from jax.experimental import pallas as pl
from jax.experimental.pallas import tpu as pltpu


# ----------------------------------------------------------------------------
# Fused Bottleneck kernel (one batch element per grid step)
# ----------------------------------------------------------------------------
def _bottleneck_kernel(x_ref, w1_ref, b1_ref, w2f_ref, b2_ref, w3_ref, b3_ref,
                       o_ref, yp_ref, pc_ref, *, H, W, pad, dil, has_downsample):
    """Inputs:
         x   (1, H, W, Cin)            bf16
         w1  (Cin, P)                  bf16   (BN1 folded)
         b1  (1, P)                    f32
         w2f (9P, P)                   bf16   (BN2 folded, 3x3 kernel flattened)
         b2  (1, P)                    f32
         w3  (P, C4) or (P+Cin, C4)    bf16   (BN3 [+ downsample BN] folded;
                                               downsample conv concatenated on K)
         b3  (1, C4)                   f32    (b3 [+ bd])
       Output:
         o   (1, H, W, C4)             bf16
       Scratch:
         yp  (H+2p, W+2p, P)           bf16   zero-bordered conv1 output
         pc  (H*W, 9P)                 bf16   im2col patch buffer
    """
    Cin = x_ref.shape[-1]
    P = w1_ref.shape[-1]
    C4 = w3_ref.shape[-1]
    M = H * W
    Hp, Wp = H + 2 * pad, W + 2 * pad
    cdt = x_ref.dtype                                   # bf16 MXU compute dtype

    x2d = x_ref[0].reshape(M, Cin)                      # (M, Cin) bf16

    # ---- conv1 (1x1) + folded BN1 + ReLU (f32 accumulation, bf16 result) ----
    y1 = jnp.dot(x2d, w1_ref[...], preferred_element_type=jnp.float32)
    y1 = jnp.maximum(y1 + b1_ref[...], 0.0).astype(cdt)          # (M, P) bf16

    # ---- stage y1 into the padded scratch; zero only the border ring -------
    # (interior is fully overwritten every step, so no full-buffer memset)
    yp_ref[0:pad, :, :] = jnp.zeros((pad, Wp, P), cdt)
    yp_ref[Hp - pad:Hp, :, :] = jnp.zeros((pad, Wp, P), cdt)
    yp_ref[:, 0:pad, :] = jnp.zeros((Hp, pad, P), cdt)
    yp_ref[:, Wp - pad:Wp, :] = jnp.zeros((Hp, pad, P), cdt)
    yp_ref[pad:pad + H, pad:pad + W, :] = y1.reshape(H, W, P)

    # ---- im2col gather: 9 shifted windows -> (M, 9P) patch buffer ----------
    # Requires pad == dil (asserted in the wrapper): window [k*dil, k*dil+H).
    for ky in range(3):
        for kx in range(3):
            t = ky * 3 + kx
            win = yp_ref[ky * dil:ky * dil + H, kx * dil:kx * dil + W, :]
            pc_ref[:, t * P:(t + 1) * P] = win.reshape(M, P)

    # ---- conv2 (3x3, dilated) as ONE K=9P GEMM + folded BN2 + ReLU ---------
    y2 = jnp.dot(pc_ref[...], w2f_ref[...], preferred_element_type=jnp.float32)
    y2 = jnp.maximum(y2 + b2_ref[...], 0.0).astype(cdt)          # (M, P) bf16

    # ---- conv3 (1x1) + folded BN3, residual, final ReLU --------------------
    if has_downsample:
        # Residual projection fused into the same GEMM via K-concatenation.
        rhs = jnp.concatenate([y2, x2d], axis=-1)                # (M, P+Cin) bf16
        y3 = jnp.dot(rhs, w3_ref[...],
                     preferred_element_type=jnp.float32) + b3_ref[...]
        out = jnp.maximum(y3, 0.0)                               # (M, C4) f32
    else:
        y3 = jnp.dot(y2, w3_ref[...],
                     preferred_element_type=jnp.float32) + b3_ref[...]
        out = jnp.maximum(y3 + x2d.astype(jnp.float32), 0.0)     # identity residual

    # Lane-dense (C4 = 4P >= 128) bf16 store.
    o_ref[0] = out.reshape(H, W, C4).astype(o_ref.dtype)


# ----------------------------------------------------------------------------
# Wrapper: one pallas_call for the whole block, grid over batch (parallel)
# ----------------------------------------------------------------------------
def bottleneck_forward(x_nchw, params):
    dt = params["dtype"]
    pad, dil = params["pad"], params["dil"]
    assert pad == dil, "kernel window indexing assumes padding == dilation"
    P, C4 = params["planes"], params["c4"]
    has_ds = params["has_downsample"]

    x = jnp.transpose(x_nchw, (0, 2, 3, 1)).astype(dt)    # NHWC, bf16
    N, H, W, Cin = x.shape
    M = H * W
    Kc = params["w3k"].shape[0]                           # P or P + Cin

    kernel = functools.partial(_bottleneck_kernel, H=H, W=W, pad=pad, dil=dil,
                               has_downsample=has_ds)

    in_specs = [
        pl.BlockSpec((1, H, W, Cin), lambda n: (n, 0, 0, 0)),
        pl.BlockSpec((Cin, P), lambda n: (0, 0)),
        pl.BlockSpec((1, P), lambda n: (0, 0)),
        pl.BlockSpec((9 * P, P), lambda n: (0, 0)),
        pl.BlockSpec((1, P), lambda n: (0, 0)),
        pl.BlockSpec((Kc, C4), lambda n: (0, 0)),
        pl.BlockSpec((1, C4), lambda n: (0, 0)),
    ]
    args = [x, params["w1"], params["b1"], params["w2f"], params["b2"],
            params["w3k"], params["b3k"]]

    flops = 2 * N * M * (Cin * P + 9 * P * P + Kc * C4)
    bytes_accessed = (sum(int(a.size) * a.dtype.itemsize for a in args)
                      + N * M * C4 * jnp.dtype(dt).itemsize)

    out_nhwc = pl.pallas_call(
        kernel,
        out_shape=jax.ShapeDtypeStruct((N, H, W, C4), dt),
        grid=(N,),
        in_specs=in_specs,
        out_specs=pl.BlockSpec((1, H, W, C4), lambda n: (n, 0, 0, 0)),
        scratch_shapes=[
            pltpu.VMEM((H + 2 * pad, W + 2 * pad, P), dt),   # padded conv1 out
            pltpu.VMEM((M, 9 * P), dt),                      # im2col patches
        ],
        compiler_params=pltpu.CompilerParams(
            dimension_semantics=("parallel",)),
        cost_estimate=pl.CostEstimate(flops=int(flops), transcendentals=0,
                                      bytes_accessed=int(bytes_accessed)),
    )(*args)
    return jnp.transpose(out_nhwc, (0, 3, 1, 2))          # back to NCHW


# ----------------------------------------------------------------------------
# Parameter construction (deterministic, eval-mode BN folded into weights)
# ----------------------------------------------------------------------------
def _resolve_conv2_geometry(stride, dilation, has_downsample):
    # Mirrors the PyTorch Bottleneck.__init__ padding/dilation logic.
    padding = 2 - stride
    if has_downsample and dilation > 1:
        dilation = dilation // 2
        padding = dilation
    assert stride == 1 or dilation == 1
    if dilation > 1:
        padding = dilation
    return padding, dilation


def _folded_bn(key, c, eps=1e-5):
    kg, kb = jax.random.split(key)
    gamma = 1.0 + 0.1 * jax.random.normal(kg, (c,), jnp.float32)
    beta = 0.1 * jax.random.normal(kb, (c,), jnp.float32)
    running_mean = jnp.zeros((c,), jnp.float32)   # eval-mode running stats
    running_var = jnp.ones((c,), jnp.float32)
    scale = gamma / jnp.sqrt(running_var + eps)
    bias = beta - running_mean * scale
    return scale, bias


def init_bottleneck_params(key, inplanes, planes, stride=1, dilation=1,
                           has_downsample=False, dtype=jnp.bfloat16):
    if stride != 1:
        # TODO(synk): stride=2 conv2 path (needs a space-to-depth phase split);
        # the module's default stride=1 configurations are covered.
        raise NotImplementedError("stride != 1 not implemented")
    pad, dil = _resolve_conv2_geometry(stride, dilation, has_downsample)
    assert pad == dil
    c4 = planes * 4
    ks = jax.random.split(key, 8)

    w1 = jax.random.normal(ks[0], (inplanes, planes), jnp.float32) / math.sqrt(inplanes)
    s1, b1 = _folded_bn(ks[1], planes)
    w2 = jax.random.normal(ks[2], (3, 3, planes, planes), jnp.float32) / (3.0 * math.sqrt(planes))
    s2, b2 = _folded_bn(ks[3], planes)
    w3 = jax.random.normal(ks[4], (planes, c4), jnp.float32) / math.sqrt(planes)
    s3, b3 = _folded_bn(ks[5], c4)

    w1f = (w1 * s1[None, :]).astype(dtype)
    w2f4 = (w2 * s2[None, None, None, :]).astype(dtype)       # (3,3,P,P) HWIO
    w3f = (w3 * s3[None, :]).astype(dtype)

    params = dict(
        dtype=dtype, pad=pad, dil=dil, planes=planes, inplanes=inplanes, c4=c4,
        has_downsample=has_downsample,
        # reference-form folded weights
        w1=w1f, b1=b1.reshape(1, planes),
        w2=w2f4, b2=b2.reshape(1, planes),
        w3=w3f, b3=b3.reshape(1, c4),
        wd=None, bd=None,
        # kernel-form weights
        w2f=w2f4.reshape(9 * planes, planes),                  # im2col GEMM weight
        w3k=w3f, b3k=b3.reshape(1, c4))

    if has_downsample:
        wd = jax.random.normal(ks[6], (inplanes, c4), jnp.float32) / math.sqrt(inplanes)
        sd, bd = _folded_bn(ks[7], c4)
        wdf = (wd * sd[None, :]).astype(dtype)
        params["wd"] = wdf
        params["bd"] = bd.reshape(1, c4)
        # conv3 + downsample fused into one GEMM along K.
        params["w3k"] = jnp.concatenate([w3f, wdf], axis=0)    # (P+Cin, C4)
        params["b3k"] = (b3 + bd).reshape(1, c4)
    else:
        assert inplanes == c4, "identity residual requires inplanes == planes * 4"
    return params


# ----------------------------------------------------------------------------
# Pure-JAX reference (same folded weights / same bf16 rounding points)
# ----------------------------------------------------------------------------
def bottleneck_reference(x_nchw, params):
    dt = params["dtype"]
    pad, dil = params["pad"], params["dil"]
    xc = jnp.transpose(x_nchw, (0, 2, 3, 1)).astype(dt)

    y1 = jnp.einsum("nhwc,cd->nhwd", xc, params["w1"],
                    preferred_element_type=jnp.float32) + params["b1"]
    y1 = jnp.maximum(y1, 0.0).astype(dt)

    y2 = jax.lax.conv_general_dilated(
        y1, params["w2"], (1, 1), ((pad, pad), (pad, pad)),
        rhs_dilation=(dil, dil),
        dimension_numbers=("NHWC", "HWIO", "NHWC"),
        preferred_element_type=jnp.float32) + params["b2"]
    y2 = jnp.maximum(y2, 0.0).astype(dt)

    y3 = jnp.einsum("nhwc,cd->nhwd", y2, params["w3"],
                    preferred_element_type=jnp.float32) + params["b3"]

    if params["wd"] is not None:
        res = jnp.einsum("nhwc,cd->nhwd", xc, params["wd"],
                         preferred_element_type=jnp.float32) + params["bd"]
    else:
        res = xc.astype(jnp.float32)

    out = jnp.maximum(y3 + res, 0.0)
    return jnp.transpose(out, (0, 3, 1, 2))


if __name__ == "__main__":
    key = jax.random.PRNGKey(0)
    kx1, kx2, kp1, kp2 = jax.random.split(key, 4)

    # Config A: identity residual (inplanes == planes*4), dilated conv2 (dilation=2).
    pA = init_bottleneck_params(kp1, inplanes=128, planes=32, stride=1,
                                dilation=2, has_downsample=False)
    xA = jax.random.normal(kx1, (2, 128, 16, 16), jnp.float32)     # NCHW

    # Config B: projection residual (1x1 conv + BN downsample), dilation=1.
    pB = init_bottleneck_params(kp2, inplanes=64, planes=32, stride=1,
                                dilation=1, has_downsample=True)
    xB = jax.random.normal(kx2, (2, 64, 16, 16), jnp.float32)      # NCHW

    for name, x, p in (("identity", xA, pA), ("downsample", xB, pB)):
        fwd = jax.jit(lambda xx, _p=p: bottleneck_forward(xx, _p))
        out = fwd(x)
        jax.block_until_ready(out)
        N, _, H, W = x.shape
        assert out.shape == (N, p["c4"], H, W), (name, out.shape)

        ref = jax.jit(lambda xx, _p=p: bottleneck_reference(xx, _p))(x)
        jax.block_until_ready(ref)
        # Output is bf16; compare with a relative tolerance that covers bf16
        # quantization of the final store (~2^-8) with margin.
        err = float(jnp.max(jnp.abs(out.astype(jnp.float32) - ref)
                            / (jnp.abs(ref) + 1.0)))
        assert err < 2e-2, f"{name}: max relative error vs reference {err}"

    print("KERNEL_OK")
</pallas_src>

<mosaic_0001>
module attributes {stable_mosaic.version = 11 : i64} {
  func.func @_bottleneck_kernel(%arg0: i32, %arg1: memref<1x16x16x128xbf16, #tpu.memory_space<vmem>>, %arg2: memref<128x32xbf16, #tpu.memory_space<vmem>>, %arg3: memref<1x32xf32, #tpu.memory_space<vmem>>, %arg4: memref<288x32xbf16, #tpu.memory_space<vmem>>, %arg5: memref<1x32xf32, #tpu.memory_space<vmem>>, %arg6: memref<32x128xbf16, #tpu.memory_space<vmem>>, %arg7: memref<1x128xf32, #tpu.memory_space<vmem>>, %arg8: memref<1x16x16x128xbf16, #tpu.memory_space<vmem>>, %arg9: memref<20x20x32xbf16, #tpu.memory_space<vmem>>, %arg10: memref<256x288xbf16, #tpu.memory_space<vmem>>) attributes {dimension_semantics = [#tpu.dimension_semantics<parallel>], iteration_bounds = array<i64: 2>, scalar_prefetch = 0 : i64, scratch_operands = 2 : i64, tpu.core_type = #tpu.core_type<tc>, window_params = [{transform_indices = @transform_0, window_bounds = array<i64: 1, 16, 16, 128>}, {pipeline_mode = #tpu.pipeline_mode<synchronous>, transform_indices = @transform_1, window_bounds = array<i64: 128, 32>}, {pipeline_mode = #tpu.pipeline_mode<synchronous>, transform_indices = @transform_2, window_bounds = array<i64: 1, 32>}, {pipeline_mode = #tpu.pipeline_mode<synchronous>, transform_indices = @transform_3, window_bounds = array<i64: 288, 32>}, {pipeline_mode = #tpu.pipeline_mode<synchronous>, transform_indices = @transform_4, window_bounds = array<i64: 1, 32>}, {pipeline_mode = #tpu.pipeline_mode<synchronous>, transform_indices = @transform_5, window_bounds = array<i64: 32, 128>}, {pipeline_mode = #tpu.pipeline_mode<synchronous>, transform_indices = @transform_6, window_bounds = array<i64: 1, 128>}, {transform_indices = @transform_7, window_bounds = array<i64: 1, 16, 16, 128>}]} {
    %c0 = arith.constant 0 : index
    %c0_0 = arith.constant 0 : index
    %c0_1 = arith.constant 0 : index
    %c0_2 = arith.constant 0 : index
    %0 = vector.load %arg1[%c0, %c0_0, %c0_1, %c0_2] : memref<1x16x16x128xbf16, #tpu.memory_space<vmem>>, vector<1x16x16x128xbf16>
    %1 = vector.shape_cast %0 : vector<1x16x16x128xbf16> to vector<16x16x128xbf16>
    %2 = vector.shape_cast %1 : vector<16x16x128xbf16> to vector<256x128xbf16>
    %c0_3 = arith.constant 0 : index
    %c0_4 = arith.constant 0 : index
    %3 = vector.load %arg2[%c0_3, %c0_4] : memref<128x32xbf16, #tpu.memory_space<vmem>>, vector<128x32xbf16>
    %cst = arith.constant dense<0.000000e+00> : vector<256x32xf32>
    %4 = tpu.matmul %2, %3, %cst {dimension_numbers = #tpu.dot_dimension_numbers<[1], [0], [0], [1], [0, 0, 1, 1], [], []>} : vector<256x128xbf16>, vector<128x32xbf16>, vector<256x32xf32> -> vector<256x32xf32>
    %c0_5 = arith.constant 0 : index
    %c0_6 = arith.constant 0 : index
    %5 = vector.load %arg3[%c0_5, %c0_6] : memref<1x32xf32, #tpu.memory_space<vmem>>, vector<1x32xf32>
    %6 = vector.broadcast %5 : vector<1x32xf32> to vector<256x32xf32>
    %7 = arith.addf %4, %6 : vector<256x32xf32>
    %cst_7 = arith.constant 0.000000e+00 : f32
    %8 = vector.broadcast %cst_7 : f32 to vector<256x32xf32>
    %9 = arith.maximumf %7, %8 : vector<256x32xf32>
    %10 = arith.truncf %9 : vector<256x32xf32> to vector<256x32xbf16>
    %cst_8 = arith.constant 0.000000e+00 : bf16
    %11 = vector.broadcast %cst_8 : bf16 to vector<2x20x32xbf16>
    %c0_9 = arith.constant 0 : index
    %c0_10 = arith.constant 0 : index
    %c0_11 = arith.constant 0 : index
    %12 = vector.load %arg9[%c0_9, %c0_10, %c0_11] : memref<20x20x32xbf16, #tpu.memory_space<vmem>>, vector<2x20x32xbf16>
    tpu.vector_store %arg9[%c0_9, %c0_10, %c0_11], %11 {strides = array<i32>} : memref<20x20x32xbf16, #tpu.memory_space<vmem>>, vector<2x20x32xbf16>,
    %cst_12 = arith.constant 0.000000e+00 : bf16
    %13 = vector.broadcast %cst_12 : bf16 to vector<2x20x32xbf16>
    %c18 = arith.constant 18 : index
    %c0_13 = arith.constant 0 : index
    %c0_14 = arith.constant 0 : index
    %14 = vector.load %arg9[%c18, %c0_13, %c0_14] : memref<20x20x32xbf16, #tpu.memory_space<vmem>>, vector<2x20x32xbf16>
    tpu.vector_store %arg9[%c18, %c0_13, %c0_14], %13 {strides = array<i32>} : memref<20x20x32xbf16, #tpu.memory_space<vmem>>, vector<2x20x32xbf16>,
    %cst_15 = arith.constant 0.000000e+00 : bf16
    %15 = vector.broadcast %cst_15 : bf16 to vector<20x2x32xbf16>
    %c0_16 = arith.constant 0 : index
    %c0_17 = arith.constant 0 : index
    %c0_18 = arith.constant 0 : index
    %16 = vector.load %arg9[%c0_16, %c0_17, %c0_18] : memref<20x20x32xbf16, #tpu.memory_space<vmem>>, vector<20x2x32xbf16>
    tpu.vector_store %arg9[%c0_16, %c0_17, %c0_18], %15 {strides = array<i32>} : memref<20x20x32xbf16, #tpu.memory_space<vmem>>, vector<20x2x32xbf16>,
    %cst_19 = arith.constant 0.000000e+00 : bf16
    %17 = vector.broadcast %cst_19 : bf16 to vector<20x2x32xbf16>
    %c0_20 = arith.constant 0 : index
    %c18_21 = arith.constant 18 : index
    %c0_22 = arith.constant 0 : index
    %18 = vector.load %arg9[%c0_20, %c18_21, %c0_22] : memref<20x20x32xbf16, #tpu.memory_space<vmem>>, vector<20x2x32xbf16>
    tpu.vector_store %arg9[%c0_20, %c18_21, %c0_22], %17 {strides = array<i32>} : memref<20x20x32xbf16, #tpu.memory_space<vmem>>, vector<20x2x32xbf16>,
    %19 = vector.shape_cast %10 : vector<256x32xbf16> to vector<16x16x32xbf16>
    %c2 = arith.constant 2 : index
    %c2_23 = arith.constant 2 : index
    %c0_24 = arith.constant 0 : index
    %20 = vector.load %arg9[%c2, %c2_23, %c0_24] : memref<20x20x32xbf16, #tpu.memory_space<vmem>>, vector<16x16x32xbf16>
    tpu.vector_store %arg9[%c2, %c2_23, %c0_24], %19 {strides = array<i32>} : memref<20x20x32xbf16, #tpu.memory_space<vmem>>, vector<16x16x32xbf16>,
    %c0_25 = arith.constant 0 : index
    %c0_26 = arith.constant 0 : index
    %c0_27 = arith.constant 0 : index
    %21 = vector.load %arg9[%c0_25, %c0_26, %c0_27] : memref<20x20x32xbf16, #tpu.memory_space<vmem>>, vector<16x16x32xbf16>
    %22 = vector.shape_cast %21 : vector<16x16x32xbf16> to vector<256x32xbf16>
    %c0_28 = arith.constant 0 : index
    %c0_29 = arith.constant 0 : index
    %23 = vector.load %arg10[%c0_28, %c0_29] : memref<256x288xbf16, #tpu.memory_space<vmem>>, vector<256x32xbf16>
    tpu.vector_store %arg10[%c0_28, %c0_29], %22 {strides = array<i32>} : memref<256x288xbf16, #tpu.memory_space<vmem>>, vector<256x32xbf16>,
    %c0_30 = arith.constant 0 : index
    %c2_31 = arith.constant 2 : index
    %c0_32 = arith.constant 0 : index
    %24 = vector.load %arg9[%c0_30, %c2_31, %c0_32] : memref<20x20x32xbf16, #tpu.memory_space<vmem>>, vector<16x16x32xbf16>
    %25 = vector.shape_cast %24 : vector<16x16x32xbf16> to vector<256x32xbf16>
    %c0_33 = arith.constant 0 : index
    %c32 = arith.constant 32 : index
    %26 = vector.load %arg10[%c0_33, %c32] : memref<256x288xbf16, #tpu.memory_space<vmem>>, vector<256x32xbf16>
    tpu.vector_store %arg10[%c0_33, %c32], %25 {strides = array<i32>} : memref<256x288xbf16, #tpu.memory_space<vmem>>, vector<256x32xbf16>,
    %c0_34 = arith.constant 0 : index
    %c4 = arith.constant 4 : index
    %c0_35 = arith.constant 0 : index
    %27 = vector.load %arg9[%c0_34, %c4, %c0_35] : memref<20x20x32xbf16, #tpu.memory_space<vmem>>, vector<16x16x32xbf16>
    %28 = vector.shape_cast %27 : vector<16x16x32xbf16> to vector<256x32xbf16>
    %c0_36 = arith.constant 0 : index
    %c64 = arith.constant 64 : index
    %29 = vector.load %arg10[%c0_36, %c64] : memref<256x288xbf16, #tpu.memory_space<vmem>>, vector<256x32xbf16>
    tpu.vector_store %arg10[%c0_36, %c64], %28 {strides = array<i32>} : memref<256x288xbf16, #tpu.memory_space<vmem>>, vector<256x32xbf16>,
    %c2_37 = arith.constant 2 : index
    %c0_38 = arith.constant 0 : index
    %c0_39 = arith.constant 0 : index
    %30 = vector.load %arg9[%c2_37, %c0_38, %c0_39] : memref<20x20x32xbf16, #tpu.memory_space<vmem>>, vector<16x16x32xbf16>
    %31 = vector.shape_cast %30 : vector<16x16x32xbf16> to vector<256x32xbf16>
    %c0_40 = arith.constant 0 : index
    %c96 = arith.constant 96 : index
    %32 = vector.load %arg10[%c0_40, %c96] : memref<256x288xbf16, #tpu.memory_space<vmem>>, vector<256x32xbf16>
    tpu.vector_store %arg10[%c0_40, %c96], %31 {strides = array<i32>} : memref<256x288xbf16, #tpu.memory_space<vmem>>, vector<256x32xbf16>,
    %c2_41 = arith.constant 2 : index
    %c2_42 = arith.constant 2 : index
    %c0_43 = arith.constant 0 : index
    %33 = vector.load %arg9[%c2_41, %c2_42, %c0_43] : memref<20x20x32xbf16, #tpu.memory_space<vmem>>, vector<16x16x32xbf16>
    %34 = vector.shape_cast %33 : vector<16x16x32xbf16> to vector<256x32xbf16>
    %c0_44 = arith.constant 0 : index
    %c128 = arith.constant 128 : index
    %35 = vector.load %arg10[%c0_44, %c128] : memref<256x288xbf16, #tpu.memory_space<vmem>>, vector<256x32xbf16>
    tpu.vector_store %arg10[%c0_44, %c128], %34 {strides = array<i32>} : memref<256x288xbf16, #tpu.memory_space<vmem>>, vector<256x32xbf16>,
    %c2_45 = arith.constant 2 : index
    %c4_46 = arith.constant 4 : index
    %c0_47 = arith.constant 0 : index
    %36 = vector.load %arg9[%c2_45, %c4_46, %c0_47] : memref<20x20x32xbf16, #tpu.memory_space<vmem>>, vector<16x16x32xbf16>
    %37 = vector.shape_cast %36 : vector<16x16x32xbf16> to vector<256x32xbf16>
    %c0_48 = arith.constant 0 : index
    %c160 = arith.constant 160 : index
    %38 = vector.load %arg10[%c0_48, %c160] : memref<256x288xbf16, #tpu.memory_space<vmem>>, vector<256x32xbf16>
    tpu.vector_store %arg10[%c0_48, %c160], %37 {strides = array<i32>} : memref<256x288xbf16, #tpu.memory_space<vmem>>, vector<256x32xbf16>,
    %c4_49 = arith.constant 4 : index
    %c0_50 = arith.constant 0 : index
    %c0_51 = arith.constant 0 : index
    %39 = vector.load %arg9[%c4_49, %c0_50, %c0_51] : memref<20x20x32xbf16, #tpu.memory_space<vmem>>, vector<16x16x32xbf16>
    %40 = vector.shape_cast %39 : vector<16x16x32xbf16> to vector<256x32xbf16>
    %c0_52 = arith.constant 0 : index
    %c192 = arith.constant 192 : index
    %41 = vector.load %arg10[%c0_52, %c192] : memref<256x288xbf16, #tpu.memory_space<vmem>>, vector<256x32xbf16>
    tpu.vector_store %arg10[%c0_52, %c192], %40 {strides = array<i32>} : memref<256x288xbf16, #tpu.memory_space<vmem>>, vector<256x32xbf16>,
    %c4_53 = arith.constant 4 : index
    %c2_54 = arith.constant 2 : index
    %c0_55 = arith.constant 0 : index
    %42 = vector.load %arg9[%c4_53, %c2_54, %c0_55] : memref<20x20x32xbf16, #tpu.memory_space<vmem>>, vector<16x16x32xbf16>
    %43 = vector.shape_cast %42 : vector<16x16x32xbf16> to vector<256x32xbf16>
    %c0_56 = arith.constant 0 : index
    %c224 = arith.constant 224 : index
    %44 = vector.load %arg10[%c0_56, %c224] : memref<256x288xbf16, #tpu.memory_space<vmem>>, vector<256x32xbf16>
    tpu.vector_store %arg10[%c0_56, %c224], %43 {strides = array<i32>} : memref<256x288xbf16, #tpu.memory_space<vmem>>, vector<256x32xbf16>,
    %c4_57 = arith.constant 4 : index
    %c4_58 = arith.constant 4 : index
    %c0_59 = arith.constant 0 : index
    %45 = vector.load %arg9[%c4_57, %c4_58, %c0_59] : memref<20x20x32xbf16, #tpu.memory_space<vmem>>, vector<16x16x32xbf16>
    %46 = vector.shape_cast %45 : vector<16x16x32xbf16> to vector<256x32xbf16>
    %c0_60 = arith.constant 0 : index
    %c256 = arith.constant 256 : index
    %47 = vector.load %arg10[%c0_60, %c256] : memref<256x288xbf16, #tpu.memory_space<vmem>>, vector<256x32xbf16>
    tpu.vector_store %arg10[%c0_60, %c256], %46 {strides = array<i32>} : memref<256x288xbf16, #tpu.memory_space<vmem>>, vector<256x32xbf16>,
    %c0_61 = arith.constant 0 : index
    %c0_62 = arith.constant 0 : index
    %48 = vector.load %arg10[%c0_61, %c0_62] : memref<256x288xbf16, #tpu.memory_space<vmem>>, vector<256x288xbf16>
    %c0_63 = arith.constant 0 : index
    %c0_64 = arith.constant 0 : index
    %49 = vector.load %arg4[%c0_63, %c0_64] : memref<288x32xbf16, #tpu.memory_space<vmem>>, vector<288x32xbf16>
    %cst_65 = arith.constant dense<0.000000e+00> : vector<256x32xf32>
    %50 = tpu.matmul %48, %49, %cst_65 {dimension_numbers = #tpu.dot_dimension_numbers<[1], [0], [0], [1], [0, 0, 1, 1], [], []>} : vector<256x288xbf16>, vector<288x32xbf16>, vector<256x32xf32> -> vector<256x32xf32>
    %c0_66 = arith.constant 0 : index
    %c0_67 = arith.constant 0 : index
    %51 = vector.load %arg5[%c0_66, %c0_67] : memref<1x32xf32, #tpu.memory_space<vmem>>, vector<1x32xf32>
    %52 = vector.broadcast %51 : vector<1x32xf32> to vector<256x32xf32>
    %53 = arith.addf %50, %52 : vector<256x32xf32>
    %cst_68 = arith.constant 0.000000e+00 : f32
    %54 = vector.broadcast %cst_68 : f32 to vector<256x32xf32>
    %55 = arith.maximumf %53, %54 : vector<256x32xf32>
    %56 = arith.truncf %55 : vector<256x32xf32> to vector<256x32xbf16>
    %c0_69 = arith.constant 0 : index
    %c0_70 = arith.constant 0 : index
    %57 = vector.load %arg6[%c0_69, %c0_70] : memref<32x128xbf16, #tpu.memory_space<vmem>>, vector<32x128xbf16>
    %cst_71 = arith.constant dense<0.000000e+00> : vector<256x128xf32>
    %58 = tpu.matmul %56, %57, %cst_71 {dimension_numbers = #tpu.dot_dimension_numbers<[1], [0], [0], [1], [0, 0, 1, 1], [], []>} : vector<256x32xbf16>, vector<32x128xbf16>, vector<256x128xf32> -> vector<256x128xf32>
    %c0_72 = arith.constant 0 : index
    %c0_73 = arith.constant 0 : index
    %59 = vector.load %arg7[%c0_72, %c0_73] : memref<1x128xf32, #tpu.memory_space<vmem>>, vector<1x128xf32>
    %60 = vector.broadcast %59 : vector<1x128xf32> to vector<256x128xf32>
    %61 = arith.addf %58, %60 : vector<256x128xf32>
    %62 = arith.extf %2 : vector<256x128xbf16> to vector<256x128xf32>
    %63 = arith.addf %61, %62 : vector<256x128xf32>
    %cst_74 = arith.constant 0.000000e+00 : f32
    %64 = vector.broadcast %cst_74 : f32 to vector<256x128xf32>
    %65 = arith.maximumf %63, %64 : vector<256x128xf32>
    %66 = vector.shape_cast %65 : vector<256x128xf32> to vector<16x16x128xf32>
    %67 = arith.truncf %66 : vector<16x16x128xf32> to vector<16x16x128xbf16>
    %c0_75 = arith.constant 0 : index
    %c0_76 = arith.constant 0 : index
    %c0_77 = arith.constant 0 : index
    %c0_78 = arith.constant 0 : index
    %68 = vector.load %arg8[%c0_75, %c0_76, %c0_77, %c0_78] : memref<1x16x16x128xbf16, #tpu.memory_space<vmem>>, vector<1x16x16x128xbf16>
    %69 = vector.shape_cast %68 : vector<1x16x16x128xbf16> to vector<16x16x128xbf16>
    %70 = vector.shape_cast %67 : vector<16x16x128xbf16> to vector<1x16x16x128xbf16>
    tpu.vector_store %arg8[%c0_75, %c0_76, %c0_77, %c0_78], %70 {strides = array<i32>} : memref<1x16x16x128xbf16, #tpu.memory_space<vmem>>, vector<1x16x16x128xbf16>,
    return
  }
  func.func @transform_0(%arg0: i32) -> (i32, i32, i32, i32) {
    %c0_i32 = arith.constant 0 : i32
    %c0_i32_0 = arith.constant 0 : i32
    %c0_i32_1 = arith.constant 0 : i32
    %c0_i32_2 = arith.constant 0 : i32
    return %arg0, %c0_i32, %c0_i32_0, %c0_i32_1 : i32, i32, i32, i32
  }
  func.func @transform_1(%arg0: i32) -> (i32, i32) {
    %c0_i32 = arith.constant 0 : i32
    %c0_i32_0 = arith.constant 0 : i32
    %c0_i32_1 = arith.constant 0 : i32
    return %c0_i32, %c0_i32_0 : i32, i32
  }
  func.func @transform_2(%arg0: i32) -> (i32, i32) {
    %c0_i32 = arith.constant 0 : i32
    %c0_i32_0 = arith.constant 0 : i32
    %c0_i32_1 = arith.constant 0 : i32
    return %c0_i32, %c0_i32_0 : i32, i32
  }
  func.func @transform_3(%arg0: i32) -> (i32, i32) {
    %c0_i32 = arith.constant 0 : i32
    %c0_i32_0 = arith.constant 0 : i32
    %c0_i32_1 = arith.constant 0 : i32
    return %c0_i32, %c0_i32_0 : i32, i32
  }
  func.func @transform_4(%arg0: i32) -> (i32, i32) {
    %c0_i32 = arith.constant 0 : i32
    %c0_i32_0 = arith.constant 0 : i32
    %c0_i32_1 = arith.constant 0 : i32
    return %c0_i32, %c0_i32_0 : i32, i32
  }
  func.func @transform_5(%arg0: i32) -> (i32, i32) {
    %c0_i32 = arith.constant 0 : i32
    %c0_i32_0 = arith.constant 0 : i32
    %c0_i32_1 = arith.constant 0 : i32
    return %c0_i32, %c0_i32_0 : i32, i32
  }
  func.func @transform_6(%arg0: i32) -> (i32, i32) {
    %c0_i32 = arith.constant 0 : i32
    %c0_i32_0 = arith.constant 0 : i32
    %c0_i32_1 = arith.constant 0 : i32
    return %c0_i32, %c0_i32_0 : i32, i32
  }
  func.func @transform_7(%arg0: i32) -> (i32, i32, i32, i32) {
    %c0_i32 = arith.constant 0 : i32
    %c0_i32_0 = arith.constant 0 : i32
    %c0_i32_1 = arith.constant 0 : i32
    %c0_i32_2 = arith.constant 0 : i32
    return %arg0, %c0_i32, %c0_i32_0, %c0_i32_1 : i32, i32, i32, i32
  }
}

</mosaic_0001>

<bundles_post_ra>
// kernel: _lambda_.1
= control target key start
LH: loop header
LB: loop body
LE: loop exit
PB: predicated region body
PF: predicated region fallthrough
CT: control target
= control target key end

     0   :  { %12 = vsyncpa [#allocation5], 0  ;;  %s7051_s0 = inlined_call_operand.vmem [shape: bf16[2,16,16,128], index: 0, kind: input, shape index: {}]   ;;  %s7052_s1 = inlined_call_operand.vmem [shape: bf16[128,32], index: 1, kind: input, shape index: {}]   ;;  %s7053_s2 = inlined_call_operand.vmem [shape: f32[1,32], index: 2, kind: input, shape index: {}]   ;;  %s7054_s3 = inlined_call_operand.vmem [shape: bf16[288,32], index: 3, kind: input, shape index: {}]   ;;  %s7055_s4 = inlined_call_operand.vmem [shape: f32[1,32], index: 4, kind: input, shape index: {}]   ;;  %s7056_s5 = inlined_call_operand.vmem [shape: bf16[32,128], index: 5, kind: input, shape index: {}]   ;;  %s7057_s6 = inlined_call_operand.vmem [shape: f32[1,128], index: 6, kind: input, shape index: {}]   ;;  %s7058_s7 = inlined_call_operand.hbm [shape: bf16[2,16,16,128], index: 7, kind: output, shape index: {}]  }
   0x1   :  { %14 = vsyncpa [#allocation5 + $0x1], 0  ;;  %s5328_s24 = smov 0   ;;  %s5330_s25 = smov 0  }
   0x2   :  { %s5332_s26 = smov 0   ;;  %s5334_s27 = smov 0  }
   0x3 LB: > { %s5349_s28 = sadd.s32 4294967295, %s5281_s27   ;;  %s4454_s29 = sadd.s32 4294967294, %s5281_s27   ;;  %s5281_s27 = sphi %s5334_s27, %s7070_s27   ;;  %s5277_s26 = sphi %s5332_s26, %s7069_s26   ;;  %s5273_s25 = sphi %s5330_s25, %s7068_s25   ;;  %s5269_s24 = sphi %s5328_s24, %s7067_s24  }
   0x4   : > { %s5353_s30 = sadd.s32 1, %s5281_s27   ;;  %s179_s8 = sadd.s32 1, %s5277_s26 }
   0x5   : > { %s176_s9 = ssub.s32 %s5281_s27, %s5353_s30  ;;  %p189_p0 = scmp.ne.s32.totalorder %s5277_s26, %s5273_s25 }
   0x6   : > { %p177_p1 = scmp.eq.s32.totalorder %s176_s9, 0  ;;  %p190_p2 = scmp.eq.s32.totalorder %s5349_s28, 1 }
   0x7   : > { %p195_p3 = scmp.ne.s32.totalorder %s5273_s25, %s5269_s24  ;;  %p196_p4 = scmp.eq.s32.totalorder %s4454_s29, 1 }
   0x8   : > { %s5364_s10 = scalar_select %p177_p1, %s5277_s26, %s179_s8  }
   0x9   : > { %p5366_p5 = por %p190_p2, %p189_p0  ;;  %p5370_p6 = por %p196_p4, %p195_p3 }
   0xa   : > { %p4457_p7 = scmp.ge.s32.totalorder %s5281_s27, 1  ;;  %p240_p8 = scmp.lt.s32.totalorder %s5281_s27, 3 }
   0xc   : > { %p241_p9 = pnand %p4457_p7, %p240_p8 }
   0xd   : > { %p272_p10 = scmp.lt.s32.totalorder (!%p241_p9), %s5349_s28, 1  ;;  %s5284_s20 = smov (!%p241_p9), 32  }
   0xe   : > { %244 = sbr.rel (%p241_p9) target bundleno = 1109 (0x455), region = 48  ;;  %s5285_s21 = smov (!%p241_p9), 64  }
   0xf   : > { %s5286_s29 = smov (!%p241_p9), 96   ;;  %s5055_s9 = sshll.u32 (!%p241_p9), %s5349_s28, 7 }
  0x10   : > { %s4388_s15 = scalar_lea.hbm (!%p241_p9), %s7058_s7, %s5055_s9  ;;  %s5239_s23 = scalar_lea.hbm (!%p241_p9), %s7058_s7, 256 }
  0x13   : > { %v4986_v0 = vld [vmem:[%s7052_s1 + $0x38] sm:$0xff]  ;;  %v4985_v1 = vld [vmem:[%s7052_s1 + $0x30] sm:$0xff]  ;;  %v4984_v2 = vld [vmem:[%s7052_s1 + $0x28] sm:$0xff]  ;;  %s273_s8 = scalar_select %p272_p10, %s5349_s28, 1  ;;  %vm627_vm0 = vcmask 257024   ;;  %v5283_v17 = vmov 0  }
  0x14   : > { %474 = vmatpush.bf16.msra.mxu0 %v4986_v0  ;;  %5151 = vmatpush.bf16.msra.mxu1 %v4986_v0  ;;  %v4983_v3 = vld [vmem:[%s7052_s1 + $0x20] sm:$0xff]  ;;  %v4982_v4 = vld [vmem:[%s7052_s1 + $0x18] sm:$0xff]  ;;  %v4981_v5 = vld [vmem:[%s7052_s1 + $0x10] sm:$0xff]  ;;  %628 = vst.msk [vmem:[#allocation2] sm:$0xf] %vm627_vm0, %v5283_v17  ;;  %vm1057_vm1 = vcmask 1042432  }
  0x15   : > { %5152 = vmatpush.bf16.msra.mxu2 %v4986_v0  ;;  %v4980_v6 = vld [vmem:[%s7052_s1 + $0x8] sm:$0xff]  ;;  %s4962_s14 = sshll.u32 %s273_s8, 7  ;;  %v4979_v7 = vld [vmem:[%s7052_s1] sm:$0xff]  ;;  %629 = vst.msk [vmem:[#allocation2 + $0x4] sm:$0xf] %vm627_vm0, %v5283_v17  ;;  %vm1058_vm2 = vcmask 1046532  }
  0x16   : > { %s5405_s19 = scalar_lea.vmem %s7051_s0, %s4962_s14  ;;  %632 = vst.msk [vmem:[#allocation2 + $0xc] sm:$0xf] %vm627_vm0, %v5283_v17  ;;  %vm630_vm3 = vcmask 254976   ;;  %vm5432_vm4 = vmor %vm1057_vm1, %vm1058_vm2  ;;  %vm663_vm5 = vcmask 254977   ;;  %vm1397_vm6 = vcmask 1041408   ;;  %vm1398_vm7 = vcmask 1045508  }
  0x17   : > { %v4963_v8 = vld [vmem:[%s5405_s19] sm:$0xff]  ;;  %v4973_v9 = vld [vmem:[%s5405_s19 + $0x50] sm:$0xff]  ;;  %v4964_v11 = vld [vmem:[%s5405_s19 + $0x8] sm:$0xff]  ;;  %633 = vst.msk [vmem:[#allocation2 + $0x10] sm:$0xf] %vm627_vm0, %v5283_v17  ;;  %vm642_vm9 = vcmask 253952  }
  0x18   : > { %475 = vmatpush.bf16.msra.mxu0 %v4985_v1  ;;  %5153 = vmatpush.bf16.msra.mxu1 %v4985_v1  ;;  %v4975_v10 = vld [vmem:[%s5405_s19 + $0x60] sm:$0xff]  ;;  %v4974_v12 = vld [vmem:[%s5405_s19 + $0x58] sm:$0xff]  ;;  %v4965_v13 = vld [vmem:[%s5405_s19 + $0x10] sm:$0xff]  ;;  %636 = vst.msk [vmem:[#allocation2 + $0xd8] sm:$0xf] %vm627_vm0, %v5283_v17  ;;  %vm848_vm10 = vcmask 257025  }
  0x19   : > { %5154 = vmatpush.bf16.msra.mxu2 %v4985_v1  ;;  %v4966_v14 = vld [vmem:[%s5405_s19 + $0x18] sm:$0xff]  ;;  %v4967_v15 = vld [vmem:[%s5405_s19 + $0x20] sm:$0xff]  ;;  %v4968_v16 = vld [vmem:[%s5405_s19 + $0x28] sm:$0xff]  ;;  %637 = vst.msk [vmem:[#allocation2 + $0xdc] sm:$0xf] %vm627_vm0, %v5283_v17  ;;  %vm716_vm11 = vcmask 1040384  }
  0x1a   : > { %639 = vst.msk [vmem:[#allocation2 + $0xe4] sm:$0xf] %vm627_vm0, %v5283_v17  ;;  %v4969_v24 = vld [vmem:[%s5405_s19 + $0x30] sm:$0xff]  ;;  %vm5456_vm8 = vmor %vm1397_vm6, %vm1398_vm7  ;;  %v4970_v53 = vld [vmem:[%s5405_s19 + $0x38] sm:$0xff]  ;;  %vm717_vm12 = vcmask 1044484   ;;  %vm3695_vm14 = vcmask 261120  }
  0x1b   : > { %v961_v18 = vld [vmem:[#allocation2] sm:$0xe]  ;;  %640 = vst.msk [vmem:[#allocation2 + $0xe8] sm:$0xf] %vm627_vm0, %v5283_v17  ;;  %v5541_v58 = vld [vmem:[%s7053_s2] ss:$0 sm:$0xff]  ;;  %vm5563_vm13 = vmor %vm716_vm11, %vm717_vm12 }
  0x1c   : > { %476 = vmatpush.bf16.msra.mxu0 %v4984_v2  ;;  %5155 = vmatpush.bf16.msra.mxu1 %v4984_v2  ;;  %v962_v19 = vld [vmem:[#allocation2 + $0x4] sm:$0xf]  ;;  %v4557_v21 = vrot.slane %v961_v18, 9  ;;  %631 = vst.msk [vmem:[#allocation2 + $0x8] sm:$0x3] %vm630_vm3, %v5283_v17  ;;  %vm1268_vm15 = vcmask 519424  }
  0x1d   : > { %5156 = vmatpush.bf16.msra.mxu2 %v4984_v2  ;;  %v1062_v22 = vrot.slane %v962_v19, 5  ;;  %638 = vst.msk [vmem:[#allocation2 + $0xe0] sm:$0x3] %vm630_vm3, %v5283_v17  ;;  %v1302_v25 = vld [vmem:[#allocation2 + $0x4] sm:$0xf]  ;;  %vm1608_vm1 = vcmask 781824  }
  0x1e   : > { %641 = vst.msk [vmem:[#allocation2 + $0xec] sm:$0x3] %vm630_vm3, %v5283_v17  ;;  %v1301_v27 = vld [vmem:[#allocation2] sm:$0xc]  ;;  %v1402_v32 = vrot.slane %v1302_v25, 6  ;;  %v4972_v25 = vld [vmem:[%s5405_s19 + $0x48] sm:$0xff] }
  0x1f   : > { %v1063_v23 = vsel %vm5432_vm4, %v4557_v21, %v1062_v22  ;;  %682 = vst.msk [vmem:[#allocation2 + $0xe0] sm:$0x2] %vm663_vm5, %v5283_v17  ;;  %v1064_v28 = vrot.slane %v1062_v22, 4  ;;  %v4573_v31 = vrot.slane %v1301_v27, 10  ;;  %v965_v38 = vld [vmem:[#allocation2 + $0x10] sm:$0xf] }
  0x20   : > { %477 = vmatpush.bf16.msra.mxu0 %v4983_v3  ;;  %5157 = vmatpush.bf16.msra.mxu1 %v4983_v3  ;;  %683 = vst.msk [vmem:[#allocation2 + $0xec] sm:$0x2] %vm663_vm5, %v5283_v17  ;;  %v1404_v35 = vrot.slane %v1402_v32, 4  ;;  %v1069_v39 = vrot.slane %v965_v38, 5  ;;  %v1304_v42 = vld [vmem:[#allocation2 + $0xc] sm:$0xc] }
  0x21   : > { %5158 = vmatpush.bf16.msra.mxu2 %v4983_v3  ;;  %1172 = vrot.lane.b32.xlu0 %v1063_v23, %s5284_s20  ;;  %634 = vst.msk [vmem:[#allocation2 + $0x14] sm:$0x3] %vm630_vm3, %v5283_v17  ;;  %v1403_v34 = vsel %vm5456_vm8, %v4573_v31, %v1402_v32  ;;  %v4574_v45 = vrot.slane %v1304_v42, 10  ;;  %v1305_v46 = vld [vmem:[#allocation2 + $0x10] sm:$0xf]  ;;  %v4971_v59 = vld [vmem:[%s5405_s19 + $0x40] sm:$0xff] }
  0x22   : > { %664 = vst.msk [vmem:[#allocation2 + $0x8] sm:$0x2] %vm663_vm5, %v5283_v17  ;;  %1512 = vrot.lane.b32.xlu2 %v1403_v34, %s5285_s21  ;;  %v1071_v43 = vrot.slane %v1069_v39, 4  ;;  %v1409_v48 = vrot.slane %v1305_v46, 6  ;;  %v964_v49 = vld [vmem:[#allocation2 + $0xc] sm:$0xe] }
  0x23   : > { %v963_v26 = vld [vmem:[#allocation2 + $0x8] sm:$0x1]  ;;  %666 = vst.msk [vmem:[#allocation2 + $0x20] sm:$0x2] %vm663_vm5, %v5283_v17  ;;  %v4558_v50 = vrot.slane %v964_v49, 9  ;;  %vm1801_vm2 = vcmask 1044224  }
  0x24   : > { %478 = vmatpush.bf16.msra.mxu0 %v4982_v4  ;;  %5159 = vmatpush.bf16.msra.mxu1 %v4982_v4  ;;  %v1065_v29 = vrot.slane %v963_v26, 5  ;;  %667 = vst.msk [vmem:[#allocation2 + $0x2c] sm:$0x2] %vm663_vm5, %v5283_v17  ;;  %v1410_v51 = vsel %vm5456_vm8, %v4574_v45, %v1409_v48  ;;  %v1411_v54 = vrot.slane %v1409_v48, 4  ;;  %v5052_v48 = vld [vmem:[%s7054_s3 + $0x88] sm:$0xff] }
  0x25   : > { %5160 = vmatpush.bf16.msra.mxu2 %v4982_v4  ;;  %668 = vst.msk [vmem:[#allocation2 + $0x38] sm:$0x2] %vm663_vm5, %v5283_v17  ;;  %v1070_v52 = vsel %vm5432_vm4, %v4558_v50, %v1069_v39  ;;  %5167 = vmatpush.bf16.msra.mxu3 %v5052_v48 }
  0x26   : > { %v1066_v33 = vsel %vm5432_vm4, %v1064_v28, %v1065_v29  ;;  %669 = vst.msk [vmem:[#allocation2 + $0x44] sm:$0x2] %vm663_vm5, %v5283_v17 }
  0x27   : > { %1174 = vrot.lane.b32.xlu1 %v1066_v33, %s5284_s20  ;;  %670 = vst.msk [vmem:[#allocation2 + $0x50] sm:$0x2] %vm663_vm5, %v5283_v17 }
  0x28   : > { %479 = vmatpush.bf16.msra.mxu0 %v4981_v5  ;;  %5161 = vmatpush.bf16.msra.mxu1 %v4981_v5  ;;  %671 = vst.msk [vmem:[#allocation2 + $0x5c] sm:$0x2] %vm663_vm5, %v5283_v17  ;;  %v966_v41 = vld [vmem:[#allocation2 + $0x14] sm:$0x1] }
  0x29   : > { %5162 = vmatpush.bf16.msra.mxu2 %v4981_v5  ;;  %672 = vst.msk [vmem:[#allocation2 + $0x68] sm:$0x2] %vm663_vm5, %v5283_v17  ;;  %v1303_v36 = vld [vmem:[#allocation2 + $0x8] sm:$0x3]  ;;  %v1072_v44 = vrot.slane %v966_v41, 5 }
  0x2a   : > { %673 = vst.msk [vmem:[#allocation2 + $0x74] sm:$0x2] %vm663_vm5, %v5283_v17  ;;  %v1405_v37 = vrot.slane %v1303_v36, 6  ;;  %1516 = vrot.lane.b32.xlu2 %v1410_v51, %s5285_s21 }
  0x2b   : > { %674 = vst.msk [vmem:[#allocation2 + $0x80] sm:$0x2] %vm663_vm5, %v5283_v17  ;;  %v1073_v47 = vsel %vm5432_vm4, %v1071_v43, %v1072_v44 }
  0x2c   : > { %480 = vmatpush.bf16.msra.mxu0 %v4980_v6  ;;  %5163 = vmatpush.bf16.msra.mxu1 %v4980_v6  ;;  %675 = vst.msk [vmem:[#allocation2 + $0x8c] sm:$0x2] %vm663_vm5, %v5283_v17  ;;  %v1406_v40 = vsel %vm5456_vm8, %v1404_v35, %v1405_v37 }
  0x2d   : > { %5164 = vmatpush.bf16.msra.mxu2 %v4980_v6  ;;  %676 = vst.msk [vmem:[#allocation2 + $0x98] sm:$0x2] %vm663_vm5, %v5283_v17  ;;  %1514 = vrot.lane.b32.xlu0 %v1406_v40, %s5285_s21 }
  0x2e   : > { %677 = vst.msk [vmem:[#allocation2 + $0xa4] sm:$0x2] %vm663_vm5, %v5283_v17 }
  0x2f   : > { %678 = vst.msk [vmem:[#allocation2 + $0xb0] sm:$0x2] %vm663_vm5, %v5283_v17  ;;  %1178 = vrot.lane.b32.xlu1 %v1073_v47, %s5284_s20 }
  0x30   : > { %481 = vmatpush.bf16.msra.mxu0 %v4979_v7  ;;  %5165 = vmatpush.bf16.msra.mxu1 %v4979_v7  ;;  %679 = vst.msk [vmem:[#allocation2 + $0xbc] sm:$0x2] %vm663_vm5, %v5283_v17 }
  0x31   : > { %5166 = vmatpush.bf16.msra.mxu2 %v4979_v7  ;;  %680 = vst.msk [vmem:[#allocation2 + $0xc8] sm:$0x2] %vm663_vm5, %v5283_v17 }
  0x32   : > { %681 = vst.msk [vmem:[#allocation2 + $0xd4] sm:$0x2] %vm663_vm5, %v5283_v17 }
  0x33   : > { %482 = vmatmul.bf16.vlgmr.msra.gmra.mxu0 %v4963_v8  ;;  %532 = vmatmul.bf16.vlgmr.msra.gmra.mxu1 %v4973_v9  ;;  %665 = vst.msk [vmem:[#allocation2 + $0x14] sm:$0x2] %vm663_vm5, %v5283_v17 }
  0x34   : > { %542 = vmatmul.bf16.vlgmr.msra.gmra.mxu2 %v4975_v10  ;;  %643 = vst.msk [vmem:[#allocation2] sm:$0x1] %vm642_vm9, %v5283_v17  ;;  %3928 = vmatpush.bf16.msrb.mxu0 %v5052_v48 }
  0x35   : > { %644 = vst.msk [vmem:[#allocation2 + $0xc] sm:$0x1] %vm642_vm9, %v5283_v17  ;;  %1176 = vrot.lane.b32.xlu0 %v1070_v52, %s5284_s20 }
  0x36   : > { %645 = vst.msk [vmem:[#allocation2 + $0x18] sm:$0x1] %vm642_vm9, %v5283_v17 }
  0x37   : > { %646 = vst.msk [vmem:[#allocation2 + $0x24] sm:$0x1] %vm642_vm9, %v5283_v17 }
  0x38   : > { %647 = vst.msk [vmem:[#allocation2 + $0x30] sm:$0x1] %vm642_vm9, %v5283_v17 }
  0x39   : > { %648 = vst.msk [vmem:[#allocation2 + $0x3c] sm:$0x1] %vm642_vm9, %v5283_v17 }
  0x3a   : > { %649 = vst.msk [vmem:[#allocation2 + $0x48] sm:$0x1] %vm642_vm9, %v5283_v17  ;;  %v1306_v55 = vld [vmem:[#allocation2 + $0x14] sm:$0x3] }
  0x3b   : > { %650 = vst.msk [vmem:[#allocation2 + $0x54] sm:$0x1] %vm642_vm9, %v5283_v17  ;;  %v1412_v56 = vrot.slane %v1306_v55, 6 }
  0x3c   : > { %651 = vst.msk [vmem:[#allocation2 + $0x60] sm:$0x1] %vm642_vm9, %v5283_v17 }
  0x3d   : > { %652 = vst.msk [vmem:[#allocation2 + $0x6c] sm:$0x1] %vm642_vm9, %v5283_v17  ;;  %v1413_v57 = vsel %vm5456_vm8, %v1411_v54, %v1412_v56 }
  0x3e   : > { %653 = vst.msk [vmem:[#allocation2 + $0x78] sm:$0x1] %vm642_vm9, %v5283_v17  ;;  %1518 = vrot.lane.b32.xlu0 %v1413_v57, %s5285_s21 }
  0x3f   : > { %654 = vst.msk [vmem:[#allocation2 + $0x84] sm:$0x1] %vm642_vm9, %v5283_v17 }
  0x40   : > { %655 = vst.msk [vmem:[#allocation2 + $0x90] sm:$0x1] %vm642_vm9, %v5283_v17 }
  0x41   : > { %656 = vst.msk [vmem:[#allocation2 + $0x9c] sm:$0x1] %vm642_vm9, %v5283_v17 }
  0x42   : > { %657 = vst.msk [vmem:[#allocation2 + $0xa8] sm:$0x1] %vm642_vm9, %v5283_v17 }
  0x43   : > { %487 = vmatmul.bf16.gmra.mxu0 %v4964_v11  ;;  %537 = vmatmul.bf16.gmra.mxu1 %v4974_v12  ;;  %658 = vst.msk [vmem:[#allocation2 + $0xb4] sm:$0x1] %vm642_vm9, %v5283_v17 }
  0x44   : > { %659 = vst.msk [vmem:[#allocation2 + $0xc0] sm:$0x1] %vm642_vm9, %v5283_v17 }
  0x45   : > { %660 = vst.msk [vmem:[#allocation2 + $0xcc] sm:$0x1] %vm642_vm9, %v5283_v17 }
  0x46   : > { %661 = vst.msk [vmem:[#allocation2 + $0xd8] sm:$0x1] %vm642_vm9, %v5283_v17 }
  0x47   : > { %662 = vst.msk [vmem:[#allocation2 + $0xe4] sm:$0x1] %vm642_vm9, %v5283_v17 }
  0x53   : > { %492 = vmatmul.bf16.gmra.mxu0 %v4965_v13 }
  0x63   : > { %497 = vmatmul.bf16.gmra.mxu0 %v4966_v14 }
  0x73   : > { %502 = vmatmul.bf16.gmra.mxu0 %v4967_v15 }
  0x83   : > { %507 = vmatmul.bf16.gmra.mxu0 %v4968_v16 }
  0x93   : > { %512 = vmatmul.bf16.gmra.mxu0 %v4969_v24 }
  0xa3   : > { %517 = vmatmul.bf16.gmra.mxu0 %v4970_v53 }
  0xb0   : > { %v483_v60 = vpop.f32.mrf.mxu0  ;;  %v533_v61 = vpop.f32.mrf.mxu1 }
  0xb1   : > { %v484_v62 = vadd.f32 %v5541_v58, %v483_v60  ;;  %v534_v63 = vadd.f32 %v5541_v58, %v533_v61 }
  0xb3   : > { %v563_v0 = vmax.f32 %v484_v62, 0.0  ;;  %v583_v1 = vmax.f32 %v534_v63, 0.0  ;;  %522 = vmatmul.bf16.gmra.mxu0 %v4971_v59 }
  0xb5   : > { %v595_v2 = vpack.c.bf16 %v563_v0, %v563_v0  ;;  %v615_v3 = vpack.c.bf16 %v583_v1, %v583_v1 }
  0xb7   : > { %v719_v4 = vrot.slane %v595_v2, 7  ;;  %v769_v5 = vrot.slane %v615_v3, 7  ;;  %v543_v6 = vpop.f32.mrf.mxu2 }
  0xb8   : > { %v485_v7 = vpop.f32.mrf.mxu0  ;;  %v535_v8 = vpop.f32.mrf.mxu1  ;;  %v544_v9 = vadd.f32 %v5541_v58, %v543_v6 }
  0xb9   : > { %849 = vst.msk [vmem:[#allocation2 + $0x18] sm:$0xe] %vm848_vm10, %v719_v4  ;;  %v486_v10 = vadd.f32 %v5541_v58, %v485_v7  ;;  %v536_v11 = vadd.f32 %v5541_v58, %v535_v8  ;;  %v720_v21 = vrot.slane %v719_v4, 4  ;;  %v770_v22 = vrot.slane %v769_v5, 4 }
  0xba   : > { %879 = vst.msk [vmem:[#allocation2 + $0x90] sm:$0xe] %vm848_vm10, %v769_v5  ;;  %v587_v12 = vmax.f32 %v544_v9, 0.0  ;;  %v5051_v5 = vld [vmem:[%s7054_s3 + $0x80] sm:$0xff] }
  0xbb   : > { %v564_v13 = vmax.f32 %v486_v10, 0.0  ;;  %v584_v14 = vmax.f32 %v536_v11, 0.0  ;;  %5168 = vmatpush.bf16.msra.mxu3 %v5051_v5  ;;  %3929 = vmatpush.bf16.msrb.mxu0 %v5051_v5 }
  0xbc   : > { %v619_v15 = vpack.c.bf16 %v587_v12, %v587_v12 }
  0xbd   : > { %v596_v16 = vpack.c.bf16 %v564_v13, %v564_v13  ;;  %v616_v17 = vpack.c.bf16 %v584_v14, %v584_v14 }
  0xbe   : > { %v779_v19 = vrot.slane %v619_v15, 7 }
  0xbf   : > { %v721_v23 = vrot.slane %v596_v16, 7  ;;  %v771_v24 = vrot.slane %v616_v17, 7  ;;  %v545_v26 = vpop.f32.mrf.mxu2 }
  0xc0   : > { %885 = vst.msk [vmem:[#allocation2 + $0xa8] sm:$0xe] %vm848_vm10, %v779_v19  ;;  %v488_v27 = vpop.f32.mrf.mxu0  ;;  %v1641_v28 = vld [vmem:[#allocation2 + $0x18] sm:$0xf]  ;;  %v546_v29 = vadd.f32 %v5541_v58, %v545_v26  ;;  %v538_v31 = vpop.f32.mrf.mxu1  ;;  %v780_v40 = vrot.slane %v779_v19, 4 }
  0xc1   : > { %v722_v32 = vsel %vm5563_vm13, %v720_v21, %v721_v23  ;;  %v723_v33 = vrot.slane %v721_v23, 4  ;;  %v772_v34 = vsel %vm5563_vm13, %v770_v22, %v771_v24  ;;  %v773_v35 = vrot.slane %v771_v24, 4  ;;  %v2459_v36 = vld [vmem:[#allocation2 + $0x90] sm:$0xf]  ;;  %1705 = vrot.lane.b32.xlu1 %v1641_v28, %s5286_s29  ;;  %v2106_v59 = vld [vmem:[#allocation2 + $0x18] sm:$0xc] }
  0xc2   : > { %850 = vst.msk [vmem:[#allocation2 + $0x1c] sm:$0xf] %vm627_vm0, %v722_v32  ;;  %v489_v37 = vadd.f32 %v5541_v58, %v488_v27  ;;  %2539 = vrot.lane.b32.xlu2 %v2459_v36, %s5285_s21  ;;  %v588_v38 = vmax.f32 %v546_v29, 0.0  ;;  %v539_v39 = vadd.f32 %v5541_v58, %v538_v31  ;;  %v2659_v55 = vld [vmem:[#allocation2 + $0x90] sm:$0xe]  ;;  %v4605_v8 = vrot.slane %v2106_v59, 10 }
  0xc3   : > { %851 = vst.msk [vmem:[#allocation2 + $0x20] sm:$0x1] %vm642_vm9, %v723_v33  ;;  %527 = vmatmul.bf16.gmra.mxu0 %v4972_v25  ;;  %v4629_v6 = vrot.slane %v2659_v55, 9  ;;  %v1307_v33 = vld [vmem:[#allocation2 + $0x18] sm:$0xc] }
  0xc4   : > { %880 = vst.msk [vmem:[#allocation2 + $0x94] sm:$0xf] %vm627_vm0, %v772_v34  ;;  %v565_v41 = vmax.f32 %v489_v37, 0.0  ;;  %v620_v42 = vpack.c.bf16 %v588_v38, %v588_v38  ;;  %v585_v43 = vmax.f32 %v539_v39, 0.0 }
  0xc5   : > { %881 = vst.msk [vmem:[#allocation2 + $0x98] sm:$0x1] %vm642_vm9, %v773_v35 }
  0xc6   : > { %v597_v44 = vpack.c.bf16 %v565_v41, %v565_v41  ;;  %v781_v45 = vrot.slane %v620_v42, 7  ;;  %v617_v46 = vpack.c.bf16 %v585_v43, %v585_v43 }
  0xc7   : > { %v2463_v47 = vld [vmem:[#allocation2 + $0xa8] sm:$0xf] }
  0xc8   : > { %v724_v49 = vrot.slane %v597_v44, 7  ;;  %v782_v50 = vsel %vm5563_vm13, %v780_v40, %v781_v45  ;;  %v783_v51 = vrot.slane %v781_v45, 4  ;;  %v490_v52 = vpop.f32.mrf.mxu0  ;;  %v540_v53 = vpop.f32.mrf.mxu1  ;;  %v774_v57 = vrot.slane %v617_v46, 7  ;;  %v3001_v60 = vld [vmem:[#allocation2 + $0xa8] sm:$0xc] }
  0xc9   : > { %886 = vst.msk [vmem:[#allocation2 + $0xac] sm:$0xf] %vm627_vm0, %v782_v50  ;;  %v491_v54 = vadd.f32 %v5541_v58, %v490_v52  ;;  %v541_v56 = vadd.f32 %v5541_v58, %v540_v53  ;;  %v5594_v0 = vld [vmem:[#allocation2 + $0x1c] sm:$0xf]  ;;  %v4647_v9 = vrot.slane %v3001_v60, 10  ;;  %v4575_v44 = vrot.slane %v1307_v33, 10 }
  0xca   : > { %852 = vst.msk [vmem:[#allocation2 + $0x24] sm:$0xe] %vm848_vm10, %v724_v49  ;;  %2547 = vrot.lane.b32.xlu2 %v2463_v47, %s5285_s21  ;;  %v725_v61 = vrot.slane %v724_v49, 4  ;;  %v5599_v4 = vld [vmem:[#allocation2 + $0x1c] sm:$0xf]  ;;  %v2204_v11 = vrot.slane %v5594_v0, 6 }
  0xcb   : > { %887 = vst.msk [vmem:[#allocation2 + $0xb0] sm:$0x1] %vm642_vm9, %v783_v51  ;;  %v566_v62 = vmax.f32 %v491_v54, 0.0  ;;  %v2460_v63 = vld [vmem:[#allocation2 + $0x94] sm:$0xf]  ;;  %v586_v3 = vmax.f32 %v541_v56, 0.0 }
  0xcc   : > { %882 = vst.msk [vmem:[#allocation2 + $0x9c] sm:$0xe] %vm848_vm10, %v774_v57  ;;  %2541 = vrot.lane.b32.xlu0 %v2460_v63, %s5285_s21  ;;  %v5597_v2 = vld [vmem:[#allocation2 + $0x94] sm:$0xf]  ;;  %v775_v14 = vrot.slane %v774_v57, 4  ;;  %v1076_v19 = vrot.slane %v5599_v4, 5  ;;  %v2205_v31 = vsel %vm5456_vm8, %v4605_v8, %v2204_v11 }
  0xcd   : > { %v598_v1 = vpack.c.bf16 %v566_v62, %v566_v62  ;;  %v2789_v7 = vrot.slane %v5597_v2, 5  ;;  %v618_v12 = vpack.c.bf16 %v586_v3, %v586_v3  ;;  %v969_v17 = vld [vmem:[#allocation2 + $0x20] sm:$0x1]  ;;  %v1642_v25 = vld [vmem:[#allocation2 + $0x1c] sm:$0xf] }
  0xce   : > { %v5615_v26 = vld [vmem:[#allocation2 + $0x1c] sm:$0xf]  ;;  %v1079_v32 = vrot.slane %v969_v17, 5  ;;  %v1078_v38 = vrot.slane %v1076_v19, 4  ;;  %v2137_v41 = vld [vmem:[#allocation2 + $0x94] sm:$0xf] }
  0xcf   : > { %v726_v10 = vrot.slane %v598_v1, 7  ;;  %v2790_v15 = vsel %vm5432_vm4, %v4629_v6, %v2789_v7  ;;  %v776_v28 = vrot.slane %v618_v12, 7  ;;  %v1416_v40 = vrot.slane %v5615_v26, 6  ;;  %v967_v45 = vld [vmem:[#allocation2 + $0x18] sm:$0xe] }
  0xd0   : > { %v3002_v13 = vld [vmem:[#allocation2 + $0xac] sm:$0xf]  ;;  %v493_v16 = vpop.f32.mrf.mxu0  ;;  %2875 = vrot.lane.b32.xlu1 %v2790_v15, %s5286_s29  ;;  %v1080_v46 = vsel %vm5432_vm4, %v1078_v38, %v1079_v32  ;;  %v2274_v48 = vrot.slane %v2137_v41, 6  ;;  %v2138_v52 = vld [vmem:[#allocation2 + $0x98] sm:$0x3]  ;;  %v4559_v53 = vrot.slane %v967_v45, 9 }
  0xd1   : > { %v3139_v21 = vrot.slane %v3002_v13, 6  ;;  %v727_v22 = vsel %vm5563_vm13, %v725_v61, %v726_v10  ;;  %v728_v23 = vrot.slane %v726_v10, 4  ;;  %v494_v24 = vadd.f32 %v5541_v58, %v493_v16  ;;  %v2661_v54 = vld [vmem:[#allocation2 + $0x98] sm:$0x1]  ;;  %v2136_v1 = vld [vmem:[#allocation2 + $0x90] sm:$0xc] }
  0xd2   : > { %v3003_v27 = vld [vmem:[#allocation2 + $0xb0] sm:$0x3]  ;;  %853 = vst.msk [vmem:[#allocation2 + $0x28] sm:$0xf] %vm627_vm0, %v727_v22  ;;  %1707 = vrot.lane.b32.xlu2 %v1642_v25, %s5286_s29  ;;  %v777_v36 = vsel %vm5563_vm13, %v775_v14, %v776_v28  ;;  %v778_v37 = vrot.slane %v776_v28, 4  ;;  %v1417_v51 = vsel %vm5456_vm8, %v4575_v44, %v1416_v40  ;;  %v1077_v56 = vsel %vm5432_vm4, %v4559_v53, %v1076_v19 }
  0xd3   : > { %854 = vst.msk [vmem:[#allocation2 + $0x2c] sm:$0x1] %vm642_vm9, %v728_v23  ;;  %v567_v29 = vmax.f32 %v494_v24, 0.0  ;;  %v3140_v34 = vsel %vm5456_vm8, %v4647_v9, %v3139_v21  ;;  %v3142_v35 = vrot.slane %v3003_v27, 6  ;;  %v3141_v42 = vrot.slane %v3139_v21, 4 }
  0xd4   : > { %3231 = vst.msk [vmem:[#allocation3 + $0xf8] sm:$0xf] %vm627_vm0, %v3140_v34  ;;  %2314 = vrot.lane.b32.xlu0 %v2205_v31, %s5284_s20  ;;  %v2276_v57 = vrot.slane %v2274_v48, 4  ;;  %v2277_v59 = vrot.slane %v2138_v52, 6  ;;  %v2791_v62 = vrot.slane %v2789_v7, 4  ;;  %v2792_v63 = vrot.slane %v2661_v54, 5 }
  0xd5   : > { %v599_v39 = vpack.c.bf16 %v567_v29, %v567_v29  ;;  %883 = vst.msk [vmem:[#allocation2 + $0xa0] sm:$0xf] %vm627_vm0, %v777_v36  ;;  %v3143_v49 = vsel %vm5456_vm8, %v3141_v42, %v3142_v35  ;;  %v5651_v3 = vld [vmem:[#allocation2 + $0x94] sm:$0xf]  ;;  %v5653_v6 = vld [vmem:[#allocation2 + $0x90] sm:$0xc] }
  0xd6   : > { %884 = vst.msk [vmem:[#allocation2 + $0xa4] sm:$0x1] %vm642_vm9, %v778_v37  ;;  %v2278_v8 = vsel %vm5456_vm8, %v2276_v57, %v2277_v59  ;;  %v5657_v10 = vld [vmem:[#allocation2 + $0xac] sm:$0xf]  ;;  %v2793_v13 = vsel %vm5432_vm4, %v2791_v62, %v2792_v63  ;;  %v1834_v15 = vld [vmem:[#allocation2 + $0x18] sm:$0xe] }
  0xd7   : > { %v729_v43 = vrot.slane %v599_v39, 7  ;;  %3232 = vst.msk [vmem:[#allocation3 + $0x104] sm:$0xf] %vm627_vm0, %v3143_v49  ;;  %v3125_v16 = vrot.slane %v5651_v3, 6  ;;  %v4615_v17 = vrot.slane %v2136_v1, 10  ;;  %v2803_v24 = vrot.slane %v5657_v10, 5 }
  0xd8   : > { %v495_v47 = vpop.f32.mrf.mxu0  ;;  %1182 = vrot.lane.b32.xlu1 %v1080_v46, %s5284_s20  ;;  %v2108_v21 = vld [vmem:[#allocation2 + $0x20] sm:$0x3]  ;;  %v5669_v23 = vld [vmem:[#allocation2 + $0xa8] sm:$0xe]  ;;  %v4645_v25 = vrot.slane %v5653_v6, 10  ;;  %v4589_v29 = vrot.slane %v1834_v15, 9 }
  0xd9   : > { %855 = vst.msk [vmem:[#allocation2 + $0x30] sm:$0xe] %vm848_vm10, %v729_v43  ;;  %v496_v50 = vadd.f32 %v5541_v58, %v495_v47  ;;  %v730_v60 = vrot.slane %v729_v43, 4  ;;  %v2275_v27 = vsel %vm5456_vm8, %v4615_v17, %v2274_v48  ;;  %v5676_v28 = vld [vmem:[#allocation2 + $0xb0] sm:$0x1]  ;;  %v5679_v36 = vrot.slane %v3125_v16, 4 }
  0xda   : > { %1520 = vrot.lane.b32.xlu2 %v1417_v51, %s5285_s21  ;;  %v901_v31 = vld [vmem:[#allocation2 + $0x18] sm:$0xf]  ;;  %v1643_v34 = vld [vmem:[#allocation2 + $0x24] sm:$0xf]  ;;  %v2461_v35 = vld [vmem:[#allocation2 + $0x9c] sm:$0xf]  ;;  %v3126_v59 = vsel %vm5456_vm8, %v4645_v25, %v3125_v16 }
  0xdb   : > { %v568_v55 = vmax.f32 %v496_v50, 0.0  ;;  %v4783_v5 = vld [vmem:[#allocation3 + $0xf8] sm:$0xf]  ;;  %v2206_v37 = vrot.slane %v2204_v11, 4  ;;  %v2207_v38 = vrot.slane %v2108_v21, 6  ;;  %v4631_v39 = vrot.slane %v5669_v23, 9 }
  0xdc   : > { %1180 = vrot.lane.b32.xlu0 %v1077_v56, %s5284_s20  ;;  %v5684_v41 = vld [vmem:[#allocation2 + $0x20] sm:$0x3]  ;;  %v2805_v43 = vrot.slane %v2803_v24, 4  ;;  %v2806_v44 = vrot.slane %v5676_v28, 5  ;;  %v5691_v45 = vrot.slane %v1416_v40, 4 }
  0xdd   : > { %v600_v61 = vpack.c.bf16 %v568_v55, %v568_v55  ;;  %v1835_v46 = vld [vmem:[#allocation2 + $0x1c] sm:$0xf]  ;;  %933 = vst.msk [vmem:[#allocation3 + $0x30] sm:$0xf] %vm627_vm0, %v901_v31  ;;  %v1419_v52 = vrot.slane %v5684_v41, 6  ;;  %v2804_v17 = vsel %vm5432_vm4, %v4631_v39, %v2803_v24 }
  0xde   : > { %v5019_v14 = vld [vmem:[#allocation3 + $0x100] sm:$0xf0]  ;;  %v1932_v0 = vrot.slane %v1835_v46, 5  ;;  %v902_v11 = vld [vmem:[#allocation2 + $0x1c] sm:$0xf]  ;;  %v2807_v21 = vsel %vm5432_vm4, %v2805_v43, %v2806_v44 }
  0xdf   : > { %v731_v4 = vrot.slane %v600_v61, 7  ;;  %v4784_v19 = vor.u32 %v5019_v14, %v4783_v5  ;;  %934 = vst.msk [vmem:[#allocation3 + $0x3c] sm:$0xf] %vm627_vm0, %v902_v11  ;;  %v1865_v57 = vld [vmem:[#allocation2 + $0x94] sm:$0xf]  ;;  %v2208_v61 = vsel %vm5456_vm8, %v2206_v37, %v2207_v38  ;;  %v1420_v39 = vsel %vm5456_vm8, %v5691_v45, %v1419_v52 }
  0xe0   : > { %v498_v9 = vpop.f32.mrf.mxu0  ;;  %2356 = vrot.lane.b32.xlu1 %v2278_v8, %s5284_s20  ;;  %v2971_v32 = vld [vmem:[#allocation2 + $0x30] sm:$0xc]  ;;  %v1933_v53 = vsel %vm5432_vm4, %v4589_v29, %v1932_v0  ;;  %v1934_v54 = vrot.slane %v1932_v0, 4  ;;  %v1866_v63 = vld [vmem:[#allocation2 + $0x98] sm:$0x1]  ;;  %v2002_v1 = vrot.slane %v1865_v57, 5 }
  0xe1   : > { %v732_v12 = vsel %vm5563_vm13, %v730_v60, %v731_v4  ;;  %v733_v2 = vrot.slane %v731_v4, 4  ;;  %v499_v7 = vadd.f32 %v5541_v58, %v498_v9  ;;  %4927 = vmatmul.msk.bf16.vlgmr.msra.gmra.mxu3 %vm3695_vm14, %v4784_v19  ;;  %v4637_v47 = vrot.slane %v2971_v32, 10  ;;  %2074 = vst.msk [vmem:[#allocation3 + $0x4] sm:$0xf] %vm627_vm0, %v1933_v53  ;;  %v1864_v3 = vld [vmem:[#allocation2 + $0x90] sm:$0xe] }
  0xe2   : > { %856 = vst.msk [vmem:[#allocation2 + $0x34] sm:$0xf] %vm627_vm0, %v732_v12  ;;  %2877 = vrot.lane.b32.xlu2 %v2793_v13, %s5286_s29  ;;  %v2005_v5 = vrot.slane %v1866_v63, 5  ;;  %v4599_v6 = vrot.slane %v1864_v3, 9  ;;  %v1836_v8 = vld [vmem:[#allocation2 + $0x20] sm:$0x1] }
  0xe3   : > { %857 = vst.msk [vmem:[#allocation2 + $0x38] sm:$0x1] %vm642_vm9, %v733_v2  ;;  %v569_v22 = vmax.f32 %v499_v7, 0.0  ;;  %v2004_v12 = vrot.slane %v2002_v1, 4  ;;  %v1935_v2 = vrot.slane %v1836_v8, 5 }
  0xe4   : > { %2354 = vrot.lane.b32.xlu0 %v2275_v27, %s5284_s20  ;;  %v2997_v7 = vld [vmem:[#allocation2 + $0x98] sm:$0x3]  ;;  %3227 = vst.msk [vmem:[#allocation3 + $0xc8] sm:$0xf] %vm627_vm0, %v3126_v59  ;;  %v2662_v14 = vld [vmem:[#allocation2 + $0x9c] sm:$0xe]  ;;  %v2003_v15 = vsel %vm5432_vm4, %v4599_v6, %v2002_v1 }
  0xe5   : > { %v601_v33 = vpack.c.bf16 %v569_v22, %v569_v22  ;;  %v3128_v16 = vrot.slane %v2997_v7, 6  ;;  %v5723_v22 = vld [vmem:[#allocation2 + $0xa0] sm:$0xf]  ;;  %v2006_v23 = vsel %vm5432_vm4, %v2004_v12, %v2005_v5  ;;  %2094 = vst.msk [vmem:[#allocation3 + $0xf4] sm:$0xf] %vm627_vm0, %v2003_v15  ;;  %v1936_v24 = vsel %vm5432_vm4, %v1934_v54, %v1935_v2 }
  0xe6   : > { %v1838_v25 = vld [vmem:[#allocation2 + $0x28] sm:$0xf]  ;;  %2095 = vst.msk [vmem:[#allocation3 + $0x100] sm:$0xf] %vm627_vm0, %v2006_v23  ;;  %v4630_v31 = vrot.slane %v2662_v14, 9  ;;  %v2796_v41 = vrot.slane %v5723_v22, 5 }
  0xe7   : > { %v734_v42 = vrot.slane %v601_v33, 7  ;;  %v904_v29 = vld [vmem:[#allocation2 + $0x28] sm:$0xf]  ;;  %v1839_v32 = vld [vmem:[#allocation2 + $0x2c] sm:$0x1]  ;;  %v1939_v33 = vrot.slane %v1838_v25, 5  ;;  %v3129_v38 = vsel %vm5456_vm8, %v5679_v36, %v3128_v16 }
  0xe8   : > { %v500_v48 = vpop.f32.mrf.mxu0  ;;  %1709 = vrot.lane.b32.xlu1 %v1643_v34, %s5286_s29  ;;  %v1942_v37 = vrot.slane %v1839_v32, 5  ;;  %2075 = vst.msk [vmem:[#allocation3 + $0x10] sm:$0xf] %vm627_vm0, %v1936_v24  ;;  %v2111_v0 = vld [vmem:[#allocation2 + $0x2c] sm:$0x3] }
  0xe9   : > { %v2972_v49 = vld [vmem:[#allocation2 + $0x34] sm:$0xf]  ;;  %v735_v50 = vrot.slane %v734_v42, 4  ;;  %858 = vst.msk [vmem:[#allocation2 + $0x3c] sm:$0xe] %vm848_vm10, %v734_v42  ;;  %v501_v51 = vadd.f32 %v5541_v58, %v500_v48  ;;  %v1941_v43 = vrot.slane %v1939_v33, 4 }
  0xea   : > { %v2973_v26 = vld [vmem:[#allocation2 + $0x38] sm:$0x3]  ;;  %v3069_v40 = vrot.slane %v2972_v49, 6  ;;  %2543 = vrot.lane.b32.xlu2 %v2461_v35, %s5285_s21  ;;  %v5738_v35 = vld [vmem:[#allocation2 + $0x28] sm:$0xf] }
  0xeb   : > { %v3072_v55 = vrot.slane %v2973_v26, 6  ;;  %v570_v56 = vmax.f32 %v501_v51, 0.0  ;;  %936 = vst.msk [vmem:[#allocation3 + $0x54] sm:$0xf] %vm627_vm0, %v904_v29  ;;  %v1943_v36 = vsel %vm5432_vm4, %v1941_v43, %v1942_v37  ;;  %v903_v51 = vld [vmem:[#allocation2 + $0x24] sm:$0xf]  ;;  %v2797_v26 = vsel %vm5432_vm4, %v4630_v31, %v2796_v41 }
  0xec   : > { %v3071_v60 = vrot.slane %v3069_v40, 4  ;;  %v3070_v62 = vsel %vm5456_vm8, %v4637_v47, %v3069_v40  ;;  %2316 = vrot.lane.b32.xlu0 %v2208_v61, %s5284_s20  ;;  %v1837_v47 = vld [vmem:[#allocation2 + $0x24] sm:$0xe]  ;;  %3228 = vst.msk [vmem:[#allocation3 + $0xd4] sm:$0xf] %vm627_vm0, %v3129_v38  ;;  %v2211_v53 = vrot.slane %v5738_v35, 6 }
  0xed   : > { %v602_v4 = vpack.c.bf16 %v570_v56, %v570_v56  ;;  %3211 = vst.msk [vmem:[#allocation3 + $0x8] sm:$0xf] %vm627_vm0, %v3070_v62  ;;  %v4590_v45 = vrot.slane %v1837_v47, 9  ;;  %v1310_v54 = vld [vmem:[#allocation2 + $0x24] sm:$0xc]  ;;  %v2798_v47 = vrot.slane %v2796_v41, 4 }
  0xee   : > { %v3073_v9 = vsel %vm5456_vm8, %v3071_v60, %v3072_v55  ;;  %2077 = vst.msk [vmem:[#allocation3 + $0x28] sm:$0xf] %vm627_vm0, %v1943_v36  ;;  %v5766_v59 = vld [vmem:[#allocation2 + $0x28] sm:$0xf]  ;;  %v2998_v62 = vld [vmem:[#allocation2 + $0x9c] sm:$0xc] }
  0xef   : > { %v736_v13 = vrot.slane %v602_v4, 7  ;;  %3212 = vst.msk [vmem:[#allocation3 + $0x14] sm:$0xf] %vm627_vm0, %v3073_v9  ;;  %v1940_v55 = vsel %vm5432_vm4, %v4590_v45, %v1939_v33  ;;  %v2999_v63 = vld [vmem:[#allocation2 + $0xa0] sm:$0xf]  ;;  %v2214_v4 = vrot.slane %v2111_v0, 6 }
  0xf0   : > { %v503_v19 = vpop.f32.mrf.mxu0  ;;  %2883 = vrot.lane.b32.xlu1 %v2804_v17, %s5286_s29  ;;  %v2974_v44 = vld [vmem:[#allocation2 + $0x3c] sm:$0xc]  ;;  %935 = vst.msk [vmem:[#allocation3 + $0x48] sm:$0xf] %vm627_vm0, %v903_v51  ;;  %v2464_v5 = vld [vmem:[#allocation2 + $0xac] sm:$0xf] }
  0xf1   : > { %v737_v27 = vsel %vm5563_vm13, %v735_v50, %v736_v13  ;;  %v738_v28 = vrot.slane %v736_v13, 4  ;;  %v504_v10 = vadd.f32 %v5541_v58, %v503_v19  ;;  %v1644_v50 = vld [vmem:[#allocation2 + $0x28] sm:$0xf]  ;;  %v4638_v52 = vrot.slane %v2974_v44, 10  ;;  %2076 = vst.msk [vmem:[#allocation3 + $0x1c] sm:$0xf] %vm627_vm0, %v1940_v55 }
  0xf2   : > { %859 = vst.msk [vmem:[#allocation2 + $0x40] sm:$0xf] %vm627_vm0, %v737_v27  ;;  %2885 = vrot.lane.b32.xlu2 %v2807_v21, %s5286_s29  ;;  %v2213_v6 = vrot.slane %v2211_v53, 4  ;;  %v4576_v8 = vrot.slane %v1310_v54, 10  ;;  %v1423_v13 = vrot.slane %v5766_v59, 6  ;;  %v3132_v16 = vrot.slane %v2999_v63, 6  ;;  %v5807_v54 = vpop.permute.xlu2 %1512 }
  0xf3   : > { %860 = vst.msk [vmem:[#allocation2 + $0x44] sm:$0x1] %vm642_vm9, %v738_v28  ;;  %v571_v34 = vmax.f32 %v504_v10, 0.0  ;;  %v5776_v14 = vld [vmem:[#allocation2 + $0x28] sm:$0xf]  ;;  %v4646_v19 = vrot.slane %v2998_v62, 10 }
  0xf4   : > { %v4663_v42 = vld [vmem:[#allocation3 + $0x8] sm:$0xf]  ;;  %1522 = vrot.lane.b32.xlu0 %v1420_v39, %s5285_s21  ;;  %v3000_v21 = vld [vmem:[#allocation2 + $0xa4] sm:$0x3]  ;;  %v2215_v23 = vsel %vm5456_vm8, %v2213_v6, %v2214_v4  ;;  %v1083_v27 = vrot.slane %v5776_v14, 5  ;;  %v1424_v29 = vsel %vm5456_vm8, %v4576_v8, %v1423_v13  ;;  %v3134_v33 = vrot.slane %v3132_v16, 4 }
  0xf5   : > { %v603_v46 = vpack.c.bf16 %v571_v34, %v571_v34  ;;  %v972_v31 = vld [vmem:[#allocation2 + $0x2c] sm:$0x1]  ;;  %v2664_v32 = vld [vmem:[#allocation2 + $0xa4] sm:$0x1]  ;;  %v3135_v34 = vrot.slane %v3000_v21, 6  ;;  %v3133_v36 = vsel %vm5456_vm8, %v4646_v19, %v3132_v16 }
  0xf6   : > { %v4989_v48 = vld [vmem:[#allocation3 + $0x10] sm:$0xf0]  ;;  %v2462_v38 = vld [vmem:[#allocation2 + $0xa0] sm:$0xf]  ;;  %v1085_v39 = vrot.slane %v1083_v27, 4 }
  0xf7   : > { %v739_v11 = vrot.slane %v603_v46, 7  ;;  %v4664_v49 = vor.u32 %v4989_v48, %v4663_v42  ;;  %v1086_v42 = vrot.slane %v972_v31, 5  ;;  %v2799_v48 = vrot.slane %v2664_v32, 5  ;;  %v2109_v0 = vld [vmem:[#allocation2 + $0x24] sm:$0xc]  ;;  %v5040_v31 = vld [vmem:[%s7054_s3 + $0x28] sm:$0xff] }
  0xf8   : > { %v505_v40 = vpop.f32.mrf.mxu0  ;;  %2879 = vrot.lane.b32.xlu1 %v2797_v26, %s5286_s29  ;;  %3229 = vst.msk [vmem:[#allocation3 + $0xe0] sm:$0xf] %vm627_vm0, %v3133_v36  ;;  %v897_v4 = vld [vmem:[#allocation2] sm:$0xf]  ;;  %v2443_v35 = vld [vmem:[#allocation2 + $0x30] sm:$0xf] }
  0xf9   : > { %v2975_v56 = vld [vmem:[#allocation2 + $0x40] sm:$0xf]  ;;  %861 = vst.msk [vmem:[#allocation2 + $0x48] sm:$0xe] %vm848_vm10, %v739_v11  ;;  %v506_v57 = vadd.f32 %v5541_v58, %v505_v40  ;;  %4917 = vmatmul.msk.bf16.vlgmr.msrb.gmra.mxu0 %vm3695_vm14, %v4664_v49  ;;  %v740_v2 = vrot.slane %v739_v11, 4  ;;  %v4606_v40 = vrot.slane %v2109_v0, 10  ;;  %v2800_v55 = vsel %vm5432_vm4, %v2798_v47, %v2799_v48 }
  0xfa   : > { %v2976_v60 = vld [vmem:[#allocation2 + $0x44] sm:$0x3]  ;;  %v3076_v61 = vrot.slane %v2975_v56, 6  ;;  %1711 = vrot.lane.b32.xlu2 %v1644_v50, %s5286_s29  ;;  %v3136_v50 = vsel %vm5456_vm8, %v3134_v33, %v3135_v34  ;;  %929 = vst.msk [vmem:[#allocation3] sm:$0xf] %vm627_vm0, %v897_v4  ;;  %v1425_v34 = vrot.slane %v1423_v13, 4 }
  0xfb   : > { %v3079_v1 = vrot.slane %v2976_v60, 6  ;;  %v572_v3 = vmax.f32 %v506_v57, 0.0  ;;  %3230 = vst.msk [vmem:[#allocation3 + $0xec] sm:$0xf] %vm627_vm0, %v3136_v50  ;;  %v2212_v63 = vsel %vm5456_vm8, %v4606_v40, %v2211_v53  ;;  %v1646_v19 = vld [vmem:[#allocation2 + $0x34] sm:$0xf] }
  0xfc   : > { %v3077_v9 = vsel %vm5456_vm8, %v4638_v52, %v3076_v61  ;;  %v3078_v12 = vrot.slane %v3076_v61, 4  ;;  %2549 = vrot.lane.b32.xlu0 %v2464_v5, %s5285_s21  ;;  %v1087_v52 = vsel %vm5432_vm4, %v1085_v39, %v1086_v42  ;;  %v5042_v5 = vld [vmem:[%s7054_s3 + $0x38] sm:$0xff]  ;;  %v898_v21 = vld [vmem:[#allocation2 + $0x4] sm:$0xf]  ;;  %v1645_v14 = vld [vmem:[#allocation2 + $0x30] sm:$0xf] }
  0xfd   : > { %v604_v7 = vpack.c.bf16 %v572_v3, %v572_v3  ;;  %3213 = vst.msk [vmem:[#allocation3 + $0x20] sm:$0xf] %vm627_vm0, %v3077_v9  ;;  %v1173_v3 = vpop.permute.xlu0 %1172  ;;  %v970_v9 = vld [vmem:[#allocation2 + $0x24] sm:$0xe]  ;;  %3744 = vmatpush.bf16.msrb.mxu1 %v5042_v5  ;;  %v1313_v47 = vld [vmem:[#allocation2 + $0x30] sm:$0xc] }
  0xfe   : > { %v3080_v15 = vsel %vm5456_vm8, %v3078_v12, %v3079_v1  ;;  %1269 = vst.msk [vmem:[#allocation3] sm:$0xf] %vm1268_vm15, %v1173_v3  ;;  %v5864_v36 = vld [vmem:[#allocation2 + $0x34] sm:$0xf] }
  0xff   : > { %v741_v17 = vrot.slane %v604_v7, 7  ;;  %3214 = vst.msk [vmem:[#allocation3 + $0x2c] sm:$0xf] %vm627_vm0, %v3080_v15  ;;  %v4560_v7 = vrot.slane %v970_v9, 9  ;;  %v2113_v40 = vld [vmem:[#allocation2 + $0x34] sm:$0xf] }
 0x100   : > { %v508_v25 = vpop.f32.mrf.mxu0  ;;  %2320 = vrot.lane.b32.xlu1 %v2215_v23, %s5284_s20  ;;  %v2977_v44 = vld [vmem:[#allocation2 + $0x48] sm:$0xc]  ;;  %v5041_v23 = vld [vmem:[%s7054_s3 + $0x30] sm:$0xff]  ;;  %930 = vst.msk [vmem:[#allocation3 + $0xc] sm:$0xf] %vm627_vm0, %v898_v21 }
 0x101   : > { %v742_v28 = vsel %vm5563_vm13, %v740_v2, %v741_v17  ;;  %v743_v10 = vrot.slane %v741_v17, 4  ;;  %v509_v24 = vadd.f32 %v5541_v58, %v508_v25  ;;  %v4639_v51 = vrot.slane %v2977_v44, 10  ;;  %v5843_v25 = vpop.permute.xlu2 %1516  ;;  %3745 = vmatpush.bf16.msrb.mxu1 %v5041_v23  ;;  %1609 = vst.msk [vmem:[#allocation3] sm:$0xf] %vm1608_vm1, %v5807_v54  ;;  %v1840_v21 = vld [vmem:[#allocation2 + $0x30] sm:$0xe] }
 0x102   : > { %862 = vst.msk [vmem:[#allocation2 + $0x4c] sm:$0xf] %vm627_vm0, %v742_v28  ;;  %1524 = vrot.lane.b32.xlu2 %v1424_v29, %s5285_s21  ;;  %v2635_v28 = vld [vmem:[#allocation2 + $0x30] sm:$0xe]  ;;  %v1312_v29 = vld [vmem:[#allocation2 + $0x2c] sm:$0x3]  ;;  %v1084_v32 = vsel %vm5432_vm4, %v4560_v7, %v1083_v27 }
 0x103   : > { %863 = vst.msk [vmem:[#allocation2 + $0x50] sm:$0x1] %vm642_vm9, %v743_v10  ;;  %v573_v37 = vmax.f32 %v509_v24, 0.0  ;;  %v5845_v10 = vld [vmem:[#allocation2 + $0x34] sm:$0xf] }
 0x104   : > { %v4675_v43 = vld [vmem:[#allocation3 + $0x20] sm:$0xf]  ;;  %2545 = vrot.lane.b32.xlu0 %v2462_v38, %s5285_s21  ;;  %v2733_v44 = vrot.slane %v5845_v10, 5 }
 0x105   : > { %v605_v46 = vpack.c.bf16 %v573_v37, %v573_v37  ;;  %v1175_v37 = vpop.permute.xlu1 %1174  ;;  %v1515_v38 = vpop.permute.xlu0 %1514  ;;  %3746 = vmatpush.bf16.msrb.mxu1 %v5040_v31 }
 0x106   : > { %v4992_v45 = vld [vmem:[#allocation3 + $0x28] sm:$0xf0]  ;;  %1270 = vst.msk [vmem:[#allocation3 + $0xc] sm:$0xf] %vm1268_vm15, %v1175_v37  ;;  %v2735_v7 = vrot.slane %v2733_v44, 4 }
 0x107   : > { %v744_v11 = vrot.slane %v605_v46, 7  ;;  %v4676_v49 = vor.u32 %v4992_v45, %v4675_v43  ;;  %v4621_v43 = vrot.slane %v2635_v28, 9  ;;  %1610 = vst.msk [vmem:[#allocation3 + $0xc] sm:$0xf] %vm1608_vm1, %v1515_v38  ;;  %v1426_v46 = vrot.slane %v1312_v29, 6  ;;  %v5037_v29 = vld [vmem:[%s7054_s3 + $0x10] sm:$0xff] }
 0x108   : > { %v510_v26 = vpop.f32.mrf.mxu0  ;;  %1186 = vrot.lane.b32.xlu1 %v1087_v52, %s5284_s20  ;;  %v5866_v45 = vld [vmem:[#allocation2 + $0x30] sm:$0xc] }
 0x109   : > { %v2978_v22 = vld [vmem:[#allocation2 + $0x4c] sm:$0xf]  ;;  %864 = vst.msk [vmem:[#allocation2 + $0x54] sm:$0xe] %vm848_vm10, %v744_v11  ;;  %v511_v41 = vadd.f32 %v5541_v58, %v510_v26  ;;  %4918 = vmatmul.msk.bf16.gmra.mxu0 %vm3695_vm14, %v4676_v49  ;;  %v745_v6 = vrot.slane %v744_v11, 4  ;;  %v2734_v50 = vsel %vm5432_vm4, %v4621_v43, %v2733_v44  ;;  %v4607_v5 = vrot.slane %v5866_v45, 10 }
 0x10a   : > { %v2979_v56 = vld [vmem:[#allocation2 + $0x50] sm:$0x3]  ;;  %v3083_v57 = vrot.slane %v2978_v22, 6  ;;  %2881 = vrot.lane.b32.xlu2 %v2800_v55, %s5286_s29 }
 0x10b   : > { %v3086_v60 = vrot.slane %v2979_v56, 6  ;;  %v574_v61 = vmax.f32 %v511_v41, 0.0  ;;  %v1427_v41 = vsel %vm5456_vm8, %v1425_v34, %v1426_v46  ;;  %v1842_v34 = vld [vmem:[#allocation2 + $0x38] sm:$0x1]  ;;  %v973_v38 = vld [vmem:[#allocation2 + $0x30] sm:$0xe] }
 0x10c   : > { %v3085_v62 = vrot.slane %v3083_v57, 4  ;;  %v3084_v1 = vsel %vm5456_vm8, %v4639_v51, %v3083_v57  ;;  %2318 = vrot.lane.b32.xlu0 %v2212_v63, %s5284_s20  ;;  %v5039_v51 = vld [vmem:[%s7054_s3 + $0x20] sm:$0xff]  ;;  %v4577_v57 = vrot.slane %v1313_v47, 10 }
 0x10d   : > { %v606_v8 = vpack.c.bf16 %v574_v61, %v574_v61  ;;  %3215 = vst.msk [vmem:[#allocation3 + $0x38] sm:$0xf] %vm627_vm0, %v3084_v1  ;;  %3747 = vmatpush.bf16.msrb.mxu1 %v5039_v51  ;;  %v1177_v63 = vpop.permute.xlu0 %1176  ;;  %v5038_v1 = vld [vmem:[%s7054_s3 + $0x18] sm:$0xff] }
 0x10e   : > { %v3087_v53 = vsel %vm5456_vm8, %v3085_v62, %v3086_v60  ;;  %v1430_v60 = vrot.slane %v5864_v36, 6  ;;  %v900_v62 = vld [vmem:[#allocation2 + $0x10] sm:$0xf] }
 0x10f   : > { %v746_v12 = vrot.slane %v606_v8, 7  ;;  %3216 = vst.msk [vmem:[#allocation3 + $0x44] sm:$0xf] %vm627_vm0, %v3087_v53  ;;  %v2444_v8 = vld [vmem:[#allocation2 + $0x34] sm:$0xf] }
 0x110   : > { %v513_v2 = vpop.f32.mrf.mxu0  ;;  %2507 = vrot.lane.b32.xlu1 %v2443_v35, %s5285_s21  ;;  %v2980_v39 = vld [vmem:[#allocation2 + $0x54] sm:$0xc]  ;;  %932 = vst.msk [vmem:[#allocation3 + $0x24] sm:$0xf] %vm627_vm0, %v900_v62  ;;  %v899_v35 = vld [vmem:[#allocation2 + $0xc] sm:$0xf] }
 0x111   : > { %v747_v15 = vsel %vm5563_vm13, %v745_v6, %v746_v12  ;;  %v748_v16 = vrot.slane %v746_v12, 4  ;;  %v514_v17 = vadd.f32 %v5541_v58, %v513_v2  ;;  %v4640_v48 = vrot.slane %v2980_v39, 10  ;;  %v1841_v53 = vld [vmem:[#allocation2 + $0x34] sm:$0xf]  ;;  %v2114_v2 = vld [vmem:[#allocation2 + $0x38] sm:$0x3]  ;;  %3748 = vmatpush.bf16.msrb.mxu1 %v5038_v1 }
 0x112   : > { %865 = vst.msk [vmem:[#allocation2 + $0x58] sm:$0xf] %vm627_vm0, %v747_v15  ;;  %1715 = vrot.lane.b32.xlu2 %v1646_v19, %s5286_s29  ;;  %v2218_v6 = vrot.slane %v2113_v40, 6  ;;  %v1179_v15 = vpop.permute.xlu1 %1178  ;;  %v2637_v19 = vld [vmem:[#allocation2 + $0x38] sm:$0x1]  ;;  %v1946_v31 = vrot.slane %v1841_v53, 5 }
 0x113   : > { %866 = vst.msk [vmem:[#allocation2 + $0x5c] sm:$0x1] %vm642_vm9, %v748_v16  ;;  %v575_v24 = vmax.f32 %v514_v17, 0.0  ;;  %v1431_v17 = vsel %vm5456_vm8, %v4577_v57, %v1430_v60  ;;  %v5036_v39 = vld [vmem:[%s7054_s3 + $0x8] sm:$0xff]  ;;  %v975_v40 = vld [vmem:[#allocation2 + $0x38] sm:$0x1] }
 0x114   : > { %v4687_v33 = vld [vmem:[#allocation3 + $0x38] sm:$0xf]  ;;  %1184 = vrot.lane.b32.xlu0 %v1084_v32, %s5284_s20  ;;  %1272 = vst.msk [vmem:[#allocation3 + $0x24] sm:$0xf] %vm1268_vm15, %v1179_v15  ;;  %v2220_v32 = vrot.slane %v2218_v6, 4  ;;  %v1948_v47 = vrot.slane %v1946_v31, 4 }
 0x115   : > { %v607_v42 = vpack.c.bf16 %v575_v24, %v575_v24  ;;  %931 = vst.msk [vmem:[#allocation3 + $0x18] sm:$0xf] %vm627_vm0, %v899_v35  ;;  %v4976_v24 = vld [vmem:[%s5405_s19 + $0x68] sm:$0xff]  ;;  %3749 = vmatpush.bf16.msrb.mxu1 %v5037_v29  ;;  %v1519_v46 = vpop.permute.xlu0 %1518  ;;  %v5035_v57 = vld [vmem:[%s7054_s3] sm:$0xff]  ;;  %v4977_v29 = vld [vmem:[%s5405_s19 + $0x70] sm:$0xff] }
 0x116   : > { %v4995_v27 = vld [vmem:[#allocation3 + $0x40] sm:$0xf0]  ;;  %547 = vmatmul.bf16.gmra.mxu2 %v4976_v24  ;;  %1271 = vst.msk [vmem:[#allocation3 + $0x18] sm:$0xf] %vm1268_vm15, %v1177_v63 }
 0x117   : > { %v749_v59 = vrot.slane %v607_v42, 7  ;;  %v4688_v13 = vor.u32 %v4995_v27, %v4687_v33  ;;  %v2221_v33 = vrot.slane %v2114_v2, 6  ;;  %v2219_v42 = vsel %vm5456_vm8, %v4607_v5, %v2218_v6  ;;  %1611 = vst.msk [vmem:[#allocation3 + $0x18] sm:$0xf] %vm1608_vm1, %v5843_v25  ;;  %v1315_v2 = vld [vmem:[#allocation2 + $0x38] sm:$0x3] }
 0x118   : > { %v515_v0 = vpop.f32.mrf.mxu0  ;;  %1713 = vrot.lane.b32.xlu1 %v1645_v14, %s5286_s29  ;;  %v2736_v14 = vrot.slane %v2637_v19, 5  ;;  %v4591_v27 = vrot.slane %v1840_v21, 9  ;;  %1612 = vst.msk [vmem:[#allocation3 + $0x24] sm:$0xf] %vm1608_vm1, %v1519_v46  ;;  %v1432_v21 = vrot.slane %v1430_v60, 4 }
 0x119   : > { %v2981_v11 = vld [vmem:[#allocation2 + $0x58] sm:$0xf]  ;;  %867 = vst.msk [vmem:[#allocation2 + $0x60] sm:$0xe] %vm848_vm10, %v749_v59  ;;  %v516_v49 = vadd.f32 %v5541_v58, %v515_v0  ;;  %4919 = vmatmul.msk.bf16.gmra.mxu0 %vm3695_vm14, %v4688_v13  ;;  %v750_v3 = vrot.slane %v749_v59, 4  ;;  %3750 = vmatpush.bf16.msrb.mxu1 %v5036_v39 }
 0x11a   : > { %v2982_v52 = vld [vmem:[#allocation2 + $0x5c] sm:$0x3]  ;;  %v3090_v26 = vrot.slane %v2981_v11, 6  ;;  %2843 = vrot.lane.b32.xlu2 %v2734_v50, %s5286_s29  ;;  %v2222_v11 = vsel %vm5456_vm8, %v2220_v32, %v2221_v33  ;;  %v1947_v25 = vsel %vm5432_vm4, %v4591_v27, %v1946_v31  ;;  %v905_v33 = vld [vmem:[#allocation2 + $0x30] sm:$0xf] }
 0x11b   : > { %v3093_v54 = vrot.slane %v2982_v52, 6  ;;  %v576_v22 = vmax.f32 %v516_v49, 0.0  ;;  %v4561_v52 = vrot.slane %v973_v38, 9  ;;  %2078 = vst.msk [vmem:[#allocation3 + $0x34] sm:$0xf] %vm627_vm0, %v1947_v25 }
 0x11c   : > { %v3092_v55 = vrot.slane %v3090_v26, 4  ;;  %v5880_v56 = vpop.permute.xlu2 %2539  ;;  %v3091_v61 = vsel %vm5456_vm8, %v4640_v48, %v3090_v26  ;;  %1526 = vrot.lane.b32.xlu0 %v1427_v41, %s5285_s21  ;;  %v1949_v48 = vrot.slane %v1842_v34, 5  ;;  %v1647_v39 = vld [vmem:[#allocation2 + $0x3c] sm:$0xf]  ;;  %v1648_v27 = vld [vmem:[#allocation2 + $0x40] sm:$0xf] }
 0x11d   : > { %v608_v4 = vpack.c.bf16 %v576_v22, %v576_v22  ;;  %3217 = vst.msk [vmem:[#allocation3 + $0x50] sm:$0xf] %vm627_vm0, %v3091_v61  ;;  %v5933_v22 = vld [vmem:[%s7053_s2] ss:$0 sm:$0xff]  ;;  %3751 = vmatpush.bf16.msrb.mxu1 %v5035_v57 }
 0x11e   : > { %v3094_v9 = vsel %vm5456_vm8, %v3092_v55, %v3093_v54  ;;  %v2737_v55 = vsel %vm5432_vm4, %v2735_v7, %v2736_v14  ;;  %v1950_v61 = vsel %vm5432_vm4, %v1948_v47, %v1949_v48  ;;  %937 = vst.msk [vmem:[#allocation3 + $0x60] sm:$0xf] %vm627_vm0, %v905_v33  ;;  %v5976_v47 = vld [vmem:[#allocation2 + $0x40] sm:$0xf] }
 0x11f   : > { %v751_v12 = vrot.slane %v608_v4, 7  ;;  %3218 = vst.msk [vmem:[#allocation3 + $0x5c] sm:$0xf] %vm627_vm0, %v3094_v9  ;;  %v1093_v4 = vrot.slane %v975_v40, 5  ;;  %v2740_v57 = vrot.slane %v5976_v47, 5 }
 0x120   : > { %v518_v16 = vpop.f32.mrf.mxu0  ;;  %2509 = vrot.lane.b32.xlu1 %v2444_v8, %s5285_s21  ;;  %v2983_v59 = vld [vmem:[#allocation2 + $0x60] sm:$0xc]  ;;  %2079 = vst.msk [vmem:[#allocation3 + $0x40] sm:$0xf] %vm627_vm0, %v1950_v61 }
 0x121   : > { %v752_v23 = vsel %vm5563_vm13, %v750_v3, %v751_v12  ;;  %v753_v28 = vrot.slane %v751_v12, 4  ;;  %v519_v10 = vadd.f32 %v5541_v58, %v518_v16  ;;  %v974_v58 = vld [vmem:[#allocation2 + $0x34] sm:$0xf]  ;;  %v4641_v50 = vrot.slane %v2983_v59, 10  ;;  %v2445_v16 = vld [vmem:[#allocation2 + $0x3c] sm:$0xf] }
 0x122   : > { %868 = vst.msk [vmem:[#allocation2 + $0x64] sm:$0xf] %vm627_vm0, %v752_v23  ;;  %1528 = vrot.lane.b32.xlu2 %v1431_v17, %s5285_s21  ;;  %v1090_v26 = vrot.slane %v974_v58, 5  ;;  %v1433_v23 = vrot.slane %v1315_v2, 6  ;;  %v906_v58 = vld [vmem:[#allocation2 + $0x34] sm:$0xf] }
 0x123   : > { %869 = vst.msk [vmem:[#allocation2 + $0x68] sm:$0x1] %vm642_vm9, %v753_v28  ;;  %v577_v37 = vmax.f32 %v519_v10, 0.0  ;;  %v2638_v59 = vld [vmem:[#allocation2 + $0x3c] sm:$0xe] }
 0x124   : > { %v5917_v43 = vpop.permute.xlu2 %2547  ;;  %v4699_v44 = vld [vmem:[#allocation3 + $0x50] sm:$0xf]  ;;  %2322 = vrot.lane.b32.xlu0 %v2219_v42, %s5284_s20  ;;  %v1091_v6 = vsel %vm5432_vm4, %v4561_v52, %v1090_v26  ;;  %v1092_v9 = vrot.slane %v1090_v26, 4  ;;  %v1434_v36 = vsel %vm5456_vm8, %v1432_v21, %v1433_v23  ;;  %938 = vst.msk [vmem:[#allocation3 + $0x6c] sm:$0xf] %vm627_vm0, %v906_v58  ;;  %v4978_v2 = vld [vmem:[%s5405_s19 + $0x78] sm:$0xff] }
 0x125   : > { %v609_v13 = vpack.c.bf16 %v577_v37, %v577_v37  ;;  %v5984_v52 = vld [vmem:[#allocation2 + $0x40] sm:$0xf] }
 0x126   : > { %v4998_v0 = vld [vmem:[#allocation3 + $0x58] sm:$0xf0]  ;;  %v1094_v17 = vsel %vm5432_vm4, %v1092_v9, %v1093_v4  ;;  %552 = vmatmul.bf16.gmra.mxu2 %v4977_v29 }
 0x127   : > { %v754_v45 = vrot.slane %v609_v13, 7  ;;  %v4700_v49 = vor.u32 %v4998_v0, %v4699_v44 }
 0x128   : > { %v520_v51 = vpop.f32.mrf.mxu0  ;;  %2324 = vrot.lane.b32.xlu1 %v2222_v11, %s5284_s20 }
 0x129   : > { %v2984_v54 = vld [vmem:[#allocation2 + $0x64] sm:$0xf]  ;;  %870 = vst.msk [vmem:[#allocation2 + $0x6c] sm:$0xe] %vm848_vm10, %v754_v45  ;;  %v521_v41 = vadd.f32 %v5933_v22, %v520_v51  ;;  %4920 = vmatmul.msk.bf16.gmra.mxu0 %vm3695_vm14, %v4700_v49  ;;  %v755_v53 = vrot.slane %v754_v45, 4  ;;  %v4622_v51 = vrot.slane %v2638_v59, 9 }
 0x12a   : > { %v2985_v62 = vld [vmem:[#allocation2 + $0x68] sm:$0x3]  ;;  %v3097_v63 = vrot.slane %v2984_v54, 6  ;;  %2845 = vrot.lane.b32.xlu2 %v2737_v55, %s5286_s29  ;;  %v1316_v45 = vld [vmem:[#allocation2 + $0x3c] sm:$0xc] }
 0x12b   : > { %v3100_v1 = vrot.slane %v2985_v62, 6  ;;  %v578_v3 = vmax.f32 %v521_v41, 0.0  ;;  %v2115_v62 = vld [vmem:[#allocation2 + $0x3c] sm:$0xc] }
 0x12c   : > { %v3099_v5 = vrot.slane %v3097_v63, 4  ;;  %v1708_v8 = vpop.permute.xlu2 %1707  ;;  %v3098_v35 = vsel %vm5456_vm8, %v4641_v50, %v3097_v63  ;;  %1188 = vrot.lane.b32.xlu0 %v1091_v6, %s5284_s20  ;;  %v2446_v50 = vld [vmem:[#allocation2 + $0x40] sm:$0xf]  ;;  %v1437_v6 = vrot.slane %v5984_v52, 6 }
 0x12d   : > { %v610_v12 = vpack.c.bf16 %v578_v3, %v578_v3  ;;  %1803 = vst.msk [vmem:[#allocation3 + $0xc] sm:$0xf] %vm1801_vm2, %v1708_v8  ;;  %v2116_v63 = vld [vmem:[#allocation2 + $0x40] sm:$0xf] }
 0x12e   : > { %v3101_v7 = vsel %vm5456_vm8, %v3099_v5, %v3100_v1  ;;  %3219 = vst.msk [vmem:[#allocation3 + $0x68] sm:$0xf] %vm627_vm0, %v3098_v35  ;;  %v4578_v5 = vrot.slane %v1316_v45, 10 }
 0x12f   : > { %v756_v15 = vrot.slane %v610_v12, 7  ;;  %3220 = vst.msk [vmem:[#allocation3 + $0x74] sm:$0xf] %vm627_vm0, %v3101_v7  ;;  %v2225_v12 = vrot.slane %v2116_v63, 6  ;;  %v2741_v7 = vsel %vm5432_vm4, %v4622_v51, %v2740_v57 }
 0x130   : > { %v523_v19 = vpop.f32.mrf.mxu0  ;;  %1190 = vrot.lane.b32.xlu1 %v1094_v17, %s5284_s20  ;;  %v2986_v34 = vld [vmem:[#allocation2 + $0x6c] sm:$0xc]  ;;  %v2640_v17 = vld [vmem:[#allocation2 + $0x44] sm:$0x1] }
 0x131   : > { %v757_v28 = vsel %vm5563_vm13, %v755_v53, %v756_v15  ;;  %v758_v10 = vrot.slane %v756_v15, 4  ;;  %v524_v24 = vadd.f32 %v5933_v22, %v523_v19  ;;  %v4642_v13 = vrot.slane %v2986_v34, 10 }
 0x132   : > { %871 = vst.msk [vmem:[#allocation2 + $0x70] sm:$0xf] %vm627_vm0, %v757_v28  ;;  %2511 = vrot.lane.b32.xlu2 %v2445_v16, %s5285_s21  ;;  %v4608_v53 = vrot.slane %v2115_v62, 10  ;;  %v2117_v16 = vld [vmem:[#allocation2 + $0x44] sm:$0x3]  ;;  %v1438_v28 = vsel %vm5456_vm8, %v4578_v5, %v1437_v6  ;;  %v2227_v34 = vrot.slane %v2225_v12, 4 }
 0x133   : > { %872 = vst.msk [vmem:[#allocation2 + $0x74] sm:$0x1] %vm642_vm9, %v758_v10  ;;  %v579_v31 = vmax.f32 %v524_v24, 0.0  ;;  %v1706_v32 = vpop.permute.xlu1 %1705  ;;  %v1843_v10 = vld [vmem:[#allocation2 + $0x3c] sm:$0xe] }
 0x134   : > { %1802 = vst.msk [vmem:[#allocation3] sm:$0xf] %vm1801_vm2, %v1706_v32  ;;  %v5972_v60 = vpop.permute.xlu2 %1520  ;;  %1530 = vrot.lane.b32.xlu0 %v1434_v36, %s5285_s21  ;;  %v4988_v54 = vld [vmem:[#allocation3 + $0x8] sm:$0xf0]  ;;  %v1844_v24 = vld [vmem:[#allocation2 + $0x40] sm:$0xf]  ;;  %v2226_v33 = vsel %vm5456_vm8, %v4608_v53, %v2225_v12 }
 0x135   : > { %v611_v37 = vpack.c.bf16 %v579_v31, %v579_v31  ;;  %v4711_v38 = vld [vmem:[#allocation3 + $0x68] sm:$0xf]  ;;  %v4592_v29 = vrot.slane %v1843_v10, 9  ;;  %v1953_v31 = vrot.slane %v1844_v24, 5  ;;  %v978_v62 = vld [vmem:[#allocation2 + $0x44] sm:$0x1] }
 0x136   : > { %v5001_v42 = vld [vmem:[#allocation3 + $0x70] sm:$0xf0]  ;;  %557 = vmatmul.bf16.gmra.mxu2 %v4978_v2  ;;  %v2447_v24 = vld [vmem:[#allocation2 + $0x48] sm:$0xf] }
 0x137   : > { %v759_v44 = vrot.slane %v611_v37, 7  ;;  %v4712_v14 = vor.u32 %v5001_v42, %v4711_v38  ;;  %v976_v37 = vld [vmem:[#allocation2 + $0x3c] sm:$0xe]  ;;  %v977_v38 = vld [vmem:[#allocation2 + $0x40] sm:$0xf] }
 0x138   : > { %v525_v46 = vpop.f32.mrf.mxu0  ;;  %1717 = vrot.lane.b32.xlu1 %v1647_v39, %s5286_s29  ;;  %v2228_v39 = vrot.slane %v2117_v16, 6  ;;  %v1868_v16 = vld [vmem:[#allocation2 + $0xa0] sm:$0xf] }
 0x139   : > { %v2987_v48 = vld [vmem:[#allocation2 + $0x70] sm:$0xf]  ;;  %873 = vst.msk [vmem:[#allocation2 + $0x78] sm:$0xe] %vm848_vm10, %v759_v44  ;;  %v526_v0 = vadd.f32 %v5933_v22, %v525_v46  ;;  %4921 = vmatmul.msk.bf16.gmra.mxu0 %vm3695_vm14, %v4712_v14  ;;  %v760_v3 = vrot.slane %v759_v44, 4  ;;  %v2742_v44 = vrot.slane %v2740_v57, 4 }
 0x13a   : > { %v2988_v11 = vld [vmem:[#allocation2 + $0x74] sm:$0x3]  ;;  %v3104_v49 = vrot.slane %v2987_v48, 6  ;;  %1719 = vrot.lane.b32.xlu2 %v1648_v27, %s5286_s29  ;;  %v2743_v14 = vrot.slane %v2640_v17, 5  ;;  %v1954_v27 = vsel %vm5432_vm4, %v4592_v29, %v1953_v31  ;;  %v1845_v46 = vld [vmem:[#allocation2 + $0x44] sm:$0x1] }
 0x13b   : > { %v3107_v26 = vrot.slane %v2988_v11, 6  ;;  %v580_v40 = vmax.f32 %v526_v0, 0.0  ;;  %v4655_v25 = vld [vmem:[#allocation3] sm:$0xf]  ;;  %2080 = vst.msk [vmem:[#allocation3 + $0x4c] sm:$0xf] %vm627_vm0, %v1954_v27 }
 0x13c   : > { %v3106_v41 = vrot.slane %v3104_v49, 4  ;;  %v5986_v55 = vpop.permute.xlu2 %2877  ;;  %v4656_v61 = vor.u32 %v4988_v54, %v4655_v25  ;;  %v3105_v1 = vsel %vm5456_vm8, %v4642_v13, %v3104_v49  ;;  %2513 = vrot.lane.b32.xlu0 %v2446_v50, %s5285_s21  ;;  %v1097_v11 = vrot.slane %v977_v38, 5  ;;  %v907_v50 = vld [vmem:[#allocation2 + $0x3c] sm:$0xf] }
 0x13d   : > { %v612_v4 = vpack.c.bf16 %v580_v40, %v580_v40  ;;  %3221 = vst.msk [vmem:[#allocation3 + $0x80] sm:$0xf] %vm627_vm0, %v3105_v1  ;;  %v1955_v49 = vrot.slane %v1953_v31, 4  ;;  %v4562_v25 = vrot.slane %v976_v37, 9  ;;  %v1956_v54 = vrot.slane %v1845_v46, 5 }
 0x13e   : > { %3752 = vmatmul.bf16.vlgmr.msrb.gmra.mxu1 %v4656_v61  ;;  %v3108_v8 = vsel %vm5456_vm8, %v3106_v41, %v3107_v26  ;;  %v5996_v35 = vpop.permute.xlu0 %2541  ;;  %v2229_v26 = vsel %vm5456_vm8, %v2227_v34, %v2228_v39  ;;  %v2744_v61 = vsel %vm5432_vm4, %v2742_v44, %v2743_v14  ;;  %939 = vst.msk [vmem:[#allocation3 + $0x78] sm:$0xf] %vm627_vm0, %v907_v50  ;;  %v2009_v29 = vrot.slane %v1868_v16, 5  ;;  %v908_v39 = vld [vmem:[#allocation2 + $0x40] sm:$0xf] }
 0x13f   : > { %v761_v9 = vrot.slane %v612_v4, 7  ;;  %3222 = vst.msk [vmem:[#allocation3 + $0x8c] sm:$0xf] %vm627_vm0, %v3108_v8  ;;  %v1099_v8 = vrot.slane %v1097_v11, 4  ;;  %v1098_v12 = vsel %vm5432_vm4, %v4562_v25, %v1097_v11  ;;  %v1870_v14 = vld [vmem:[#allocation2 + $0xa8] sm:$0xe] }
 0x140   : > { %v528_v15 = vpop.f32.mrf.mxu0  ;;  %2847 = vrot.lane.b32.xlu1 %v2741_v7, %s5286_s29  ;;  %v2989_v59 = vld [vmem:[#allocation2 + $0x78] sm:$0xc]  ;;  %v1100_v7 = vrot.slane %v978_v62, 5  ;;  %940 = vst.msk [vmem:[#allocation3 + $0x84] sm:$0xf] %vm627_vm0, %v908_v39  ;;  %v4601_v11 = vrot.slane %v1870_v14, 9 }
 0x141   : > { %v762_v19 = vsel %vm5563_vm13, %v760_v3, %v761_v9  ;;  %v763_v21 = vrot.slane %v761_v9, 4  ;;  %v529_v23 = vadd.f32 %v5933_v22, %v528_v15  ;;  %v4643_v51 = vrot.slane %v2989_v59, 10  ;;  %v1318_v9 = vld [vmem:[#allocation2 + $0x44] sm:$0x3]  ;;  %v1871_v25 = vld [vmem:[#allocation2 + $0xac] sm:$0xf] }
 0x142   : > { %874 = vst.msk [vmem:[#allocation2 + $0x7c] sm:$0xf] %vm627_vm0, %v762_v19  ;;  %1532 = vrot.lane.b32.xlu2 %v1438_v28, %s5285_s21  ;;  %v6013_v32 = vpop.permute.xlu1 %2875  ;;  %v1101_v31 = vsel %vm5432_vm4, %v1099_v8, %v1100_v7  ;;  %v1872_v62 = vld [vmem:[#allocation2 + $0xb0] sm:$0x1] }
 0x143   : > { %875 = vst.msk [vmem:[#allocation2 + $0x80] sm:$0x1] %vm642_vm9, %v763_v21  ;;  %v581_v36 = vmax.f32 %v529_v23, 0.0  ;;  %v1867_v21 = vld [vmem:[#allocation2 + $0x9c] sm:$0xe] }
 0x144   : > { %v6017_v58 = vpop.permute.xlu2 %2543  ;;  %v4723_v42 = vld [vmem:[#allocation3 + $0x80] sm:$0xf]  ;;  %2326 = vrot.lane.b32.xlu0 %v2226_v33, %s5284_s20  ;;  %v1440_v33 = vrot.slane %v1318_v9, 6  ;;  %v4600_v34 = vrot.slane %v1867_v21, 9 }
 0x145   : > { %v613_v13 = vpack.c.bf16 %v581_v36, %v581_v36  ;;  %v1439_v36 = vrot.slane %v1437_v6, 4  ;;  %v2011_v6 = vrot.slane %v2009_v29, 4 }
 0x146   : > { %v5004_v47 = vld [vmem:[#allocation3 + $0x88] sm:$0xf0]  ;;  %v2315_v0 = vpop.permute.xlu0 %2314 }
 0x147   : > { %v764_v48 = vrot.slane %v613_v13, 7  ;;  %v4724_v45 = vor.u32 %v5004_v47, %v4723_v42  ;;  %2410 = vst.msk [vmem:[#allocation3 + $0x4] sm:$0xf] %vm1268_vm15, %v2315_v0  ;;  %v1869_v42 = vld [vmem:[#allocation2 + $0xa4] sm:$0x1]  ;;  %v1441_v27 = vsel %vm5456_vm8, %v1439_v36, %v1440_v33  ;;  %v2010_v13 = vsel %vm5432_vm4, %v4600_v34, %v2009_v29  ;;  %v5050_v29 = vld [vmem:[%s7054_s3 + $0x78] sm:$0xff] }
 0x148   : > { %v530_v40 = vpop.f32.mrf.mxu0  ;;  %2328 = vrot.lane.b32.xlu1 %v2229_v26, %s5284_s20  ;;  %v2012_v44 = vrot.slane %v1869_v42, 5  ;;  %v1649_v47 = vld [vmem:[#allocation2 + $0x48] sm:$0xf]  ;;  %2096 = vst.msk [vmem:[#allocation3 + $0x10c] sm:$0xf] %vm627_vm0, %v2010_v13  ;;  %3833 = vmatpush.bf16.msrb.mxu2 %v5050_v29  ;;  %v5046_v29 = vld [vmem:[%s7054_s3 + $0x58] sm:$0xff] }
 0x149   : > { %v2990_v41 = vld [vmem:[#allocation2 + $0x7c] sm:$0xf]  ;;  %876 = vst.msk [vmem:[#allocation2 + $0x84] sm:$0xe] %vm848_vm10, %v764_v48  ;;  %v531_v57 = vadd.f32 %v5933_v22, %v530_v40  ;;  %4922 = vmatmul.msk.bf16.gmra.mxu0 %vm3695_vm14, %v4724_v45  ;;  %v1957_v22 = vsel %vm5432_vm4, %v1955_v49, %v1956_v54  ;;  %v765_v17 = vrot.slane %v764_v48, 4 }
 0x14a   : > { %v2991_v63 = vld [vmem:[#allocation2 + $0x80] sm:$0x3]  ;;  %v3111_v1 = vrot.slane %v2990_v41, 6  ;;  %2849 = vrot.lane.b32.xlu2 %v2744_v61, %s5286_s29  ;;  %v1183_v4 = vpop.permute.xlu1 %1182  ;;  %2081 = vst.msk [vmem:[#allocation3 + $0x58] sm:$0xf] %vm627_vm0, %v1957_v22  ;;  %v2013_v40 = vsel %vm5432_vm4, %v2011_v6, %v2012_v44  ;;  %v2016_v61 = vrot.slane %v1871_v25, 5 }
 0x14b   : > { %v3114_v3 = vrot.slane %v2991_v63, 6  ;;  %v582_v5 = vmax.f32 %v531_v57, 0.0  ;;  %1274 = vst.msk [vmem:[#allocation3 + $0x3c] sm:$0xf] %vm1268_vm15, %v1183_v4  ;;  %v2641_v0 = vld [vmem:[#allocation2 + $0x48] sm:$0xe] }
 0x14c   : > { %v3113_v53 = vrot.slane %v3111_v1, 4  ;;  %v6039_v2 = vpop.permute.xlu2 %2885  ;;  %v3112_v15 = vsel %vm5456_vm8, %v4643_v51, %v3111_v1  ;;  %1192 = vrot.lane.b32.xlu0 %v1098_v12, %s5284_s20  ;;  %v2642_v45 = vld [vmem:[#allocation2 + $0x4c] sm:$0xf]  ;;  %v1319_v26 = vld [vmem:[#allocation2 + $0x48] sm:$0xc]  ;;  %v2019_v1 = vrot.slane %v1872_v62, 5  ;;  %v2017_v8 = vsel %vm5432_vm4, %v4601_v11, %v2016_v61 }
 0x14d   : > { %v614_v19 = vpack.c.bf16 %v582_v5, %v582_v5  ;;  %3223 = vst.msk [vmem:[#allocation3 + $0x98] sm:$0xf] %vm627_vm0, %v3112_v15  ;;  %v1650_v51 = vld [vmem:[#allocation2 + $0x4c] sm:$0xf]  ;;  %v2018_v9 = vrot.slane %v2016_v61, 4  ;;  %v4623_v12 = vrot.slane %v2641_v0, 9 }
 0x14e   : > { %v3115_v23 = vsel %vm5456_vm8, %v3113_v53, %v3114_v3  ;;  %v1181_v10 = vpop.permute.xlu0 %1180  ;;  %v6074_v41 = vld [vmem:[#allocation2 + $0x4c] sm:$0xf]  ;;  %2097 = vst.msk [vmem:[#allocation3 + $0x118] sm:$0xf] %vm627_vm0, %v2013_v40  ;;  %v4579_v16 = vrot.slane %v1319_v26, 10  ;;  %v5049_v25 = vld [vmem:[%s7054_s3 + $0x70] sm:$0xff] }
 0x14f   : > { %v766_v28 = vrot.slane %v614_v19, 7  ;;  %3224 = vst.msk [vmem:[#allocation3 + $0xa4] sm:$0xf] %vm627_vm0, %v3115_v23  ;;  %v2119_v57 = vld [vmem:[#allocation2 + $0x4c] sm:$0xf]  ;;  %v2020_v21 = vsel %vm5432_vm4, %v2018_v9, %v2019_v1  ;;  %v1444_v23 = vrot.slane %v6074_v41, 6  ;;  %3834 = vmatpush.bf16.msrb.mxu2 %v5049_v25 }
 0x150   : > { %1273 = vst.msk [vmem:[#allocation3 + $0x30] sm:$0xf] %vm1268_vm15, %v1181_v10  ;;  %1194 = vrot.lane.b32.xlu1 %v1101_v31, %s5284_s20  ;;  %v2992_v46 = vld [vmem:[#allocation2 + $0x84] sm:$0xc]  ;;  %v2448_v5 = vld [vmem:[#allocation2 + $0x4c] sm:$0xf] }
 0x151   : > { %v767_v37 = vsel %vm5563_vm13, %v765_v17, %v766_v28  ;;  %v768_v38 = vrot.slane %v766_v28, 4  ;;  %1613 = vst.msk [vmem:[#allocation3 + $0x30] sm:$0xf] %vm1608_vm1, %v5972_v60  ;;  %v4644_v54 = vrot.slane %v2992_v46, 10  ;;  %v2118_v17 = vld [vmem:[#allocation2 + $0x48] sm:$0xc] }
 0x152   : > { %877 = vst.msk [vmem:[#allocation2 + $0x88] sm:$0xf] %vm627_vm0, %v767_v37  ;;  %2515 = vrot.lane.b32.xlu2 %v2447_v24, %s5285_s21  ;;  %v2357_v52 = vpop.permute.xlu1 %2356  ;;  %v2232_v28 = vrot.slane %v2119_v57, 6  ;;  %v2120_v10 = vld [vmem:[#allocation2 + $0x50] sm:$0x3]  ;;  %v4609_v36 = vrot.slane %v2118_v17, 10 }
 0x153   : > { %878 = vst.msk [vmem:[#allocation2 + $0x8c] sm:$0x1] %vm642_vm9, %v768_v38  ;;  %v2235_v34 = vrot.slane %v2120_v10, 6  ;;  %v2643_v37 = vld [vmem:[#allocation2 + $0x50] sm:$0x1]  ;;  %v1445_v38 = vsel %vm5456_vm8, %v4579_v16, %v1444_v23 }
 0x154   : > { %2431 = vst.msk [vmem:[#allocation3 + $0x100] sm:$0xf] %vm1268_vm15, %v2357_v52  ;;  %v1712_v60 = vpop.permute.xlu2 %1711  ;;  %v4735_v59 = vld [vmem:[#allocation3 + $0x98] sm:$0xf]  ;;  %1534 = vrot.lane.b32.xlu0 %v1441_v27, %s5285_s21  ;;  %v2234_v39 = vrot.slane %v2232_v28, 4  ;;  %v2233_v46 = vsel %vm5456_vm8, %v4609_v36, %v2232_v28 }
 0x155   : > { %1805 = vst.msk [vmem:[#allocation3 + $0x24] sm:$0xf] %vm1801_vm2, %v1712_v60  ;;  %v1846_v52 = vld [vmem:[#allocation2 + $0x48] sm:$0xe]  ;;  %v1847_v6 = vld [vmem:[#allocation2 + $0x4c] sm:$0xf] }
 0x156   : > { %v5007_v48 = vld [vmem:[#allocation3 + $0xa0] sm:$0xf0]  ;;  %v2355_v49 = vpop.permute.xlu0 %2354  ;;  %2098 = vst.msk [vmem:[#allocation3 + $0x124] sm:$0xf] %vm627_vm0, %v2017_v8  ;;  %v4593_v14 = vrot.slane %v1846_v52, 9  ;;  %v1960_v27 = vrot.slane %v1847_v6, 5 }
 0x157   : > { %v4736_v50 = vor.u32 %v5007_v48, %v4735_v59  ;;  %2430 = vst.msk [vmem:[#allocation3 + $0xf4] sm:$0xf] %vm1268_vm15, %v2355_v49  ;;  %v909_v60 = vld [vmem:[#allocation2 + $0x48] sm:$0xf]  ;;  %v980_v40 = vld [vmem:[#allocation2 + $0x4c] sm:$0xf] }
 0x158   : > { %2623 = vst.msk [vmem:[#allocation3 + $0xf4] sm:$0xf] %vm1608_vm1, %v5917_v43  ;;  %1721 = vrot.lane.b32.xlu1 %v1649_v47, %s5286_s29  ;;  %v2747_v43 = vrot.slane %v2642_v45, 5  ;;  %v1848_v47 = vld [vmem:[#allocation2 + $0x50] sm:$0x1]  ;;  %v1961_v11 = vsel %vm5432_vm4, %v4593_v14, %v1960_v27  ;;  %v1962_v49 = vrot.slane %v1960_v27, 4 }
 0x159   : > { %v2993_v63 = vld [vmem:[#allocation2 + $0x88] sm:$0xf]  ;;  %4923 = vmatmul.msk.bf16.gmra.mxu0 %vm3695_vm14, %v4736_v50  ;;  %2099 = vst.msk [vmem:[#allocation3 + $0x130] sm:$0xf] %vm627_vm0, %v2020_v21  ;;  %v1963_v50 = vrot.slane %v1848_v47, 5 }
 0x15a   : > { %v2994_v3 = vld [vmem:[#allocation2 + $0x8c] sm:$0x3]  ;;  %v3118_v4 = vrot.slane %v2993_v63, 6  ;;  %1723 = vrot.lane.b32.xlu2 %v1650_v51, %s5286_s29  ;;  %v1710_v53 = vpop.permute.xlu1 %1709  ;;  %v2748_v33 = vsel %vm5432_vm4, %v4623_v12, %v2747_v43  ;;  %v2749_v42 = vrot.slane %v2747_v43, 4  ;;  %941 = vst.msk [vmem:[#allocation3 + $0x90] sm:$0xf] %vm627_vm0, %v909_v60 }
 0x15b   : > { %v3121_v22 = vrot.slane %v2994_v3, 6  ;;  %1804 = vst.msk [vmem:[#allocation3 + $0x18] sm:$0xf] %vm1801_vm2, %v1710_v53  ;;  %v2750_v51 = vrot.slane %v2643_v37, 5  ;;  %v979_v26 = vld [vmem:[#allocation2 + $0x48] sm:$0xe]  ;;  %v1964_v57 = vsel %vm5432_vm4, %v1962_v49, %v1963_v50  ;;  %v2236_v3 = vsel %vm5456_vm8, %v2234_v39, %v2235_v34 }
 0x15c   : > { %v3120_v7 = vrot.slane %v3118_v4, 4  ;;  %v6086_v15 = vpop.permute.xlu2 %1524  ;;  %v3119_v19 = vsel %vm5456_vm8, %v4644_v54, %v3118_v4  ;;  %2517 = vrot.lane.b32.xlu0 %v2448_v5, %s5285_s21  ;;  %v4991_v44 = vld [vmem:[#allocation3 + $0x20] sm:$0xf0]  ;;  %v5048_v63 = vld [vmem:[%s7054_s3 + $0x68] sm:$0xff]  ;;  %2082 = vst.msk [vmem:[#allocation3 + $0x64] sm:$0xf] %vm627_vm0, %v1961_v11 }
 0x15d   : > { %3225 = vst.msk [vmem:[#allocation3 + $0xb0] sm:$0xf] %vm627_vm0, %v3119_v19  ;;  %v910_v1 = vld [vmem:[#allocation2 + $0x4c] sm:$0xf]  ;;  %v4563_v4 = vrot.slane %v979_v26, 9  ;;  %v1104_v5 = vrot.slane %v980_v40, 5  ;;  %v2751_v9 = vsel %vm5432_vm4, %v2749_v42, %v2750_v51  ;;  %3835 = vmatpush.bf16.msrb.mxu2 %v5048_v63 }
 0x15e   : > { %v3122_v24 = vsel %vm5456_vm8, %v3120_v7, %v3121_v22  ;;  %v2317_v31 = vpop.permute.xlu0 %2316  ;;  %v921_v8 = vld [vmem:[#allocation2 + $0x90] sm:$0xf]  ;;  %2083 = vst.msk [vmem:[#allocation3 + $0x70] sm:$0xf] %vm627_vm0, %v1964_v57  ;;  %v922_v12 = vld [vmem:[#allocation2 + $0x94] sm:$0xf] }
 0x15f   : > { %3226 = vst.msk [vmem:[#allocation3 + $0xbc] sm:$0xf] %vm627_vm0, %v3122_v24  ;;  %v981_v22 = vld [vmem:[#allocation2 + $0x50] sm:$0x1]  ;;  %v1105_v43 = vsel %vm5432_vm4, %v4563_v4, %v1104_v5  ;;  %v1106_v16 = vrot.slane %v1104_v5, 4  ;;  %v5047_v19 = vld [vmem:[%s7054_s3 + $0x60] sm:$0xff] }
 0x160   : > { %2411 = vst.msk [vmem:[#allocation3 + $0x10] sm:$0xf] %vm1268_vm15, %v2317_v31  ;;  %2851 = vrot.lane.b32.xlu1 %v2748_v33, %s5286_s29  ;;  %v1107_v17 = vrot.slane %v981_v22, 5  ;;  %v925_v21 = vld [vmem:[#allocation2 + $0xa8] sm:$0xf]  ;;  %v1446_v33 = vrot.slane %v1444_v23, 4 }
 0x161   : > { %942 = vst.msk [vmem:[#allocation3 + $0x9c] sm:$0xf] %vm627_vm0, %v910_v1  ;;  %v1321_v28 = vld [vmem:[#allocation2 + $0x50] sm:$0x3]  ;;  %v2449_v10 = vld [vmem:[#allocation2 + $0x54] sm:$0xf]  ;;  %3836 = vmatpush.bf16.msrb.mxu2 %v5047_v19 }
 0x162   : > { %1536 = vrot.lane.b32.xlu2 %v1445_v38, %s5285_s21  ;;  %v2884_v59 = vpop.permute.xlu1 %2883  ;;  %v4667_v13 = vld [vmem:[#allocation3 + $0x18] sm:$0xf]  ;;  %953 = vst.msk [vmem:[#allocation3 + $0x120] sm:$0xf] %vm627_vm0, %v921_v8  ;;  %v926_v31 = vld [vmem:[#allocation2 + $0xac] sm:$0xf]  ;;  %v1108_v36 = vsel %vm5432_vm4, %v1106_v16, %v1107_v17 }
 0x163   : > { %2959 = vst.msk [vmem:[#allocation3 + $0xf4] sm:$0xf] %vm1801_vm2, %v2884_v59  ;;  %v4668_v48 = vor.u32 %v4991_v44, %v4667_v13  ;;  %v1447_v34 = vrot.slane %v1321_v28, 6  ;;  %v923_v37 = vld [vmem:[#allocation2 + $0x9c] sm:$0xf]  ;;  %v5044_v14 = vld [vmem:[%s7054_s3 + $0x48] sm:$0xff] }
 0x164   : > { %v6115_v0 = vpop.permute.xlu2 %2881  ;;  %v4747_v45 = vld [vmem:[#allocation3 + $0xb0] sm:$0xf]  ;;  %2330 = vrot.lane.b32.xlu0 %v2233_v46, %s5284_s20  ;;  %954 = vst.msk [vmem:[#allocation3 + $0x12c] sm:$0xf] %vm627_vm0, %v922_v12  ;;  %v5013_v42 = vld [vmem:[#allocation3 + $0xd0] sm:$0xf0] }
 0x165   : > { %3757 = vmatmul.bf16.gmra.mxu1 %v4668_v48  ;;  %957 = vst.msk [vmem:[#allocation3 + $0x150] sm:$0xf] %vm627_vm0, %v925_v21  ;;  %3837 = vmatpush.bf16.msrb.mxu2 %v5046_v29  ;;  %v924_v39 = vld [vmem:[#allocation2 + $0xa0] sm:$0xf]  ;;  %v1448_v41 = vsel %vm5456_vm8, %v1446_v33, %v1447_v34  ;;  %v4759_v52 = vld [vmem:[#allocation3 + $0xc8] sm:$0xf] }
 0x166   : > { %v5010_v54 = vld [vmem:[#allocation3 + $0xb8] sm:$0xf0]  ;;  %v1523_v61 = vpop.permute.xlu0 %1522  ;;  %958 = vst.msk [vmem:[#allocation3 + $0x15c] sm:$0xf] %vm627_vm0, %v926_v31  ;;  %v4760_v44 = vor.u32 %v5013_v42, %v4759_v52  ;;  %v1651_v27 = vld [vmem:[#allocation2 + $0x54] sm:$0xf] }
 0x167   : > { %v4748_v62 = vor.u32 %v5010_v54, %v4747_v45  ;;  %1614 = vst.msk [vmem:[#allocation3 + $0x3c] sm:$0xf] %vm1608_vm1, %v1523_v61  ;;  %v2644_v60 = vld [vmem:[#allocation2 + $0x54] sm:$0xe]  ;;  %v1652_v59 = vld [vmem:[#allocation2 + $0x58] sm:$0xf] }
 0x168   : > { %2332 = vrot.lane.b32.xlu1 %v2236_v3, %s5284_s20  ;;  %955 = vst.msk [vmem:[#allocation3 + $0x138] sm:$0xf] %vm627_vm0, %v923_v37  ;;  %v2645_v13 = vld [vmem:[#allocation2 + $0x58] sm:$0xf]  ;;  %v1322_v46 = vld [vmem:[#allocation2 + $0x54] sm:$0xc] }
 0x169   : > { %4924 = vmatmul.msk.bf16.gmra.mxu0 %vm3695_vm14, %v4748_v62  ;;  %956 = vst.msk [vmem:[#allocation3 + $0x144] sm:$0xf] %vm627_vm0, %v924_v39  ;;  %v6181_v47 = vld [vmem:[#allocation2 + $0x58] sm:$0xf]  ;;  %v4624_v11 = vrot.slane %v2644_v60, 9  ;;  %v2754_v50 = vrot.slane %v2645_v13, 5 }
 0x16a   : > { %2853 = vrot.lane.b32.xlu2 %v2751_v9, %s5286_s29  ;;  %v6139_v53 = vpop.permute.xlu1 %2879  ;;  %v2450_v45 = vld [vmem:[#allocation2 + $0x58] sm:$0xf]  ;;  %v5043_v26 = vld [vmem:[%s7054_s3 + $0x40] sm:$0xff]  ;;  %v4580_v40 = vrot.slane %v1322_v46, 10  ;;  %v1451_v25 = vrot.slane %v6181_v47, 6 }
 0x16b   : > { %v2122_v51 = vld [vmem:[#allocation2 + $0x58] sm:$0xf]  ;;  %v2121_v54 = vld [vmem:[#allocation2 + $0x54] sm:$0xc]  ;;  %v2755_v62 = vsel %vm5432_vm4, %v4624_v11, %v2754_v50  ;;  %v2123_v1 = vld [vmem:[#allocation2 + $0x5c] sm:$0x3] }
 0x16c   : > { %v1716_v7 = vpop.permute.xlu2 %1715  ;;  %1196 = vrot.lane.b32.xlu0 %v1105_v43, %s5284_s20  ;;  %v2239_v61 = vrot.slane %v2122_v51, 6  ;;  %v4610_v63 = vrot.slane %v2121_v54, 10  ;;  %v1452_v3 = vsel %vm5456_vm8, %v4580_v40, %v1451_v25  ;;  %v1849_v4 = vld [vmem:[#allocation2 + $0x54] sm:$0xe]  ;;  %v4771_v5 = vld [vmem:[#allocation3 + $0xe0] sm:$0xf] }
 0x16d   : > { %1807 = vst.msk [vmem:[#allocation3 + $0x3c] sm:$0xf] %vm1801_vm2, %v1716_v7  ;;  %v5016_v8 = vld [vmem:[#allocation3 + $0xe8] sm:$0xf0]  ;;  %v1850_v22 = vld [vmem:[#allocation2 + $0x58] sm:$0xf] }
 0x16e   : > { %v2550_v24 = vpop.permute.xlu0 %2549  ;;  %v2646_v9 = vld [vmem:[#allocation2 + $0x5c] sm:$0x1]  ;;  %v4594_v12 = vrot.slane %v1849_v4, 9  ;;  %v2241_v7 = vrot.slane %v2239_v61, 4  ;;  %v2242_v16 = vrot.slane %v2123_v1, 6  ;;  %v1967_v19 = vrot.slane %v1850_v22, 5 }
 0x16f   : > { %2624 = vst.msk [vmem:[#allocation3 + $0x100] sm:$0xf] %vm1608_vm1, %v2550_v24  ;;  %v982_v17 = vld [vmem:[#allocation2 + $0x54] sm:$0xe]  ;;  %v2240_v21 = vsel %vm5456_vm8, %v4610_v63, %v2239_v61  ;;  %v2756_v29 = vrot.slane %v2754_v50, 4  ;;  %v2757_v31 = vrot.slane %v2646_v9, 5 }
 0x170   : > { %2960 = vst.msk [vmem:[#allocation3 + $0x100] sm:$0xf] %vm1801_vm2, %v6039_v2  ;;  %1198 = vrot.lane.b32.xlu1 %v1108_v36, %s5284_s20  ;;  %v5045_v2 = vld [vmem:[%s7054_s3 + $0x50] sm:$0xff]  ;;  %v983_v36 = vld [vmem:[#allocation2 + $0x58] sm:$0xf]  ;;  %v1968_v33 = vsel %vm5432_vm4, %v4594_v12, %v1967_v19  ;;  %v1969_v34 = vrot.slane %v1967_v19, 4 }
 0x171   : > { %3838 = vmatpush.bf16.msrb.mxu2 %v5045_v2  ;;  %v911_v24 = vld [vmem:[#allocation2 + $0x54] sm:$0xf]  ;;  %2084 = vst.msk [vmem:[#allocation3 + $0x7c] sm:$0xf] %vm627_vm0, %v1968_v33  ;;  %v1111_v42 = vrot.slane %v983_v36, 5  ;;  %v2758_v52 = vsel %vm5432_vm4, %v2756_v29, %v2757_v31  ;;  %v1453_v50 = vrot.slane %v1451_v25, 4 }
 0x172   : > { %2519 = vrot.lane.b32.xlu2 %v2449_v10, %s5285_s21  ;;  %v2321_v38 = vpop.permute.xlu1 %2320  ;;  %v1851_v10 = vld [vmem:[#allocation2 + $0x5c] sm:$0x1]  ;;  %943 = vst.msk [vmem:[#allocation3 + $0xa8] sm:$0xf] %vm627_vm0, %v911_v24  ;;  %v912_v2 = vld [vmem:[#allocation2 + $0x58] sm:$0xf] }
 0x173   : > { %2413 = vst.msk [vmem:[#allocation3 + $0x28] sm:$0xf] %vm1268_vm15, %v2321_v38  ;;  %v4772_v38 = vor.u32 %v5016_v8, %v4771_v5  ;;  %v1970_v39 = vrot.slane %v1851_v10, 5  ;;  %v1324_v46 = vld [vmem:[#allocation2 + $0x5c] sm:$0x3] }
 0x174   : > { %v2844_v23 = vpop.permute.xlu2 %2843  ;;  %1538 = vrot.lane.b32.xlu0 %v1448_v41, %s5285_s21  ;;  %v2243_v41 = vsel %vm5456_vm8, %v2241_v7, %v2242_v16  ;;  %944 = vst.msk [vmem:[#allocation3 + $0xb4] sm:$0xf] %vm627_vm0, %v912_v2  ;;  %v1454_v51 = vrot.slane %v1324_v46, 6  ;;  %v4994_v54 = vld [vmem:[#allocation3 + $0x38] sm:$0xf0] }
 0x175   : > { %3839 = vmatpush.bf16.msrb.mxu2 %v5044_v14  ;;  %v1971_v14 = vsel %vm5432_vm4, %v1969_v34, %v1970_v39  ;;  %v1653_v25 = vld [vmem:[#allocation2 + $0x60] sm:$0xf]  ;;  %v2648_v1 = vld [vmem:[#allocation2 + $0x64] sm:$0xf]  ;;  %v2126_v33 = vld [vmem:[#allocation2 + $0x68] sm:$0x3] }
 0x176   : > { %v6173_v6 = vpop.permute.xlu0 %2545  ;;  %2085 = vst.msk [vmem:[#allocation3 + $0x88] sm:$0xf] %vm627_vm0, %v1971_v14  ;;  %v2647_v63 = vld [vmem:[#allocation2 + $0x60] sm:$0xe]  ;;  %v6244_v5 = vld [vmem:[#allocation2 + $0x64] sm:$0xf] }
 0x177   : > { %v1325_v4 = vld [vmem:[#allocation2 + $0x60] sm:$0xc]  ;;  %v2452_v9 = vld [vmem:[#allocation2 + $0x64] sm:$0xf]  ;;  %v4625_v22 = vrot.slane %v2647_v63, 9  ;;  %v2761_v12 = vrot.slane %v2648_v1, 5 }
 0x178   : > { %1725 = vrot.lane.b32.xlu1 %v1651_v27, %s5286_s29  ;;  %v2124_v10 = vld [vmem:[#allocation2 + $0x60] sm:$0xc]  ;;  %v1854_v46 = vld [vmem:[#allocation2 + $0x68] sm:$0x1]  ;;  %v2655_v18 = vld [vmem:[#allocation2 + $0x80] sm:$0x1] }
 0x179   : > { %4925 = vmatmul.msk.bf16.gmra.mxu0 %vm3695_vm14, %v4760_v44  ;;  %3840 = vmatpush.bf16.msrb.mxu2 %v5043_v26  ;;  %v984_v44 = vld [vmem:[#allocation2 + $0x5c] sm:$0x1]  ;;  %v2762_v31 = vsel %vm5432_vm4, %v4625_v22, %v2761_v12  ;;  %v4611_v36 = vrot.slane %v2124_v10, 10 }
 0x17a   : > { %1727 = vrot.lane.b32.xlu2 %v1652_v59, %s5286_s29  ;;  %v1187_v48 = vpop.permute.xlu1 %1186  ;;  %v1113_v59 = vrot.slane %v1111_v42, 4  ;;  %v1114_v13 = vrot.slane %v984_v44, 5  ;;  %v2763_v44 = vrot.slane %v2761_v12, 4  ;;  %v1327_v12 = vld [vmem:[#allocation2 + $0x68] sm:$0x3] }
 0x17b   : > { %1276 = vst.msk [vmem:[#allocation3 + $0x54] sm:$0xf] %vm1268_vm15, %v1187_v48 }
 0x17c   : > { %v6184_v49 = vpop.permute.xlu2 %1528  ;;  %2521 = vrot.lane.b32.xlu0 %v2450_v45, %s5285_s21  ;;  %v2451_v45 = vld [vmem:[#allocation2 + $0x60] sm:$0xf]  ;;  %v1115_v11 = vsel %vm5432_vm4, %v1113_v59, %v1114_v13 }
 0x17e   : > { %v2319_v57 = vpop.permute.xlu0 %2318 }
 0x17f   : > { %2412 = vst.msk [vmem:[#allocation3 + $0x1c] sm:$0xf] %vm1268_vm15, %v2319_v57  ;;  %v1455_v57 = vsel %vm5456_vm8, %v1453_v50, %v1454_v51  ;;  %v1977_v51 = vrot.slane %v1854_v46, 5  ;;  %v6315_v46 = vld [vmem:[#allocation2 + $0x70] sm:$0xf] }
 0x180   : > { %2855 = vrot.lane.b32.xlu1 %v2755_v62, %s5286_s29 }
 0x182   : > { %1540 = vrot.lane.b32.xlu2 %v1452_v3, %s5285_s21  ;;  %v2508_v43 = vpop.permute.xlu1 %2507  ;;  %v1654_v3 = vld [vmem:[#allocation2 + $0x64] sm:$0xf] }
 0x183   : > { %2603 = vst.msk [vmem:[#allocation3 + $0x4] sm:$0xf] %vm1608_vm1, %v2508_v43  ;;  %v2125_v43 = vld [vmem:[#allocation2 + $0x64] sm:$0xf] }
 0x184   : > { %v2846_v28 = vpop.permute.xlu2 %2845  ;;  %2939 = vst.msk [vmem:[#allocation3 + $0x4] sm:$0xf] %vm1801_vm2, %v2844_v23  ;;  %2334 = vrot.lane.b32.xlu0 %v2240_v21, %s5284_s20  ;;  %v4564_v23 = vrot.slane %v982_v17, 9  ;;  %v4581_v21 = vrot.slane %v1325_v4, 10  ;;  %v2246_v29 = vrot.slane %v2125_v43, 6 }
 0x186   : > { %v1185_v37 = vpop.permute.xlu0 %1184  ;;  %v2248_v39 = vrot.slane %v2246_v29, 4 }
 0x187   : > { %1275 = vst.msk [vmem:[#allocation3 + $0x48] sm:$0xf] %vm1268_vm15, %v1185_v37  ;;  %v2649_v37 = vld [vmem:[#allocation2 + $0x68] sm:$0x1] }
 0x188   : > { %1615 = vst.msk [vmem:[#allocation3 + $0x48] sm:$0xf] %vm1608_vm1, %v6086_v15  ;;  %2336 = vrot.lane.b32.xlu1 %v2243_v41, %s5284_s20  ;;  %v1112_v15 = vsel %vm5432_vm4, %v4564_v23, %v1111_v42  ;;  %v2249_v41 = vrot.slane %v2126_v33, 6  ;;  %v1852_v23 = vld [vmem:[#allocation2 + $0x60] sm:$0xe]  ;;  %v2764_v14 = vrot.slane %v2649_v37, 5 }
 0x189   : > { %4926 = vmatmul.msk.bf16.gmra.mxu0 %vm3695_vm14, %v4772_v38  ;;  %v1853_v42 = vld [vmem:[#allocation2 + $0x64] sm:$0xf]  ;;  %v4595_v59 = vrot.slane %v1852_v23, 9 }
 0x18a   : > { %2857 = vrot.lane.b32.xlu2 %v2758_v52, %s5286_s29  ;;  %v1714_v27 = vpop.permute.xlu1 %1713  ;;  %v913_v52 = vld [vmem:[#allocation2 + $0x60] sm:$0xf]  ;;  %v1974_v13 = vrot.slane %v1853_v42, 5 }
 0x18b   : > { %1806 = vst.msk [vmem:[#allocation3 + $0x30] sm:$0xf] %vm1801_vm2, %v1714_v27  ;;  %v4987_v16 = vld [vmem:[#allocation3 + $0x4] sm:$0xf]  ;;  %v985_v27 = vld [vmem:[#allocation2 + $0x60] sm:$0xe] }
 0x18c   : > { %v2512_v60 = vpop.permute.xlu2 %2511  ;;  %1200 = vrot.lane.b32.xlu0 %v1112_v15, %s5284_s20  ;;  %v986_v15 = vld [vmem:[#allocation2 + $0x64] sm:$0xf]  ;;  %945 = vst.msk [vmem:[#allocation3 + $0xc0] sm:$0xf] %vm627_vm0, %v913_v52 }
 0x18d   : > { %2605 = vst.msk [vmem:[#allocation3 + $0x1c] sm:$0xf] %vm1608_vm1, %v2512_v60 }
 0x18e   : > { %v1527_v48 = vpop.permute.xlu0 %1526 }
 0x18f   : > { %1616 = vst.msk [vmem:[#allocation3 + $0x54] sm:$0xf] %vm1608_vm1, %v1527_v48 }
 0x190   : > { %1202 = vrot.lane.b32.xlu1 %v1115_v11, %s5284_s20  ;;  %v6271_v11 = vld [vmem:[%s7053_s2] ss:$0 sm:$0xff] }
 0x192   : > { %2523 = vrot.lane.b32.xlu2 %v2451_v45, %s5285_s21  ;;  %v2510_v26 = vpop.permute.xlu1 %2509  ;;  %v4679_v40 = vld [vmem:[#allocation3 + $0x30] sm:$0xf]  ;;  %v2250_v45 = vsel %vm5456_vm8, %v2248_v39, %v2249_v41 }
 0x193   : > { %2604 = vst.msk [vmem:[#allocation3 + $0x10] sm:$0xf] %vm1608_vm1, %v2510_v26  ;;  %v4680_v61 = vor.u32 %v4994_v54, %v4679_v40  ;;  %v914_v26 = vld [vmem:[#allocation2 + $0x64] sm:$0xf]  ;;  %v4565_v40 = vrot.slane %v985_v27, 9  ;;  %v1118_v54 = vrot.slane %v986_v15, 5 }
 0x194   : > { %v1720_v62 = vpop.permute.xlu2 %1719  ;;  %2940 = vst.msk [vmem:[#allocation3 + $0x10] sm:$0xf] %vm1801_vm2, %v2846_v28  ;;  %1542 = vrot.lane.b32.xlu0 %v1455_v57, %s5285_s21  ;;  %v1458_v28 = vrot.slane %v6244_v5, 6  ;;  %v1975_v57 = vsel %vm5432_vm4, %v4595_v59, %v1974_v13  ;;  %v2650_v27 = vld [vmem:[#allocation2 + $0x6c] sm:$0xe] }
 0x195   : > { %3762 = vmatmul.bf16.gmra.mxu1 %v4680_v61  ;;  %1809 = vst.msk [vmem:[#allocation3 + $0x54] sm:$0xf] %vm1801_vm2, %v1720_v62  ;;  %v1976_v61 = vrot.slane %v1974_v13, 4  ;;  %v2765_v62 = vsel %vm5432_vm4, %v2763_v44, %v2764_v14  ;;  %v1119_v4 = vsel %vm5432_vm4, %v4565_v40, %v1118_v54  ;;  %v2651_v15 = vld [vmem:[#allocation2 + $0x70] sm:$0xf] }
 0x196   : > { %v2323_v47 = vpop.permute.xlu0 %2322  ;;  %v1459_v34 = vsel %vm5456_vm8, %v4581_v21, %v1458_v28  ;;  %2086 = vst.msk [vmem:[#allocation3 + $0x94] sm:$0xf] %vm627_vm0, %v1975_v57  ;;  %v2454_v13 = vld [vmem:[#allocation2 + $0x70] sm:$0xf]  ;;  %v2768_v57 = vrot.slane %v2651_v15, 5 }
 0x197   : > { %2414 = vst.msk [vmem:[#allocation3 + $0x34] sm:$0xf] %vm1268_vm15, %v2323_v47  ;;  %v987_v47 = vld [vmem:[#allocation2 + $0x68] sm:$0x1]  ;;  %v1978_v63 = vsel %vm5432_vm4, %v1976_v61, %v1977_v51  ;;  %v4626_v51 = vrot.slane %v2650_v27, 9 }
 0x198   : > { %1729 = vrot.lane.b32.xlu1 %v1653_v25, %s5286_s29  ;;  %946 = vst.msk [vmem:[#allocation3 + $0xcc] sm:$0xf] %vm627_vm0, %v914_v26  ;;  %v1121_v22 = vrot.slane %v987_v47, 5  ;;  %v1856_v15 = vld [vmem:[#allocation2 + $0x70] sm:$0xf] }
 0x199   : > { %v548_v60 = vpop.f32.mrf.mxu2  ;;  %2087 = vst.msk [vmem:[#allocation3 + $0xa0] sm:$0xf] %vm627_vm0, %v1978_v63  ;;  %v2127_v63 = vld [vmem:[#allocation2 + $0x6c] sm:$0xc] }
 0x19a   : > { %1731 = vrot.lane.b32.xlu2 %v1654_v3, %s5286_s29  ;;  %v2325_v8 = vpop.permute.xlu1 %2324  ;;  %v549_v50 = vadd.f32 %v6271_v11, %v548_v60  ;;  %v1328_v60 = vld [vmem:[#allocation2 + $0x6c] sm:$0xc] }
 0x19b   : > { %2415 = vst.msk [vmem:[#allocation3 + $0x40] sm:$0xf] %vm1268_vm15, %v2325_v8  ;;  %v4657_v17 = vld [vmem:[#allocation3 + $0xc] sm:$0xf0]  ;;  %v4582_v61 = vrot.slane %v1328_v60, 10 }
 0x19c   : > { %v6247_v7 = vpop.permute.xlu2 %1532  ;;  %2525 = vrot.lane.b32.xlu0 %v2452_v9, %s5285_s21  ;;  %v4660_v19 = vor.u32 %v4987_v16, %v4657_v17  ;;  %v589_v25 = vmax.f32 %v549_v50, 0.0  ;;  %v1120_v9 = vrot.slane %v1118_v54, 4 }
 0x19e   : > { %3841 = vmatmul.bf16.vlgmr.msrb.gmra.mxu2 %v4660_v19  ;;  %v1189_v24 = vpop.permute.xlu0 %1188  ;;  %v621_v3 = vpack.c.bf16 %v589_v25, %v589_v25  ;;  %v2453_v19 = vld [vmem:[#allocation2 + $0x6c] sm:$0xf]  ;;  %v1122_v10 = vsel %vm5432_vm4, %v1120_v9, %v1121_v22  ;;  %v1465_v25 = vrot.slane %v6315_v46, 6  ;;  %v2129_v9 = vld [vmem:[#allocation2 + $0x74] sm:$0x3] }
 0x19f   : > { %1277 = vst.msk [vmem:[#allocation3 + $0x60] sm:$0xf] %vm1268_vm15, %v1189_v24  ;;  %v1460_v24 = vrot.slane %v1458_v28, 4 }
 0x1a0   : > { %1617 = vst.msk [vmem:[#allocation3 + $0x60] sm:$0xf] %vm1608_vm1, %v6184_v49  ;;  %2859 = vrot.lane.b32.xlu1 %v2762_v31, %s5286_s29  ;;  %v2247_v49 = vsel %vm5456_vm8, %v4611_v36, %v2246_v29  ;;  %v784_v43 = vrot.slane %v621_v3, 7  ;;  %v1461_v29 = vrot.slane %v1327_v12, 6 }
 0x1a1   : > { %v550_v16 = vpop.f32.mrf.mxu2 }
 0x1a2   : > { %1544 = vrot.lane.b32.xlu2 %v1459_v34, %s5285_s21  ;;  %v1191_v38 = vpop.permute.xlu1 %1190  ;;  %888 = vst.msk [vmem:[#allocation2 + $0xb4] sm:$0xe] %vm848_vm10, %v784_v43  ;;  %v551_v21 = vadd.f32 %v6271_v11, %v550_v16  ;;  %v4997_v34 = vld [vmem:[#allocation3 + $0x50] sm:$0xf0]  ;;  %v785_v37 = vrot.slane %v784_v43, 4  ;;  %v1462_v39 = vsel %vm5456_vm8, %v1460_v24, %v1461_v29  ;;  %v2769_v43 = vsel %vm5432_vm4, %v4626_v51, %v2768_v57 }
 0x1a3   : > { %1278 = vst.msk [vmem:[#allocation3 + $0x6c] sm:$0xf] %vm1268_vm15, %v1191_v38 }
 0x1a4   : > { %v2850_v2 = vpop.permute.xlu2 %2849  ;;  %2338 = vrot.lane.b32.xlu0 %v2247_v49, %s5284_s20  ;;  %v590_v31 = vmax.f32 %v551_v21, 0.0  ;;  %v1655_v49 = vld [vmem:[#allocation2 + $0x6c] sm:$0xf] }
 0x1a6   : > { %v1531_v48 = vpop.permute.xlu0 %1530  ;;  %v622_v38 = vpack.c.bf16 %v590_v31, %v590_v31  ;;  %v2652_v31 = vld [vmem:[#allocation2 + $0x74] sm:$0x1] }
 0x1a7   : > { %1618 = vst.msk [vmem:[#allocation3 + $0x6c] sm:$0xf] %vm1608_vm1, %v1531_v48 }
 0x1a8   : > { %2340 = vrot.lane.b32.xlu1 %v2250_v45, %s5284_s20  ;;  %v786_v41 = vrot.slane %v622_v38, 7  ;;  %v989_v38 = vld [vmem:[#allocation2 + $0x70] sm:$0xf] }
 0x1a9   : > { %v553_v23 = vpop.f32.mrf.mxu2  ;;  %v3004_v47 = vld [vmem:[#allocation2 + $0xb4] sm:$0xc] }
 0x1aa   : > { %2861 = vrot.lane.b32.xlu2 %v2765_v62, %s5286_s29  ;;  %v1718_v1 = vpop.permute.xlu1 %1717  ;;  %v787_v52 = vsel %vm5563_vm13, %v785_v37, %v786_v41  ;;  %v788_v44 = vrot.slane %v786_v41, 4  ;;  %v554_v14 = vadd.f32 %v6271_v11, %v553_v23  ;;  %v2128_v62 = vld [vmem:[#allocation2 + $0x70] sm:$0xf]  ;;  %v4648_v12 = vrot.slane %v3004_v47, 10 }
 0x1ab   : > { %1808 = vst.msk [vmem:[#allocation3 + $0x48] sm:$0xf] %vm1801_vm2, %v1718_v1 }
 0x1ac   : > { %v2516_v8 = vpop.permute.xlu2 %2515  ;;  %1204 = vrot.lane.b32.xlu0 %v1119_v4, %s5284_s20  ;;  %889 = vst.msk [vmem:[#allocation2 + $0xb8] sm:$0xf] %vm627_vm0, %v787_v52  ;;  %v591_v59 = vmax.f32 %v554_v14, 0.0 }
 0x1ad   : > { %2607 = vst.msk [vmem:[#allocation3 + $0x34] sm:$0xf] %vm1608_vm1, %v2516_v8  ;;  %v2253_v8 = vrot.slane %v2128_v62, 6  ;;  %v1981_v62 = vrot.slane %v1856_v15, 5 }
 0x1ae   : > { %v2514_v17 = vpop.permute.xlu0 %2513  ;;  %890 = vst.msk [vmem:[#allocation2 + $0xbc] sm:$0x1] %vm642_vm9, %v788_v44  ;;  %v623_v26 = vpack.c.bf16 %v591_v59, %v591_v59  ;;  %v1125_v44 = vrot.slane %v989_v38, 5  ;;  %v990_v59 = vld [vmem:[#allocation2 + $0x74] sm:$0x1] }
 0x1af   : > { %2606 = vst.msk [vmem:[#allocation3 + $0x28] sm:$0xf] %vm1608_vm1, %v2514_v17  ;;  %v4612_v17 = vrot.slane %v2127_v63, 10  ;;  %v1128_v63 = vrot.slane %v990_v59, 5  ;;  %v2654_v59 = vld [vmem:[#allocation2 + $0x7c] sm:$0xf] }
 0x1b0   : > { %2942 = vst.msk [vmem:[#allocation3 + $0x28] sm:$0xf] %vm1801_vm2, %v2850_v2  ;;  %1206 = vrot.lane.b32.xlu1 %v1122_v10, %s5284_s20  ;;  %v1656_v2 = vld [vmem:[#allocation2 + $0x70] sm:$0xf]  ;;  %v789_v1 = vrot.slane %v623_v26, 7  ;;  %v1466_v10 = vsel %vm5456_vm8, %v4582_v61, %v1465_v25  ;;  %v1127_v47 = vrot.slane %v1125_v44, 4 }
 0x1b1   : > { %v555_v3 = vpop.f32.mrf.mxu2 }
 0x1b2   : > { %2527 = vrot.lane.b32.xlu2 %v2453_v19, %s5285_s21  ;;  %v2848_v36 = vpop.permute.xlu1 %2847  ;;  %v4691_v33 = vld [vmem:[#allocation3 + $0x48] sm:$0xf]  ;;  %891 = vst.msk [vmem:[#allocation2 + $0xc0] sm:$0xe] %vm848_vm10, %v789_v1  ;;  %v556_v22 = vadd.f32 %v6271_v11, %v555_v3  ;;  %v790_v37 = vrot.slane %v789_v1, 4 }
 0x1b3   : > { %2941 = vst.msk [vmem:[#allocation3 + $0x1c] sm:$0xf] %vm1801_vm2, %v2848_v36  ;;  %v4692_v5 = vor.u32 %v4997_v34, %v4691_v33  ;;  %v3005_v16 = vld [vmem:[#allocation2 + $0xb8] sm:$0xf]  ;;  %v2255_v33 = vrot.slane %v2253_v8, 4  ;;  %v2256_v34 = vrot.slane %v2129_v9, 6 }
 0x1b4   : > { %v1724_v28 = vpop.permute.xlu2 %1723  ;;  %1546 = vrot.lane.b32.xlu0 %v1462_v39, %s5285_s21  ;;  %v3146_v21 = vrot.slane %v3005_v16, 6  ;;  %v592_v24 = vmax.f32 %v556_v22, 0.0  ;;  %v2254_v39 = vsel %vm5456_vm8, %v4612_v17, %v2253_v8  ;;  %v1983_v8 = vrot.slane %v1981_v62, 4  ;;  %v1330_v17 = vld [vmem:[#allocation2 + $0x74] sm:$0x3] }
 0x1b5   : > { %1811 = vst.msk [vmem:[#allocation3 + $0x6c] sm:$0xf] %vm1801_vm2, %v1724_v28  ;;  %3767 = vmatmul.bf16.gmra.mxu1 %v4692_v5  ;;  %v3006_v19 = vld [vmem:[#allocation2 + $0xbc] sm:$0x3]  ;;  %v2770_v28 = vrot.slane %v2768_v57, 4  ;;  %v2257_v51 = vsel %vm5456_vm8, %v2255_v33, %v2256_v34 }
 0x1b6   : > { %v2327_v42 = vpop.permute.xlu0 %2326  ;;  %v3149_v29 = vrot.slane %v3006_v19, 6  ;;  %v3147_v41 = vsel %vm5456_vm8, %v4648_v12, %v3146_v21  ;;  %v3148_v23 = vrot.slane %v3146_v21, 4 }
 0x1b7   : > { %2416 = vst.msk [vmem:[#allocation3 + $0x4c] sm:$0xf] %vm1268_vm15, %v2327_v42  ;;  %v4669_v50 = vld [vmem:[#allocation3 + $0x24] sm:$0xf0]  ;;  %v1855_v42 = vld [vmem:[#allocation2 + $0x6c] sm:$0xe] }
 0x1b8   : > { %1733 = vrot.lane.b32.xlu1 %v1655_v49, %s5286_s29  ;;  %v2771_v49 = vrot.slane %v2652_v31, 5  ;;  %3233 = vst.msk [vmem:[#allocation3 + $0x110] sm:$0xf] %vm627_vm0, %v3147_v41  ;;  %v3150_v27 = vsel %vm5456_vm8, %v3148_v23, %v3149_v29  ;;  %v2455_v31 = vld [vmem:[#allocation2 + $0x78] sm:$0xf] }
 0x1b9   : > { %v558_v14 = vpop.f32.mrf.mxu2  ;;  %3234 = vst.msk [vmem:[#allocation3 + $0x11c] sm:$0xf] %vm627_vm0, %v3150_v27  ;;  %v3007_v22 = vld [vmem:[#allocation2 + $0xc0] sm:$0xc] }
 0x1ba   : > { %1735 = vrot.lane.b32.xlu2 %v1656_v2, %s5286_s29  ;;  %v2329_v48 = vpop.permute.xlu1 %2328  ;;  %v4990_v45 = vld [vmem:[#allocation3 + $0x1c] sm:$0xf]  ;;  %v2772_v57 = vsel %vm5432_vm4, %v2770_v28, %v2771_v49 }
 0x1bb   : > { %2417 = vst.msk [vmem:[#allocation3 + $0x58] sm:$0xf] %vm1268_vm15, %v2329_v48  ;;  %v4672_v40 = vor.u32 %v4990_v45, %v4669_v50  ;;  %v988_v2 = vld [vmem:[#allocation2 + $0x6c] sm:$0xe]  ;;  %v559_v45 = vadd.f32 %v6271_v11, %v558_v14  ;;  %v4596_v50 = vrot.slane %v1855_v42, 9 }
 0x1bc   : > { %v6318_v54 = vpop.permute.xlu2 %1536  ;;  %2529 = vrot.lane.b32.xlu0 %v2454_v13, %s5285_s21  ;;  %v4566_v26 = vrot.slane %v988_v2, 9  ;;  %v5000_v46 = vld [vmem:[#allocation3 + $0x68] sm:$0xf0] }
 0x1bd   : > { %3846 = vmatmul.bf16.gmra.mxu2 %v4672_v40  ;;  %v1857_v40 = vld [vmem:[#allocation2 + $0x74] sm:$0x1]  ;;  %v593_v61 = vmax.f32 %v559_v45, 0.0 }
 0x1be   : > { %v1193_v4 = vpop.permute.xlu0 %1192  ;;  %v1984_v9 = vrot.slane %v1857_v40, 5  ;;  %v1126_v12 = vsel %vm5432_vm4, %v4566_v26, %v1125_v44  ;;  %v1658_v26 = vld [vmem:[#allocation2 + $0x7c] sm:$0xf]  ;;  %v2775_v40 = vrot.slane %v2654_v59, 5  ;;  %v2657_v59 = vld [vmem:[#allocation2 + $0x88] sm:$0xf] }
 0x1bf   : > { %1279 = vst.msk [vmem:[#allocation3 + $0x78] sm:$0xf] %vm1268_vm15, %v1193_v4  ;;  %v625_v3 = vpack.c.bf16 %v593_v61, %v593_v61  ;;  %v1982_v4 = vsel %vm5432_vm4, %v4596_v50, %v1981_v62  ;;  %v4795_v16 = vld [vmem:[#allocation3 + $0x110] sm:$0xf] }
 0x1c0   : > { %1619 = vst.msk [vmem:[#allocation3 + $0x78] sm:$0xf] %vm1608_vm1, %v6247_v7  ;;  %2863 = vrot.lane.b32.xlu1 %v2769_v43, %s5286_s29  ;;  %v624_v7 = vpack.c.bf16 %v592_v24, %v592_v24  ;;  %v4649_v24 = vrot.slane %v3007_v22, 10  ;;  %v1985_v34 = vsel %vm5432_vm4, %v1983_v8, %v1984_v9  ;;  %v2131_v9 = vld [vmem:[#allocation2 + $0x7c] sm:$0xf]  ;;  %v2777_v22 = vrot.slane %v2775_v40, 4 }
 0x1c1   : > { %v794_v19 = vrot.slane %v625_v3, 7  ;;  %v560_v21 = vpop.f32.mrf.mxu2  ;;  %2088 = vst.msk [vmem:[#allocation3 + $0xac] sm:$0xf] %vm627_vm0, %v1982_v4 }
 0x1c2   : > { %1548 = vrot.lane.b32.xlu2 %v1466_v10, %s5285_s21  ;;  %v1195_v36 = vpop.permute.xlu1 %1194  ;;  %v791_v52 = vrot.slane %v624_v7, 7  ;;  %v5022_v10 = vld [vmem:[#allocation3 + $0x118] sm:$0xf0]  ;;  %v1467_v7 = vrot.slane %v1465_v25, 4  ;;  %2089 = vst.msk [vmem:[#allocation3 + $0xb8] sm:$0xf] %vm627_vm0, %v1985_v34 }
 0x1c3   : > { %1280 = vst.msk [vmem:[#allocation3 + $0x84] sm:$0xf] %vm1268_vm15, %v1195_v36  ;;  %v561_v36 = vadd.f32 %v6271_v11, %v560_v21  ;;  %v4796_v33 = vor.u32 %v5022_v10, %v4795_v16  ;;  %v795_v25 = vrot.slane %v794_v19, 4  ;;  %v2260_v10 = vrot.slane %v2131_v9, 6 }
 0x1c4   : > { %v6338_v5 = vpop.permute.xlu2 %2853  ;;  %2342 = vrot.lane.b32.xlu0 %v2254_v39, %s5284_s20  ;;  %v792_v13 = vsel %vm5563_vm13, %v790_v37, %v791_v52  ;;  %v793_v48 = vrot.slane %v791_v52, 4  ;;  %894 = vst.msk [vmem:[#allocation2 + $0xcc] sm:$0xe] %vm848_vm10, %v794_v19  ;;  %v1129_v37 = vsel %vm5432_vm4, %v1127_v47, %v1128_v63  ;;  %v1468_v39 = vrot.slane %v1330_v17, 6 }
 0x1c5   : > { %892 = vst.msk [vmem:[#allocation2 + $0xc4] sm:$0xf] %vm627_vm0, %v792_v13  ;;  %v594_v41 = vmax.f32 %v561_v36, 0.0  ;;  %4928 = vmatmul.msk.bf16.gmra.mxu3 %vm3695_vm14, %v4796_v33  ;;  %v2132_v36 = vld [vmem:[#allocation2 + $0x80] sm:$0x3] }
 0x1c6   : > { %v1535_v60 = vpop.permute.xlu0 %1534  ;;  %893 = vst.msk [vmem:[#allocation2 + $0xc8] sm:$0x1] %vm642_vm9, %v793_v48  ;;  %v1469_v44 = vsel %vm5456_vm8, %v1467_v7, %v1468_v39  ;;  %v2653_v48 = vld [vmem:[#allocation2 + $0x78] sm:$0xe] }
 0x1c7   : > { %1620 = vst.msk [vmem:[#allocation3 + $0x84] sm:$0xf] %vm1608_vm1, %v1535_v60  ;;  %v626_v2 = vpack.c.bf16 %v594_v41, %v594_v41  ;;  %v4627_v61 = vrot.slane %v2653_v48, 9  ;;  %v2262_v41 = vrot.slane %v2260_v10, 4 }
 0x1c8   : > { %2344 = vrot.lane.b32.xlu1 %v2257_v51, %s5284_s20  ;;  %v1657_v51 = vld [vmem:[#allocation2 + $0x78] sm:$0xf] }
 0x1c9   : > { %v796_v15 = vrot.slane %v626_v2, 7  ;;  %v2457_v2 = vld [vmem:[#allocation2 + $0x84] sm:$0xf] }
 0x1ca   : > { %2865 = vrot.lane.b32.xlu2 %v2772_v57, %s5286_s29  ;;  %v1722_v1 = vpop.permute.xlu1 %1721  ;;  %v2456_v57 = vld [vmem:[#allocation2 + $0x7c] sm:$0xf] }
 0x1cb   : > { %1810 = vst.msk [vmem:[#allocation3 + $0x60] sm:$0xf] %vm1801_vm2, %v1722_v1  ;;  %v797_v45 = vsel %vm5563_vm13, %v795_v25, %v796_v15  ;;  %v798_v50 = vrot.slane %v796_v15, 4  ;;  %v2130_v1 = vld [vmem:[#allocation2 + $0x78] sm:$0xc] }
 0x1cc   : > { %v2520_v43 = vpop.permute.xlu2 %2519  ;;  %1208 = vrot.lane.b32.xlu0 %v1126_v12, %s5284_s20  ;;  %v3008_v38 = vld [vmem:[#allocation2 + $0xc4] sm:$0xf]  ;;  %895 = vst.msk [vmem:[#allocation2 + $0xd0] sm:$0xf] %vm627_vm0, %v797_v45  ;;  %v3010_v3 = vld [vmem:[#allocation2 + $0xcc] sm:$0xc] }
 0x1cd   : > { %2609 = vst.msk [vmem:[#allocation3 + $0x4c] sm:$0xf] %vm1608_vm1, %v2520_v43  ;;  %v3009_v11 = vld [vmem:[#allocation2 + $0xc8] sm:$0x3]  ;;  %v3153_v28 = vrot.slane %v3008_v38, 6  ;;  %v2778_v12 = vrot.slane %v2655_v18, 5 }
 0x1ce   : > { %v2518_v29 = vpop.permute.xlu0 %2517  ;;  %v3156_v23 = vrot.slane %v3009_v11, 6  ;;  %896 = vst.msk [vmem:[#allocation2 + $0xd4] sm:$0x1] %vm642_vm9, %v798_v50  ;;  %v4650_v17 = vrot.slane %v3010_v3, 10  ;;  %v4613_v21 = vrot.slane %v2130_v1, 10 }
 0x1cf   : > { %2608 = vst.msk [vmem:[#allocation3 + $0x40] sm:$0xf] %vm1608_vm1, %v2518_v29  ;;  %v3155_v52 = vrot.slane %v3153_v28, 4  ;;  %v2776_v29 = vsel %vm5432_vm4, %v4627_v61, %v2775_v40  ;;  %v6432_v15 = vld [vmem:[#allocation2 + $0x88] sm:$0xf]  ;;  %v2782_v61 = vrot.slane %v2657_v59, 5 }
 0x1d0   : > { %2944 = vst.msk [vmem:[#allocation3 + $0x40] sm:$0xf] %vm1801_vm2, %v6338_v5  ;;  %1210 = vrot.lane.b32.xlu1 %v1129_v37, %s5284_s20  ;;  %v3154_v5 = vsel %vm5456_vm8, %v4649_v24, %v3153_v28  ;;  %v2779_v37 = vsel %vm5432_vm4, %v2777_v22, %v2778_v12  ;;  %v1659_v50 = vld [vmem:[#allocation2 + $0x84] sm:$0xf]  ;;  %v2267_v40 = vrot.slane %v6432_v15, 6 }
 0x1d1   : > { %v3157_v60 = vsel %vm5456_vm8, %v3155_v52, %v3156_v23  ;;  %3235 = vst.msk [vmem:[#allocation3 + $0x128] sm:$0xf] %vm627_vm0, %v3154_v5  ;;  %v2263_v23 = vrot.slane %v2132_v36, 6  ;;  %v2458_v52 = vld [vmem:[#allocation2 + $0x88] sm:$0xf] }
 0x1d2   : > { %2531 = vrot.lane.b32.xlu2 %v2455_v31, %s5285_s21  ;;  %v2852_v42 = vpop.permute.xlu1 %2851  ;;  %v4703_v49 = vld [vmem:[#allocation3 + $0x60] sm:$0xf]  ;;  %3236 = vst.msk [vmem:[#allocation3 + $0x134] sm:$0xf] %vm627_vm0, %v3157_v60  ;;  %v3015_v1 = vld [vmem:[#allocation2 + $0xe0] sm:$0x3] }
 0x1d3   : > { %2943 = vst.msk [vmem:[#allocation3 + $0x34] sm:$0xf] %vm1801_vm2, %v2852_v42  ;;  %v4704_v14 = vor.u32 %v5000_v46, %v4703_v49  ;;  %v3011_v31 = vld [vmem:[#allocation2 + $0xd0] sm:$0xf]  ;;  %v915_v42 = vld [vmem:[#allocation2 + $0x6c] sm:$0xf]  ;;  %v2264_v5 = vsel %vm5456_vm8, %v2262_v41, %v2263_v23 }
 0x1d4   : > { %v1728_v27 = vpop.permute.xlu2 %1727  ;;  %1550 = vrot.lane.b32.xlu0 %v1469_v44, %s5285_s21  ;;  %v3160_v34 = vrot.slane %v3011_v31, 6  ;;  %v916_v46 = vld [vmem:[#allocation2 + $0x70] sm:$0xf]  ;;  %947 = vst.msk [vmem:[#allocation3 + $0xd8] sm:$0xf] %vm627_vm0, %v915_v42  ;;  %v2784_v31 = vrot.slane %v2782_v61, 4 }
 0x1d5   : > { %1813 = vst.msk [vmem:[#allocation3 + $0x84] sm:$0xf] %vm1801_vm2, %v1728_v27  ;;  %3772 = vmatmul.bf16.gmra.mxu1 %v4704_v14  ;;  %v3012_v33 = vld [vmem:[#allocation2 + $0xd4] sm:$0x3]  ;;  %v2133_v14 = vld [vmem:[#allocation2 + $0x84] sm:$0xc] }
 0x1d6   : > { %v2331_v13 = vpop.permute.xlu0 %2330  ;;  %v3163_v38 = vrot.slane %v3012_v33, 6  ;;  %v3161_v39 = vsel %vm5456_vm8, %v4650_v17, %v3160_v34  ;;  %v3162_v11 = vrot.slane %v3160_v34, 4  ;;  %948 = vst.msk [vmem:[#allocation3 + $0xe4] sm:$0xf] %vm627_vm0, %v916_v46  ;;  %v1672_v30 = vld [vmem:[#allocation2 + $0xd0] sm:$0xf] }
 0x1d7   : > { %2418 = vst.msk [vmem:[#allocation3 + $0x64] sm:$0xf] %vm1268_vm15, %v2331_v13  ;;  %v4681_v63 = vld [vmem:[#allocation3 + $0x3c] sm:$0xf0] }
 0x1d8   : > { %1737 = vrot.lane.b32.xlu1 %v1657_v51, %s5286_s29  ;;  %v4807_v43 = vld [vmem:[#allocation3 + $0x128] sm:$0xf]  ;;  %v3164_v49 = vsel %vm5456_vm8, %v3162_v11, %v3163_v38  ;;  %3237 = vst.msk [vmem:[#allocation3 + $0x140] sm:$0xf] %vm627_vm0, %v3161_v39  ;;  %v1660_v51 = vld [vmem:[#allocation2 + $0x88] sm:$0xf] }
 0x1d9   : > { %v5025_v16 = vld [vmem:[#allocation3 + $0x130] sm:$0xf0]  ;;  %3238 = vst.msk [vmem:[#allocation3 + $0x14c] sm:$0xf] %vm627_vm0, %v3164_v49  ;;  %v2135_v11 = vld [vmem:[#allocation2 + $0x8c] sm:$0x3] }
 0x1da   : > { %1739 = vrot.lane.b32.xlu2 %v1658_v26, %s5286_s29  ;;  %v2333_v62 = vpop.permute.xlu1 %2332  ;;  %v4993_v47 = vld [vmem:[#allocation3 + $0x34] sm:$0xf]  ;;  %v4808_v24 = vor.u32 %v5025_v16, %v4807_v43  ;;  %v4614_v26 = vrot.slane %v2133_v14, 10  ;;  %v991_v43 = vld [vmem:[#allocation2 + $0x78] sm:$0xe]  ;;  %v3170_v16 = vrot.slane %v3015_v1, 6 }
 0x1db   : > { %2419 = vst.msk [vmem:[#allocation3 + $0x70] sm:$0xf] %vm1268_vm15, %v2333_v62  ;;  %v4684_v4 = vor.u32 %v4993_v47, %v4681_v63  ;;  %v3013_v62 = vld [vmem:[#allocation2 + $0xd8] sm:$0xc]  ;;  %v3014_v47 = vld [vmem:[#allocation2 + $0xdc] sm:$0xf] }
 0x1dc   : > { %v6401_v8 = vpop.permute.xlu2 %1540  ;;  %2533 = vrot.lane.b32.xlu0 %v2456_v57, %s5285_s21  ;;  %4929 = vmatmul.msk.bf16.gmra.mxu3 %vm3695_vm14, %v4808_v24  ;;  %v2656_v57 = vld [vmem:[#allocation2 + $0x84] sm:$0xe]  ;;  %v5003_v18 = vld [vmem:[#allocation3 + $0x80] sm:$0xf0]  ;;  %v2658_v63 = vld [vmem:[#allocation2 + $0x8c] sm:$0x1]  ;;  %v2268_v22 = vsel %vm5456_vm8, %v4614_v26, %v2267_v40 }
 0x1dd   : > { %3851 = vmatmul.bf16.gmra.mxu2 %v4684_v4  ;;  %v4651_v3 = vrot.slane %v3013_v62, 10  ;;  %v3167_v4 = vrot.slane %v3014_v47, 6  ;;  %v2785_v36 = vrot.slane %v2658_v63, 5  ;;  %v1333_v14 = vld [vmem:[#allocation2 + $0x80] sm:$0x3] }
 0x1de   : > { %v1197_v19 = vpop.permute.xlu0 %1196  ;;  %v2139_v26 = vld [vmem:[#allocation2 + $0x9c] sm:$0xc]  ;;  %v1858_v47 = vld [vmem:[#allocation2 + $0x78] sm:$0xe] }
 0x1df   : > { %1281 = vst.msk [vmem:[#allocation3 + $0x90] sm:$0xf] %vm1268_vm15, %v1197_v19  ;;  %v4819_v60 = vld [vmem:[#allocation3 + $0x140] sm:$0xf]  ;;  %v3168_v24 = vsel %vm5456_vm8, %v4651_v3, %v3167_v4  ;;  %v2786_v39 = vsel %vm5432_vm4, %v2784_v31, %v2785_v36  ;;  %v1859_v63 = vld [vmem:[#allocation2 + $0x7c] sm:$0xf] }
 0x1e0   : > { %1621 = vst.msk [vmem:[#allocation3 + $0x90] sm:$0xf] %vm1608_vm1, %v6318_v54  ;;  %2867 = vrot.lane.b32.xlu1 %v2776_v29, %s5286_s29  ;;  %v2261_v54 = vsel %vm5456_vm8, %v4613_v21, %v2260_v10  ;;  %v5028_v13 = vld [vmem:[#allocation3 + $0x148] sm:$0xf0]  ;;  %v4628_v21 = vrot.slane %v2656_v57, 9  ;;  %v3169_v29 = vrot.slane %v3167_v4, 4 }
 0x1e1   : > { %v4820_v48 = vor.u32 %v5028_v13, %v4819_v60  ;;  %v992_v10 = vld [vmem:[#allocation2 + $0x7c] sm:$0xf]  ;;  %3239 = vst.msk [vmem:[#allocation3 + $0x158] sm:$0xf] %vm627_vm0, %v3168_v24  ;;  %v4616_v1 = vrot.slane %v2139_v26, 10  ;;  %v4597_v4 = vrot.slane %v1858_v47, 9 }
 0x1e2   : > { %2869 = vrot.lane.b32.xlu2 %v2779_v37, %s5286_s29  ;;  %v1199_v7 = vpop.permute.xlu1 %1198  ;;  %v3171_v33 = vsel %vm5456_vm8, %v3169_v29, %v3170_v16  ;;  %v4567_v37 = vrot.slane %v991_v43, 9  ;;  %v1132_v38 = vrot.slane %v992_v10, 5  ;;  %v918_v43 = vld [vmem:[#allocation2 + $0x7c] sm:$0xf]  ;;  %v3018_v10 = vld [vmem:[#allocation2 + $0xec] sm:$0x3] }
 0x1e3   : > { %1282 = vst.msk [vmem:[#allocation3 + $0x9c] sm:$0xf] %vm1268_vm15, %v1199_v7  ;;  %v2783_v7 = vsel %vm5432_vm4, %v4628_v21, %v2782_v61  ;;  %v3017_v21 = vld [vmem:[#allocation2 + $0xe8] sm:$0xf]  ;;  %v3177_v36 = vrot.slane %v3018_v10, 6 }
 0x1e4   : > { %v2858_v28 = vpop.permute.xlu2 %2857  ;;  %2346 = vrot.lane.b32.xlu0 %v2261_v54, %s5284_s20  ;;  %3240 = vst.msk [vmem:[#allocation3 + $0x164] sm:$0xf] %vm627_vm0, %v3171_v33  ;;  %v1332_v54 = vld [vmem:[#allocation2 + $0x7c] sm:$0xf]  ;;  %v1133_v23 = vsel %vm5432_vm4, %v4567_v37, %v1132_v38  ;;  %v1134_v61 = vrot.slane %v1132_v38, 4  ;;  %v3174_v31 = vrot.slane %v3017_v21, 6 }
 0x1e5   : > { %950 = vst.msk [vmem:[#allocation3 + $0xfc] sm:$0xf] %vm627_vm0, %v918_v43  ;;  %v994_v26 = vld [vmem:[#allocation2 + $0x84] sm:$0xe] }
 0x1e6   : > { %v1539_v25 = vpop.permute.xlu0 %1538 }
 0x1e7   : > { %1622 = vst.msk [vmem:[#allocation3 + $0x9c] sm:$0xf] %vm1608_vm1, %v1539_v25 }
 0x1e8   : > { %2348 = vrot.lane.b32.xlu1 %v2264_v5, %s5284_s20  ;;  %v2270_v5 = vrot.slane %v2135_v11, 6 }
 0x1ea   : > { %2535 = vrot.lane.b32.xlu2 %v2457_v2, %s5285_s21  ;;  %v1726_v44 = vpop.permute.xlu1 %1725  ;;  %v2269_v2 = vrot.slane %v2267_v40, 4  ;;  %v2140_v40 = vld [vmem:[#allocation2 + $0xa0] sm:$0xf] }
 0x1eb   : > { %1812 = vst.msk [vmem:[#allocation3 + $0x78] sm:$0xf] %vm1801_vm2, %v1726_v44  ;;  %v5031_v15 = vld [vmem:[#allocation3 + $0x160] sm:$0xf0]  ;;  %v2281_v3 = vrot.slane %v2140_v40, 6 }
 0x1ec   : > { %v2524_v27 = vpop.permute.xlu2 %2523  ;;  %2537 = vrot.lane.b32.xlu0 %v2458_v52, %s5285_s21  ;;  %4930 = vmatmul.msk.bf16.gmra.mxu3 %vm3695_vm14, %v4820_v48  ;;  %v1472_v52 = vrot.slane %v1332_v54, 6  ;;  %v2271_v13 = vsel %vm5456_vm8, %v2269_v2, %v2270_v5  ;;  %v2141_v2 = vld [vmem:[#allocation2 + $0xa4] sm:$0x3]  ;;  %v995_v40 = vld [vmem:[#allocation2 + $0x88] sm:$0xf] }
 0x1ed   : > { %2611 = vst.msk [vmem:[#allocation3 + $0x64] sm:$0xf] %vm1608_vm1, %v2524_v27  ;;  %v4831_v27 = vld [vmem:[#allocation3 + $0x158] sm:$0xf]  ;;  %v2282_v11 = vsel %vm5456_vm8, %v4616_v1, %v2281_v3  ;;  %v2283_v5 = vrot.slane %v2281_v3, 4  ;;  %v1139_v1 = vrot.slane %v995_v40, 5 }
 0x1ee   : > { %v2522_v45 = vpop.permute.xlu0 %2521  ;;  %v4832_v59 = vor.u32 %v5031_v15, %v4831_v27  ;;  %v1474_v48 = vrot.slane %v1472_v52, 4  ;;  %v2670_v15 = vld [vmem:[#allocation2 + $0xbc] sm:$0x1] }
 0x1ef   : > { %2610 = vst.msk [vmem:[#allocation3 + $0x58] sm:$0xf] %vm1608_vm1, %v2522_v45  ;;  %v1475_v45 = vrot.slane %v1333_v14, 6  ;;  %v2466_v14 = vld [vmem:[#allocation2 + $0xb8] sm:$0xf] }
 0x1f0   : > { %2946 = vst.msk [vmem:[#allocation3 + $0x58] sm:$0xf] %vm1801_vm2, %v2858_v28  ;;  %1741 = vrot.lane.b32.xlu1 %v1659_v50, %s5286_s29  ;;  %v1331_v28 = vld [vmem:[#allocation2 + $0x78] sm:$0xc]  ;;  %v993_v50 = vld [vmem:[#allocation2 + $0x80] sm:$0x1] }
 0x1f1   : > { %v4583_v44 = vrot.slane %v1331_v28, 10  ;;  %v1476_v62 = vsel %vm5456_vm8, %v1474_v48, %v1475_v45  ;;  %v5053_v45 = vld [vmem:[%s7056_s5] sm:$0xff] }
 0x1f2   : > { %1743 = vrot.lane.b32.xlu2 %v1660_v51, %s5286_s29  ;;  %v2856_v9 = vpop.permute.xlu1 %2855  ;;  %v4715_v12 = vld [vmem:[#allocation3 + $0x78] sm:$0xf] }
 0x1f3   : > { %2945 = vst.msk [vmem:[#allocation3 + $0x4c] sm:$0xf] %vm1801_vm2, %v2856_v9  ;;  %v4716_v17 = vor.u32 %v5003_v18, %v4715_v12  ;;  %v1473_v51 = vsel %vm5456_vm8, %v4583_v44, %v1472_v52  ;;  %v1135_v18 = vrot.slane %v993_v50, 5  ;;  %v1988_v9 = vrot.slane %v1859_v63, 5  ;;  %v1860_v12 = vld [vmem:[#allocation2 + $0x80] sm:$0x1] }
 0x1f4   : > { %v1732_v19 = vpop.permute.xlu2 %1731  ;;  %2350 = vrot.lane.b32.xlu0 %v2268_v22, %s5284_s20  ;;  %v917_v22 = vld [vmem:[#allocation2 + $0x78] sm:$0xf]  ;;  %v1991_v37 = vrot.slane %v1860_v12, 5  ;;  %v5054_v44 = vld [vmem:[%s7056_s5 + $0x8] sm:$0xff]  ;;  %v4568_v63 = vrot.slane %v994_v26, 9 }
 0x1f5   : > { %1815 = vst.msk [vmem:[#allocation3 + $0x9c] sm:$0xf] %vm1801_vm2, %v1732_v19  ;;  %3777 = vmatmul.bf16.gmra.mxu1 %v4716_v17  ;;  %v1136_v17 = vsel %vm5432_vm4, %v1134_v61, %v1135_v18  ;;  %v3016_v19 = vld [vmem:[#allocation2 + $0xe4] sm:$0xc]  ;;  %v1989_v24 = vsel %vm5432_vm4, %v4597_v4, %v1988_v9  ;;  %v1990_v33 = vrot.slane %v1988_v9, 4  ;;  %4133 = vmatpush.bf16.msrb.mxu3 %v5054_v44  ;;  %v2813_v61 = vrot.slane %v2670_v15, 5 }
 0x1f6   : > { %v2335_v34 = vpop.permute.xlu0 %2334  ;;  %949 = vst.msk [vmem:[#allocation3 + $0xf0] sm:$0xf] %vm627_vm0, %v917_v22  ;;  %v4652_v29 = vrot.slane %v3016_v19, 10  ;;  %v2668_v4 = vld [vmem:[#allocation2 + $0xb4] sm:$0xe]  ;;  %v1140_v19 = vsel %vm5432_vm4, %v4568_v63, %v1139_v1  ;;  %v1141_v15 = vrot.slane %v1139_v1, 4 }
 0x1f7   : > { %2420 = vst.msk [vmem:[#allocation3 + $0x7c] sm:$0xf] %vm1268_vm15, %v2335_v34  ;;  %v4693_v49 = vld [vmem:[#allocation3 + $0x54] sm:$0xf0]  ;;  %v1662_v34 = vld [vmem:[#allocation2 + $0x94] sm:$0xf] }
 0x1f8   : > { %2871 = vrot.lane.b32.xlu1 %v2783_v7, %s5286_s29  ;;  %2090 = vst.msk [vmem:[#allocation3 + $0xc4] sm:$0xf] %vm627_vm0, %v1989_v24  ;;  %v3175_v38 = vsel %vm5456_vm8, %v4652_v29, %v3174_v31  ;;  %v3176_v7 = vrot.slane %v3174_v31, 4  ;;  %v1335_v9 = vld [vmem:[#allocation2 + $0x88] sm:$0xf]  ;;  %v4632_v24 = vrot.slane %v2668_v4, 9 }
 0x1f9   : > { %3241 = vst.msk [vmem:[#allocation3 + $0x170] sm:$0xf] %vm627_vm0, %v3175_v38  ;;  %4134 = vmatpush.bf16.msrb.mxu3 %v5053_v45  ;;  %v1334_v22 = vld [vmem:[#allocation2 + $0x84] sm:$0xc]  ;;  %v1479_v29 = vrot.slane %v1335_v9, 6 }
 0x1fa   : > { %2873 = vrot.lane.b32.xlu2 %v2786_v39, %s5286_s29  ;;  %v2337_v41 = vpop.permute.xlu1 %2336  ;;  %v4996_v42 = vld [vmem:[#allocation3 + $0x4c] sm:$0xf]  ;;  %v3178_v28 = vsel %vm5456_vm8, %v3176_v7, %v3177_v36  ;;  %v4584_v31 = vrot.slane %v1334_v22, 10  ;;  %v1336_v36 = vld [vmem:[#allocation2 + $0x8c] sm:$0x3] }
 0x1fb   : > { %2421 = vst.msk [vmem:[#allocation3 + $0x88] sm:$0xf] %vm1268_vm15, %v2337_v41  ;;  %v4696_v46 = vor.u32 %v4996_v42, %v4693_v49  ;;  %v1992_v41 = vsel %vm5432_vm4, %v1990_v33, %v1991_v37  ;;  %v2465_v49 = vld [vmem:[#allocation2 + $0xb4] sm:$0xf]  ;;  %v1861_v33 = vld [vmem:[#allocation2 + $0x84] sm:$0xe] }
 0x1fc   : > { %v6463_v25 = vpop.permute.xlu2 %1544  ;;  %1212 = vrot.lane.b32.xlu0 %v1133_v23, %s5284_s20  ;;  %4931 = vmatmul.msk.bf16.gmra.mxu3 %vm3695_vm14, %v4832_v59  ;;  %v6502_v23 = vld [vmem:[#allocation2 + $0xb8] sm:$0xf]  ;;  %3242 = vst.msk [vmem:[#allocation3 + $0x17c] sm:$0xf] %vm627_vm0, %v3178_v28  ;;  %v5006_v27 = vld [vmem:[#allocation3 + $0x98] sm:$0xf0] }
 0x1fd   : > { %3856 = vmatmul.bf16.gmra.mxu2 %v4696_v46  ;;  %2091 = vst.msk [vmem:[#allocation3 + $0xd0] sm:$0xf] %vm627_vm0, %v1992_v41  ;;  %v1661_v46 = vld [vmem:[#allocation2 + $0x90] sm:$0xf]  ;;  %v2810_v52 = vrot.slane %v6502_v23, 5  ;;  %v4598_v37 = vrot.slane %v1861_v33, 9 }
 0x1fe   : > { %v1201_v60 = vpop.permute.xlu0 %1200  ;;  %v1863_v38 = vld [vmem:[#allocation2 + $0x8c] sm:$0x1]  ;;  %v1481_v41 = vrot.slane %v1479_v29, 4  ;;  %v1482_v23 = vrot.slane %v1336_v36, 6  ;;  %v6570_v22 = vld [vmem:[#allocation2 + $0xc4] sm:$0xf] }
 0x1ff   : > { %1283 = vst.msk [vmem:[#allocation3 + $0xa8] sm:$0xf] %vm1268_vm15, %v1201_v60  ;;  %v2811_v28 = vsel %vm5432_vm4, %v4632_v24, %v2810_v52  ;;  %v2144_v24 = vld [vmem:[#allocation2 + $0xb0] sm:$0x3]  ;;  %v2673_v36 = vld [vmem:[#allocation2 + $0xc8] sm:$0x1] }
 0x200   : > { %1623 = vst.msk [vmem:[#allocation3 + $0xa8] sm:$0xf] %vm1608_vm1, %v6401_v8  ;;  %2352 = vrot.lane.b32.xlu1 %v2271_v13, %s5284_s20  ;;  %v2284_v13 = vrot.slane %v2141_v2, 6  ;;  %v4843_v48 = vld [vmem:[#allocation3 + $0x170] sm:$0xf] }
 0x202   : > { %1552 = vrot.lane.b32.xlu2 %v1473_v51, %s5285_s21  ;;  %v1203_v57 = vpop.permute.xlu1 %1202  ;;  %v2285_v47 = vsel %vm5456_vm8, %v2283_v5, %v2284_v13  ;;  %v3931_v5 = vpop.f32.mrf.mxu0  ;;  %v2142_v13 = vld [vmem:[#allocation2 + $0xa8] sm:$0xc] }
 0x203   : > { %1284 = vst.msk [vmem:[#allocation3 + $0xb4] sm:$0xf] %vm1268_vm15, %v1203_v57  ;;  %v2812_v57 = vrot.slane %v2810_v52, 4  ;;  %v5034_v18 = vld [vmem:[#allocation3 + $0x178] sm:$0xf0]  ;;  %v4617_v40 = vrot.slane %v2142_v13, 10 }
 0x204   : > { %v2862_v8 = vpop.permute.xlu2 %2861  ;;  %1554 = vrot.lane.b32.xlu0 %v1476_v62, %s5285_s21  ;;  %v4844_v62 = vor.u32 %v5034_v18, %v4843_v48  ;;  %v2143_v48 = vld [vmem:[#allocation2 + $0xac] sm:$0xf]  ;;  %v1664_v18 = vld [vmem:[#allocation2 + $0xa0] sm:$0xf] }
 0x205   : > { %v2814_v3 = vsel %vm5432_vm4, %v2812_v57, %v2813_v61  ;;  %v2288_v57 = vrot.slane %v2143_v48, 6 }
 0x206   : > { %v1543_v16 = vpop.permute.xlu0 %1542 }
 0x207   : > { %1624 = vst.msk [vmem:[#allocation3 + $0xb4] sm:$0xf] %vm1608_vm1, %v1543_v16 }
 0x208   : > { %1214 = vrot.lane.b32.xlu1 %v1136_v17, %s5284_s20  ;;  %v3753_v17 = vpop.f32.mrf.mxu1 }
 0x20a   : > { %1747 = vrot.lane.b32.xlu2 %v1662_v34, %s5286_s29  ;;  %v1730_v39 = vpop.permute.xlu1 %1729  ;;  %v1862_v34 = vld [vmem:[#allocation2 + $0x88] sm:$0xf]  ;;  %v3933_v1 = vpop.f32.mrf.mxu0 }
 0x20b   : > { %1814 = vst.msk [vmem:[#allocation3 + $0x90] sm:$0xf] %vm1801_vm2, %v1730_v39  ;;  %v1995_v39 = vrot.slane %v1862_v34, 5 }
 0x20c   : > { %v2528_v54 = vpop.permute.xlu2 %2527  ;;  %2358 = vrot.lane.b32.xlu0 %v2282_v11, %s5284_s20  ;;  %4932 = vmatmul.msk.bf16.gmra.mxu3 %vm3695_vm14, %v4844_v62  ;;  %v1998_v11 = vrot.slane %v1863_v38, 5 }
 0x20d   : > { %2613 = vst.msk [vmem:[#allocation3 + $0x7c] sm:$0xf] %vm1608_vm1, %v2528_v54  ;;  %v6537_v54 = vld [vmem:[%s7055_s4] ss:$0 sm:$0xff]  ;;  %v1997_v2 = vrot.slane %v1995_v39, 4 }
 0x20e   : > { %v2526_v42 = vpop.permute.xlu0 %2525 }
 0x20f   : > { %2612 = vst.msk [vmem:[#allocation3 + $0x70] sm:$0xf] %vm1608_vm1, %v2526_v42  ;;  %v1480_v42 = vsel %vm5456_vm8, %v4584_v31, %v1479_v29  ;;  %v2817_v29 = vrot.slane %v6570_v22, 5  ;;  %v2468_v31 = vld [vmem:[#allocation2 + $0xc4] sm:$0xf] }
 0x210   : > { %2948 = vst.msk [vmem:[#allocation3 + $0x70] sm:$0xf] %vm1801_vm2, %v2862_v8  ;;  %1745 = vrot.lane.b32.xlu1 %v1661_v46, %s5286_s29  ;;  %v1996_v46 = vsel %vm5432_vm4, %v4598_v37, %v1995_v39  ;;  %v3755_v45 = vpop.f32.mrf.mxu1  ;;  %v2290_v39 = vrot.slane %v2288_v57, 4 }
 0x211   : > { %2092 = vst.msk [vmem:[#allocation3 + $0xdc] sm:$0xf] %vm627_vm0, %v1996_v46  ;;  %v3756_v61 = vadd.f32 %v6537_v54, %v3755_v45 }
 0x212   : > { %2551 = vrot.lane.b32.xlu2 %v2465_v49, %s5285_s21  ;;  %v2860_v60 = vpop.permute.xlu1 %2859  ;;  %v4727_v59 = vld [vmem:[#allocation3 + $0x90] sm:$0xf]  ;;  %v996_v49 = vld [vmem:[#allocation2 + $0x8c] sm:$0x1] }
 0x213   : > { %2947 = vst.msk [vmem:[#allocation3 + $0x64] sm:$0xf] %vm1801_vm2, %v2860_v60  ;;  %v4728_v50 = vor.u32 %v5006_v27, %v4727_v59  ;;  %v1142_v60 = vrot.slane %v996_v49, 5  ;;  %v3754_v59 = vadd.f32 %v6537_v54, %v3753_v17  ;;  %v2467_v17 = vld [vmem:[#allocation2 + $0xc0] sm:$0xf] }
 0x214   : > { %v1736_v51 = vpop.permute.xlu2 %1735  ;;  %2553 = vrot.lane.b32.xlu0 %v2466_v14, %s5285_s21  ;;  %v1483_v14 = vsel %vm5456_vm8, %v1481_v41, %v1482_v23  ;;  %v2819_v41 = vrot.slane %v2817_v29, 4  ;;  %v2820_v23 = vrot.slane %v2673_v36, 5  ;;  %v920_v49 = vld [vmem:[#allocation2 + $0x88] sm:$0xf] }
 0x215   : > { %1817 = vst.msk [vmem:[#allocation3 + $0xb4] sm:$0xf] %vm1801_vm2, %v1736_v51  ;;  %3782 = vmatmul.bf16.gmra.mxu1 %v4728_v50  ;;  %v1143_v26 = vsel %vm5432_vm4, %v1141_v15, %v1142_v60 }
 0x216   : > { %v2339_v8 = vpop.permute.xlu0 %2338  ;;  %952 = vst.msk [vmem:[#allocation3 + $0x114] sm:$0xf] %vm627_vm0, %v920_v49 }
 0x217   : > { %2422 = vst.msk [vmem:[#allocation3 + $0x94] sm:$0xf] %vm1268_vm15, %v2339_v8  ;;  %v4705_v16 = vld [vmem:[#allocation3 + $0x6c] sm:$0xf0] }
 0x218   : > { %2360 = vrot.lane.b32.xlu1 %v2285_v47, %s5284_s20  ;;  %v3758_v15 = vpop.f32.mrf.mxu1 }
 0x21a   : > { %2889 = vrot.lane.b32.xlu2 %v2814_v3, %s5286_s29  ;;  %v2341_v12 = vpop.permute.xlu1 %2340  ;;  %v4999_v43 = vld [vmem:[#allocation3 + $0x64] sm:$0xf]  ;;  %v2289_v3 = vsel %vm5456_vm8, %v4617_v40, %v2288_v57  ;;  %v1339_v57 = vld [vmem:[#allocation2 + $0x98] sm:$0x3] }
 0x21b   : > { %2423 = vst.msk [vmem:[#allocation3 + $0xa0] sm:$0xf] %vm1268_vm15, %v2341_v12  ;;  %v4708_v21 = vor.u32 %v4999_v43, %v4705_v16 }
 0x21c   : > { %v6531_v10 = vpop.permute.xlu2 %1548  ;;  %1216 = vrot.lane.b32.xlu0 %v1140_v19, %s5284_s20  ;;  %v1663_v19 = vld [vmem:[#allocation2 + $0x9c] sm:$0xf]  ;;  %v5009_v37 = vld [vmem:[#allocation3 + $0xb0] sm:$0xf0] }
 0x21d   : > { %3861 = vmatmul.bf16.gmra.mxu2 %v4708_v21 }
 0x21e   : > { %v1205_v7 = vpop.permute.xlu0 %1204 }
 0x21f   : > { %1285 = vst.msk [vmem:[#allocation3 + $0xc0] sm:$0xf] %vm1268_vm15, %v1205_v7 }
 0x220   : > { %1625 = vst.msk [vmem:[#allocation3 + $0xc0] sm:$0xf] %vm1608_vm1, %v6463_v25  ;;  %2887 = vrot.lane.b32.xlu1 %v2811_v28, %s5286_s29  ;;  %v1999_v25 = vsel %vm5432_vm4, %v1997_v2, %v1998_v11  ;;  %v2291_v11 = vrot.slane %v2144_v24, 6  ;;  %v998_v28 = vld [vmem:[#allocation2 + $0x94] sm:$0xf] }
 0x221   : > { %v3842_v44 = vpop.f32.mrf.mxu2  ;;  %2093 = vst.msk [vmem:[#allocation3 + $0xe8] sm:$0xf] %vm627_vm0, %v1999_v25  ;;  %v997_v2 = vld [vmem:[#allocation2 + $0x90] sm:$0xe]  ;;  %v2671_v25 = vld [vmem:[#allocation2 + $0xc0] sm:$0xe] }
 0x222   : > { %1556 = vrot.lane.b32.xlu2 %v1480_v42, %s5285_s21  ;;  %v1207_v52 = vpop.permute.xlu1 %1206  ;;  %v3843_v50 = vadd.f32 %v3842_v44, %v3754_v59  ;;  %v919_v42 = vld [vmem:[#allocation2 + $0x84] sm:$0xf]  ;;  %v1146_v44 = vrot.slane %v998_v28, 5  ;;  %v2146_v24 = vld [vmem:[#allocation2 + $0xb8] sm:$0xf] }
 0x223   : > { %1286 = vst.msk [vmem:[#allocation3 + $0xcc] sm:$0xf] %vm1268_vm15, %v1207_v52  ;;  %v2821_v52 = vsel %vm5432_vm4, %v2819_v41, %v2820_v23 }
 0x224   : > { %v2866_v27 = vpop.permute.xlu2 %2865  ;;  %1558 = vrot.lane.b32.xlu0 %v1483_v14, %s5285_s21  ;;  %v3932_v8 = vadd.f32 %v3931_v5, %v3843_v50  ;;  %951 = vst.msk [vmem:[#allocation3 + $0x108] sm:$0xf] %vm627_vm0, %v919_v42  ;;  %v2292_v5 = vsel %vm5456_vm8, %v2290_v39, %v2291_v11  ;;  %v1338_v14 = vld [vmem:[#allocation2 + $0x94] sm:$0xf] }
 0x225   : > { %v1486_v40 = vrot.slane %v1338_v14, 6  ;;  %v1665_v14 = vld [vmem:[#allocation2 + $0xa8] sm:$0xf] }
 0x226   : > { %v1547_v51 = vpop.permute.xlu0 %1546  ;;  %v4011_v12 = vmax.f32 %v3932_v8, 0.0 }
 0x227   : > { %1626 = vst.msk [vmem:[#allocation3 + $0xcc] sm:$0xf] %vm1608_vm1, %v1547_v51  ;;  %v4633_v51 = vrot.slane %v2671_v25, 9  ;;  %v1488_v8 = vrot.slane %v1486_v40, 4  ;;  %v2469_v25 = vld [vmem:[#allocation2 + $0xcc] sm:$0xf] }
 0x228   : > { %1218 = vrot.lane.b32.xlu1 %v1143_v26, %s5284_s20  ;;  %v1337_v26 = vld [vmem:[#allocation2 + $0x90] sm:$0xc] }
 0x229   : > { %v3844_v62 = vpop.f32.mrf.mxu2 }
 0x22a   : > { %1751 = vrot.lane.b32.xlu2 %v1664_v18, %s5286_s29  ;;  %v3845_v47 = vadd.f32 %v3844_v62, %v3756_v61  ;;  %v1734_v63 = vpop.permute.xlu1 %1733  ;;  %v4585_v18 = vrot.slane %v1337_v26, 10  ;;  %v2818_v62 = vsel %vm5432_vm4, %v4633_v51, %v2817_v29 }
 0x22b   : > { %1816 = vst.msk [vmem:[#allocation3 + $0xa8] sm:$0xf] %vm1801_vm2, %v1734_v63  ;;  %v3936_v63 = vpop.f32.mrf.mxu0 }
 0x22c   : > { %v2532_v4 = vpop.permute.xlu2 %2531  ;;  %v3934_v9 = vadd.f32 %v3933_v1, %v3845_v47  ;;  %2362 = vrot.lane.b32.xlu0 %v2289_v3, %s5284_s20  ;;  %v1489_v47 = vrot.slane %v1339_v57, 6  ;;  %v1487_v3 = vsel %vm5456_vm8, %v4585_v18, %v1486_v40 }
 0x22d   : > { %2615 = vst.msk [vmem:[#allocation3 + $0x94] sm:$0xf] %vm1608_vm1, %v2532_v4  ;;  %v999_v4 = vld [vmem:[#allocation2 + $0x98] sm:$0x1] }
 0x22e   : > { %v4012_v43 = vmax.f32 %v3934_v9, 0.0  ;;  %v2530_v16 = vpop.permute.xlu0 %2529  ;;  %v6604_v9 = vpop.f32.mrf.mxu3 }
 0x22f   : > { %2614 = vst.msk [vmem:[#allocation3 + $0x88] sm:$0xf] %vm1608_vm1, %v2530_v16  ;;  %v1148_v16 = vrot.slane %v1146_v44, 4 }
 0x230   : > { %v4043_v21 = vpack.c.bf16 %v4012_v43, %v4011_v12  ;;  %2950 = vst.msk [vmem:[#allocation3 + $0x88] sm:$0xf] %vm1801_vm2, %v2866_v27  ;;  %1749 = vrot.lane.b32.xlu1 %v1663_v19, %s5286_s29  ;;  %v4569_v27 = vrot.slane %v997_v2, 9  ;;  %v3759_v12 = vadd.f32 %v6537_v54, %v3758_v15  ;;  %v1490_v43 = vsel %vm5456_vm8, %v1488_v8, %v1489_v47  ;;  %v3760_v19 = vpop.f32.mrf.mxu1  ;;  %v2147_v15 = vld [vmem:[#allocation2 + $0xbc] sm:$0x3] }
 0x231   : > { %v3761_v36 = vadd.f32 %v6537_v54, %v3760_v19  ;;  %v1000_v8 = vld [vmem:[#allocation2 + $0x9c] sm:$0xe]  ;;  %v1001_v47 = vld [vmem:[#allocation2 + $0xa0] sm:$0xf] }
 0x232   : > { %2555 = vrot.lane.b32.xlu2 %v2467_v17, %s5285_s21  ;;  %v2864_v33 = vpop.permute.xlu1 %2863  ;;  %4941 = vmatmul.msk.bf16.vlgmr.msrb.gmra.mxu3 %vm3695_vm14, %v4043_v21  ;;  %v4739_v34 = vld [vmem:[#allocation3 + $0xa8] sm:$0xf]  ;;  %v1147_v48 = vsel %vm5432_vm4, %v4569_v27, %v1146_v44  ;;  %v1149_v17 = vrot.slane %v999_v4, 5  ;;  %v2145_v21 = vld [vmem:[#allocation2 + $0xb4] sm:$0xc]  ;;  %v1153_v4 = vrot.slane %v1001_v47, 5 }
 0x233   : > { %2949 = vst.msk [vmem:[#allocation3 + $0x7c] sm:$0xf] %vm1801_vm2, %v2864_v33  ;;  %v4740_v38 = vor.u32 %v5009_v37, %v4739_v34  ;;  %v4618_v34 = vrot.slane %v2145_v21, 10  ;;  %v2295_v37 = vrot.slane %v2146_v24, 6  ;;  %v3938_v28 = vpop.f32.mrf.mxu0  ;;  %v6626_v44 = vld [vmem:[#allocation2 + $0xd0] sm:$0xf] }
 0x234   : > { %v1740_v7 = vpop.permute.xlu2 %1739  ;;  %2557 = vrot.lane.b32.xlu0 %v2468_v31, %s5285_s21  ;;  %v1150_v33 = vsel %vm5432_vm4, %v1148_v16, %v1149_v17 }
 0x235   : > { %1819 = vst.msk [vmem:[#allocation3 + $0xcc] sm:$0xf] %vm1801_vm2, %v1740_v7  ;;  %3787 = vmatmul.bf16.gmra.mxu1 %v4740_v38  ;;  %v1666_v7 = vld [vmem:[#allocation2 + $0xac] sm:$0xf]  ;;  %v2296_v49 = vsel %vm5456_vm8, %v4618_v34, %v2295_v37  ;;  %v2297_v57 = vrot.slane %v2295_v37, 4 }
 0x236   : > { %v2343_v46 = vpop.permute.xlu0 %2342  ;;  %v6619_v23 = vpop.f32.mrf.mxu3  ;;  %v1342_v34 = vld [vmem:[#allocation2 + $0xa4] sm:$0x3] }
 0x237   : > { %2424 = vst.msk [vmem:[#allocation3 + $0xac] sm:$0xf] %vm1268_vm15, %v2343_v46  ;;  %v4717_v13 = vld [vmem:[#allocation3 + $0x84] sm:$0xf0] }
 0x238   : > { %2364 = vrot.lane.b32.xlu1 %v2292_v5, %s5284_s20  ;;  %v3763_v16 = vpop.f32.mrf.mxu1 }
 0x23a   : > { %2893 = vrot.lane.b32.xlu2 %v2821_v52, %s5286_s29  ;;  %v2345_v60 = vpop.permute.xlu1 %2344  ;;  %v5002_v59 = vld [vmem:[#allocation3 + $0x7c] sm:$0xf] }
 0x23b   : > { %2425 = vst.msk [vmem:[#allocation3 + $0xb8] sm:$0xf] %vm1268_vm15, %v2345_v60  ;;  %v4720_v45 = vor.u32 %v5002_v59, %v4717_v13  ;;  %v2824_v60 = vrot.slane %v6626_v44, 5  ;;  %v2470_v59 = vld [vmem:[#allocation2 + $0xd0] sm:$0xf] }
 0x23c   : > { %v6593_v50 = vpop.permute.xlu2 %2869  ;;  %1220 = vrot.lane.b32.xlu0 %v1147_v48, %s5284_s20  ;;  %v2676_v13 = vld [vmem:[#allocation2 + $0xd4] sm:$0x1]  ;;  %v5012_v51 = vld [vmem:[#allocation3 + $0xc8] sm:$0xf0] }
 0x23d   : > { %3866 = vmatmul.bf16.gmra.mxu2 %v4720_v45  ;;  %v2826_v18 = vrot.slane %v2824_v60, 4 }
 0x23e   : > { %v1209_v61 = vpop.permute.xlu0 %1208 }
 0x23f   : > { %1287 = vst.msk [vmem:[#allocation3 + $0xd8] sm:$0xf] %vm1268_vm15, %v1209_v61 }
 0x240   : > { %1627 = vst.msk [vmem:[#allocation3 + $0xd8] sm:$0xf] %vm1608_vm1, %v6531_v10  ;;  %2891 = vrot.lane.b32.xlu1 %v2818_v62, %s5286_s29  ;;  %v3847_v1 = vpop.f32.mrf.mxu2  ;;  %v2827_v62 = vrot.slane %v2676_v13, 5  ;;  %v3765_v44 = vpop.f32.mrf.mxu1 }
 0x241   : > { %v3848_v29 = vadd.f32 %v3847_v1, %v3759_v12  ;;  %v2674_v12 = vld [vmem:[#allocation2 + $0xcc] sm:$0xe] }
 0x242   : > { %1560 = vrot.lane.b32.xlu2 %v1487_v3, %s5285_s21  ;;  %v1211_v22 = vpop.permute.xlu1 %1210  ;;  %v4570_v3 = vrot.slane %v1000_v8, 9 }
 0x243   : > { %1288 = vst.msk [vmem:[#allocation3 + $0xe4] sm:$0xf] %vm1268_vm15, %v1211_v22  ;;  %v3937_v39 = vadd.f32 %v3936_v63, %v3848_v29  ;;  %v2828_v22 = vsel %vm5432_vm4, %v2826_v18, %v2827_v62 }
 0x244   : > { %v2536_v10 = vpop.permute.xlu2 %2535  ;;  %1562 = vrot.lane.b32.xlu0 %v1490_v43, %s5285_s21  ;;  %v1341_v43 = vld [vmem:[#allocation2 + $0xa0] sm:$0xf] }
 0x245   : > { %2617 = vst.msk [vmem:[#allocation3 + $0xac] sm:$0xf] %vm1608_vm1, %v2536_v10  ;;  %v4013_v2 = vmax.f32 %v3937_v39, 0.0  ;;  %v1340_v10 = vld [vmem:[#allocation2 + $0x9c] sm:$0xc]  ;;  %v1496_v39 = vrot.slane %v1342_v34, 6 }
 0x246   : > { %v1551_v31 = vpop.permute.xlu0 %1550 }
 0x247   : > { %1628 = vst.msk [vmem:[#allocation3 + $0xe4] sm:$0xf] %vm1608_vm1, %v1551_v31  ;;  %v4634_v31 = vrot.slane %v2674_v12, 9 }
 0x248   : > { %1222 = vrot.lane.b32.xlu1 %v1150_v33, %s5284_s20  ;;  %v3849_v38 = vpop.f32.mrf.mxu2  ;;  %v6636_v61 = vpop.f32.mrf.mxu3 }
 0x249   : > { %v3850_v11 = vadd.f32 %v3849_v38, %v3761_v36  ;;  %v1493_v36 = vrot.slane %v1341_v43, 6  ;;  %v2825_v38 = vsel %vm5432_vm4, %v4634_v31, %v2824_v60  ;;  %v3766_v60 = vadd.f32 %v6537_v54, %v3765_v44  ;;  %v1667_v43 = vld [vmem:[#allocation2 + $0xb4] sm:$0xf] }
 0x24a   : > { %1755 = vrot.lane.b32.xlu2 %v1666_v7, %s5286_s29  ;;  %v1738_v41 = vpop.permute.xlu1 %1737 }
 0x24b   : > { %v3939_v42 = vadd.f32 %v3938_v28, %v3850_v11  ;;  %1818 = vst.msk [vmem:[#allocation3 + $0xc0] sm:$0xf] %vm1801_vm2, %v1738_v41  ;;  %v1495_v7 = vrot.slane %v1493_v36, 4  ;;  %v3941_v11 = vpop.f32.mrf.mxu0  ;;  %v1002_v41 = vld [vmem:[#allocation2 + $0xa4] sm:$0x1] }
 0x24c   : > { %v1744_v46 = vpop.permute.xlu2 %1743  ;;  %2366 = vrot.lane.b32.xlu0 %v2296_v49, %s5284_s20 }
 0x24d   : > { %1821 = vst.msk [vmem:[#allocation3 + $0xe4] sm:$0xf] %vm1801_vm2, %v1744_v46  ;;  %v4014_v5 = vmax.f32 %v3939_v42, 0.0  ;;  %v3764_v42 = vadd.f32 %v6537_v54, %v3763_v16  ;;  %v1497_v49 = vsel %vm5456_vm8, %v1495_v7, %v1496_v39  ;;  %v2679_v16 = vld [vmem:[#allocation2 + $0xe0] sm:$0x1] }
 0x24e   : > { %v2534_v52 = vpop.permute.xlu0 %2533  ;;  %v1003_v7 = vld [vmem:[#allocation2 + $0xa8] sm:$0xe]  ;;  %v1004_v39 = vld [vmem:[#allocation2 + $0xac] sm:$0xf] }
 0x24f   : > { %2616 = vst.msk [vmem:[#allocation3 + $0xa0] sm:$0xf] %vm1608_vm1, %v2534_v52  ;;  %v4044_v27 = vpack.c.bf16 %v4014_v5, %v4013_v2  ;;  %v1155_v2 = vrot.slane %v1153_v4, 4  ;;  %v1156_v5 = vrot.slane %v1002_v41, 5  ;;  %v2148_v52 = vld [vmem:[#allocation2 + $0xc0] sm:$0xc] }
 0x250   : > { %2952 = vst.msk [vmem:[#allocation3 + $0xa0] sm:$0xf] %vm1801_vm2, %v6593_v50  ;;  %1753 = vrot.lane.b32.xlu1 %v1665_v14, %s5286_s29  ;;  %v2298_v50 = vrot.slane %v2147_v15, 6  ;;  %v6655_v33 = vpop.f32.mrf.mxu3  ;;  %v4619_v13 = vrot.slane %v2148_v52, 10 }
 0x251   : > { %4942 = vmatmul.msk.bf16.gmra.mxu3 %vm3695_vm14, %v4044_v27 }
 0x252   : > { %2559 = vrot.lane.b32.xlu2 %v2469_v25, %s5285_s21  ;;  %v2868_v48 = vpop.permute.xlu1 %2867  ;;  %v4751_v45 = vld [vmem:[#allocation3 + $0xc0] sm:$0xf]  ;;  %v2299_v1 = vsel %vm5456_vm8, %v2297_v57, %v2298_v50  ;;  %v2149_v25 = vld [vmem:[#allocation2 + $0xc4] sm:$0xf] }
 0x253   : > { %2951 = vst.msk [vmem:[#allocation3 + $0x94] sm:$0xf] %vm1801_vm2, %v2868_v48  ;;  %v4752_v26 = vor.u32 %v5012_v51, %v4751_v45  ;;  %v2302_v48 = vrot.slane %v2149_v25, 6  ;;  %v1668_v51 = vld [vmem:[#allocation2 + $0xb8] sm:$0xf]  ;;  %v3943_v57 = vpop.f32.mrf.mxu0 }
 0x254   : > { %v2874_v40 = vpop.permute.xlu2 %2873  ;;  %2561 = vrot.lane.b32.xlu0 %v2470_v59, %s5285_s21  ;;  %v1157_v59 = vsel %vm5432_vm4, %v1155_v2, %v1156_v5  ;;  %v5015_v62 = vld [vmem:[#allocation3 + $0xe0] sm:$0xf0]  ;;  %v1343_v2 = vld [vmem:[#allocation2 + $0xa8] sm:$0xc] }
 0x255   : > { %3792 = vmatmul.bf16.gmra.mxu1 %v4752_v26 }
 0x256   : > { %v2347_v63 = vpop.permute.xlu0 %2346 }
 0x257   : > { %2426 = vst.msk [vmem:[#allocation3 + $0xc4] sm:$0xf] %vm1268_vm15, %v2347_v63  ;;  %v4729_v21 = vld [vmem:[#allocation3 + $0x9c] sm:$0xf0] }
 0x258   : > { %2619 = vst.msk [vmem:[#allocation3 + $0xc4] sm:$0xf] %vm1608_vm1, %v5880_v56  ;;  %2368 = vrot.lane.b32.xlu1 %v2299_v1, %s5284_s20  ;;  %v1154_v56 = vsel %vm5432_vm4, %v4570_v3, %v1153_v4  ;;  %v2678_v1 = vld [vmem:[#allocation2 + $0xdc] sm:$0xf] }
 0x259   : > { %2955 = vst.msk [vmem:[#allocation3 + $0xc4] sm:$0xf] %vm1801_vm2, %v6013_v32  ;;  %v4586_v32 = vrot.slane %v1340_v10, 10  ;;  %v2831_v12 = vrot.slane %v2678_v1, 5 }
 0x25a   : > { %2897 = vrot.lane.b32.xlu2 %v2828_v22, %s5286_s29  ;;  %v2349_v17 = vpop.permute.xlu1 %2348  ;;  %v5005_v19 = vld [vmem:[#allocation3 + $0x94] sm:$0xf]  ;;  %v2471_v22 = vld [vmem:[#allocation2 + $0xd8] sm:$0xf] }
 0x25b   : > { %2427 = vst.msk [vmem:[#allocation3 + $0xd0] sm:$0xf] %vm1268_vm15, %v2349_v17  ;;  %v4732_v24 = vor.u32 %v5005_v19, %v4729_v21  ;;  %v1494_v28 = vsel %vm5456_vm8, %v4586_v32, %v1493_v36  ;;  %v2150_v19 = vld [vmem:[#allocation2 + $0xc8] sm:$0x3]  ;;  %v2472_v21 = vld [vmem:[#allocation2 + $0xdc] sm:$0xf] }
 0x25c   : > { %v6653_v29 = vpop.permute.xlu2 %1552  ;;  %2620 = vst.msk [vmem:[#allocation3 + $0xd0] sm:$0xf] %vm1608_vm1, %v5996_v35  ;;  %1224 = vrot.lane.b32.xlu0 %v1154_v56, %s5284_s20  ;;  %v2833_v36 = vrot.slane %v2831_v12, 4  ;;  %v2834_v32 = vrot.slane %v2679_v16, 5 }
 0x25d   : > { %2956 = vst.msk [vmem:[#allocation3 + $0xd0] sm:$0xf] %vm1801_vm2, %v5986_v55  ;;  %3871 = vmatmul.bf16.gmra.mxu2 %v4732_v24 }
 0x25e   : > { %v2538_v37 = vpop.permute.xlu0 %2537 }
 0x25f   : > { %2618 = vst.msk [vmem:[#allocation3 + $0xb8] sm:$0xf] %vm1608_vm1, %v2538_v37  ;;  %v6677_v27 = vpop.f32.mrf.mxu3 }
 0x260   : > { %2954 = vst.msk [vmem:[#allocation3 + $0xb8] sm:$0xf] %vm1801_vm2, %v2874_v40  ;;  %2895 = vrot.lane.b32.xlu1 %v2825_v38, %s5286_s29  ;;  %v3852_v35 = vpop.f32.mrf.mxu2  ;;  %v2304_v38 = vrot.slane %v2302_v48, 4 }
 0x261   : > { %v3853_v14 = vadd.f32 %v3852_v35, %v3764_v42  ;;  %v2835_v35 = vsel %vm5432_vm4, %v2833_v36, %v2834_v32  ;;  %v1160_v42 = vrot.slane %v1004_v39, 5 }
 0x262   : > { %1564 = vrot.lane.b32.xlu2 %v1494_v28, %s5285_s21  ;;  %v1742_v55 = vpop.permute.xlu1 %1741  ;;  %v2677_v28 = vld [vmem:[#allocation2 + $0xd8] sm:$0xe] }
 0x263   : > { %1820 = vst.msk [vmem:[#allocation3 + $0xd8] sm:$0xf] %vm1801_vm2, %v1742_v55  ;;  %v3942_v26 = vadd.f32 %v3941_v11, %v3853_v14  ;;  %v4571_v55 = vrot.slane %v1003_v7, 9 }
 0x264   : > { %v6674_v46 = vpop.permute.xlu2 %1747  ;;  %1566 = vrot.lane.b32.xlu0 %v1497_v49, %s5285_s21  ;;  %v4635_v49 = vrot.slane %v2677_v28, 9  ;;  %v6756_v28 = vld [vmem:[#allocation2 + $0xe8] sm:$0xf] }
 0x265   : > { %v1161_v52 = vsel %vm5432_vm4, %v4571_v55, %v1160_v42 }
 0x266   : > { %v2351_v15 = vpop.permute.xlu0 %2350 }
 0x267   : > { %2428 = vst.msk [vmem:[#allocation3 + $0xdc] sm:$0xf] %vm1268_vm15, %v2351_v15  ;;  %v6696_v17 = vpop.f32.mrf.mxu3  ;;  %v4741_v31 = vld [vmem:[#allocation3 + $0xb4] sm:$0xf0]  ;;  %v4587_v15 = vrot.slane %v1343_v2, 10  ;;  %v2838_v2 = vrot.slane %v6756_v28, 5 }
 0x268   : > { %2621 = vst.msk [vmem:[#allocation3 + $0xdc] sm:$0xf] %vm1608_vm1, %v6017_v58  ;;  %1226 = vrot.lane.b32.xlu1 %v1157_v59, %s5284_s20  ;;  %v3854_v45 = vpop.f32.mrf.mxu2  ;;  %v2303_v58 = vsel %vm5456_vm8, %v4619_v13, %v2302_v48  ;;  %v2832_v59 = vsel %vm5432_vm4, %v4635_v49, %v2831_v12  ;;  %v2473_v49 = vld [vmem:[#allocation2 + $0xe4] sm:$0xf]  ;;  %v4777_v28 = vld [vmem:[#allocation3 + $0xfc] sm:$0xf0] }
 0x269   : > { %2957 = vst.msk [vmem:[#allocation3 + $0xdc] sm:$0xf] %vm1801_vm2, %v6139_v53  ;;  %v3855_v40 = vadd.f32 %v3854_v45, %v3766_v60  ;;  %v4015_v53 = vmax.f32 %v3942_v26, 0.0  ;;  %v1345_v60 = vld [vmem:[#allocation2 + $0xb0] sm:$0x3] }
 0x26a   : > { %1759 = vrot.lane.b32.xlu2 %v1668_v51, %s5286_s29  ;;  %v2872_v50 = vpop.permute.xlu1 %2871  ;;  %v4763_v18 = vld [vmem:[#allocation3 + $0xd8] sm:$0xf]  ;;  %v1503_v45 = vrot.slane %v1345_v60, 6  ;;  %v3946_v51 = vpop.f32.mrf.mxu0 }
 0x26b   : > { %v3944_v8 = vadd.f32 %v3943_v57, %v3855_v40  ;;  %2953 = vst.msk [vmem:[#allocation3 + $0xac] sm:$0xf] %vm1801_vm2, %v2872_v50  ;;  %v4764_v47 = vor.u32 %v5015_v62, %v4763_v18  ;;  %v4753_v57 = vld [vmem:[#allocation3 + $0xcc] sm:$0xf0]  ;;  %v5011_v18 = vld [vmem:[#allocation3 + $0xc4] sm:$0xf] }
 0x26c   : > { %v6692_v63 = vpop.permute.xlu2 %2551  ;;  %2370 = vrot.lane.b32.xlu0 %v2303_v58, %s5284_s20  ;;  %v1162_v62 = vrot.slane %v1160_v42, 4 }
 0x26d   : > { %v4016_v3 = vmax.f32 %v3944_v8, 0.0  ;;  %3797 = vmatmul.bf16.gmra.mxu1 %v4764_v47  ;;  %v4756_v47 = vor.u32 %v5011_v18, %v4753_v57  ;;  %v1007_v57 = vld [vmem:[#allocation2 + $0xb8] sm:$0xf] }
 0x26e   : > { %v1213_v4 = vpop.permute.xlu0 %1212 }
 0x26f   : > { %1289 = vst.msk [vmem:[#allocation3 + $0xf0] sm:$0xf] %vm1268_vm15, %v1213_v4  ;;  %v4045_v10 = vpack.c.bf16 %v4016_v3, %v4015_v53  ;;  %v6717_v5 = vpop.f32.mrf.mxu3  ;;  %v2151_v4 = vld [vmem:[#allocation2 + $0xcc] sm:$0xc] }
 0x270   : > { %1629 = vst.msk [vmem:[#allocation3 + $0xf0] sm:$0xf] %vm1608_vm1, %v6653_v29  ;;  %1757 = vrot.lane.b32.xlu1 %v1667_v43, %s5286_s29  ;;  %v2305_v29 = vrot.slane %v2150_v19, 6  ;;  %v4620_v19 = vrot.slane %v2151_v4, 10  ;;  %v1347_v4 = vld [vmem:[#allocation2 + $0xb8] sm:$0xf] }
 0x271   : > { %4943 = vmatmul.msk.bf16.gmra.mxu3 %vm3695_vm14, %v4045_v10 }
 0x272   : > { %2563 = vrot.lane.b32.xlu2 %v2471_v22, %s5285_s21  ;;  %v2353_v56 = vpop.permute.xlu1 %2352  ;;  %v5008_v24 = vld [vmem:[#allocation3 + $0xac] sm:$0xf]  ;;  %v2306_v41 = vsel %vm5456_vm8, %v2304_v38, %v2305_v29  ;;  %v2152_v22 = vld [vmem:[#allocation2 + $0xd0] sm:$0xf]  ;;  %v3948_v32 = vpop.f32.mrf.mxu0 }
 0x273   : > { %2429 = vst.msk [vmem:[#allocation3 + $0xe8] sm:$0xf] %vm1268_vm15, %v2353_v56  ;;  %v4744_v34 = vor.u32 %v5008_v24, %v4741_v31  ;;  %v1670_v24 = vld [vmem:[#allocation2 + $0xc4] sm:$0xf] }
 0x274   : > { %v6704_v37 = vpop.permute.xlu2 %2889  ;;  %2622 = vst.msk [vmem:[#allocation3 + $0xe8] sm:$0xf] %vm1608_vm1, %v6173_v6  ;;  %2565 = vrot.lane.b32.xlu0 %v2472_v21, %s5285_s21  ;;  %v1344_v6 = vld [vmem:[#allocation2 + $0xac] sm:$0xf]  ;;  %v2309_v21 = vrot.slane %v2152_v22, 6 }
 0x275   : > { %2958 = vst.msk [vmem:[#allocation3 + $0xe8] sm:$0xf] %vm1801_vm2, %v6115_v0  ;;  %3876 = vmatmul.bf16.gmra.mxu2 %v4744_v34  ;;  %v3768_v0 = vpop.f32.mrf.mxu1  ;;  %v1500_v14 = vrot.slane %v1344_v6, 6  ;;  %v1873_v22 = vld [vmem:[#allocation2 + $0xb4] sm:$0xe] }
 0x276   : > { %v1555_v11 = vpop.permute.xlu0 %1554  ;;  %v3769_v8 = vadd.f32 %v6537_v54, %v3768_v0  ;;  %v2310_v39 = vsel %vm5456_vm8, %v4620_v19, %v2309_v21  ;;  %v1669_v0 = vld [vmem:[#allocation2 + $0xc0] sm:$0xf]  ;;  %v4602_v19 = vrot.slane %v1873_v22, 9 }
 0x277   : > { %v1502_v48 = vrot.slane %v1500_v14, 4  ;;  %v1501_v40 = vsel %vm5456_vm8, %v4587_v15, %v1500_v14  ;;  %v6743_v53 = vpop.f32.mrf.mxu3  ;;  %v2153_v15 = vld [vmem:[#allocation2 + $0xd4] sm:$0x3] }
 0x278   : > { %2372 = vrot.lane.b32.xlu1 %v2306_v41, %s5284_s20 }
 0x279   : > { %v1504_v58 = vsel %vm5456_vm8, %v1502_v48, %v1503_v45 }
 0x27a   : > { %2901 = vrot.lane.b32.xlu2 %v2835_v35, %s5286_s29  ;;  %v1215_v44 = vpop.permute.xlu1 %1214 }
 0x27b   : > { %1290 = vst.msk [vmem:[#allocation3 + $0xfc] sm:$0xf] %vm1268_vm15, %v1215_v44 }
 0x27c   : > { %v6722_v25 = vpop.permute.xlu2 %1556  ;;  %1630 = vst.msk [vmem:[#allocation3 + $0xfc] sm:$0xf] %vm1608_vm1, %v1555_v11  ;;  %1228 = vrot.lane.b32.xlu0 %v1161_v52, %s5284_s20  ;;  %v2682_v52 = vld [vmem:[#allocation2 + $0xec] sm:$0x1]  ;;  %v4765_v14 = vld [vmem:[#allocation3 + $0xe4] sm:$0xf0] }
 0x27d   : > { %1823 = vst.msk [vmem:[#allocation3 + $0xfc] sm:$0xf] %vm1801_vm2, %v6674_v46  ;;  %v1005_v46 = vld [vmem:[#allocation2 + $0xb0] sm:$0x1]  ;;  %v3770_v3 = vpop.f32.mrf.mxu1  ;;  %v2841_v48 = vrot.slane %v2682_v52, 5 }
 0x27e   : > { %v2359_v13 = vpop.permute.xlu0 %2358  ;;  %v1163_v1 = vrot.slane %v1005_v46, 5  ;;  %v3771_v10 = vadd.f32 %v6537_v54, %v3770_v3  ;;  %v2680_v46 = vld [vmem:[#allocation2 + $0xe4] sm:$0xe]  ;;  %v1346_v3 = vld [vmem:[#allocation2 + $0xb4] sm:$0xc] }
 0x27f   : > { %2432 = vst.msk [vmem:[#allocation3 + $0x10c] sm:$0xf] %vm1268_vm15, %v2359_v13  ;;  %v6762_v42 = vpop.f32.mrf.mxu3  ;;  %v2840_v13 = vrot.slane %v2838_v2, 4 }
 0x280   : > { %2625 = vst.msk [vmem:[#allocation3 + $0x10c] sm:$0xf] %vm1608_vm1, %v6692_v63  ;;  %2899 = vrot.lane.b32.xlu1 %v2832_v59, %s5286_s29  ;;  %v3857_v26 = vpop.f32.mrf.mxu2  ;;  %v1164_v16 = vsel %vm5432_vm4, %v1162_v62, %v1163_v1  ;;  %v5014_v59 = vld [vmem:[#allocation3 + $0xdc] sm:$0xf]  ;;  %v4636_v1 = vrot.slane %v2680_v46, 9 }
 0x281   : > { %v3858_v12 = vadd.f32 %v3857_v26, %v3769_v8  ;;  %v4768_v45 = vor.u32 %v5014_v59, %v4765_v14  ;;  %v2311_v26 = vrot.slane %v2309_v21, 4  ;;  %v2842_v18 = vsel %vm5432_vm4, %v2840_v13, %v2841_v48  ;;  %v5017_v14 = vld [vmem:[#allocation3 + $0xf4] sm:$0xf] }
 0x282   : > { %1568 = vrot.lane.b32.xlu2 %v1501_v40, %s5285_s21  ;;  %v1746_v50 = vpop.permute.xlu1 %1745  ;;  %v1006_v40 = vld [vmem:[#allocation2 + $0xb4] sm:$0xe] }
 0x283   : > { %1822 = vst.msk [vmem:[#allocation3 + $0xf0] sm:$0xf] %vm1801_vm2, %v1746_v50  ;;  %v3947_v31 = vadd.f32 %v3946_v51, %v3858_v12  ;;  %v1874_v12 = vld [vmem:[#allocation2 + $0xb8] sm:$0xf] }
 0x284   : > { %v6741_v63 = vpop.permute.xlu2 %1751  ;;  %1570 = vrot.lane.b32.xlu0 %v1504_v58, %s5285_s21  ;;  %v5018_v29 = vld [vmem:[#allocation3 + $0xf8] sm:$0xf0]  ;;  %v4572_v58 = vrot.slane %v1006_v40, 9  ;;  %v2023_v21 = vrot.slane %v1874_v12, 5 }
 0x285   : > { %3881 = vmatmul.bf16.gmra.mxu2 %v4756_v47  ;;  %v4017_v41 = vmax.f32 %v3947_v31, 0.0  ;;  %v1167_v47 = vrot.slane %v1007_v57, 5  ;;  %v4588_v31 = vrot.slane %v1346_v3, 10 }
 0x286   : > { %v2554_v43 = vpop.permute.xlu0 %2553 }
 0x287   : > { %v6779_v8 = vpop.f32.mrf.mxu3  ;;  %v1169_v13 = vrot.slane %v1167_v47, 4 }
 0x288   : > { %1230 = vrot.lane.b32.xlu1 %v1164_v16, %s5284_s20  ;;  %v3859_v56 = vpop.f32.mrf.mxu2 }
 0x289   : > { %v3860_v36 = vadd.f32 %v3859_v56, %v3771_v10  ;;  %v3773_v10 = vpop.f32.mrf.mxu1  ;;  %v1168_v56 = vsel %vm5432_vm4, %v4572_v58, %v1167_v47 }
 0x28a   : > { %1763 = vrot.lane.b32.xlu2 %v1670_v24, %s5286_s29  ;;  %v2361_v34 = vpop.permute.xlu1 %2360  ;;  %v4775_v38 = vld [vmem:[#allocation3 + $0xf0] sm:$0xf] }
 0x28b   : > { %v3949_v7 = vadd.f32 %v3948_v32, %v3860_v36  ;;  %2433 = vst.msk [vmem:[#allocation3 + $0x118] sm:$0xf] %vm1268_vm15, %v2361_v34  ;;  %v4776_v11 = vor.u32 %v5018_v29, %v4775_v38  ;;  %v1507_v36 = vrot.slane %v1347_v4, 6  ;;  %v1875_v32 = vld [vmem:[#allocation2 + $0xbc] sm:$0x1]  ;;  %v2024_v38 = vsel %vm5432_vm4, %v4602_v19, %v2023_v21 }
 0x28c   : > { %v6754_v35 = vpop.permute.xlu2 %2555  ;;  %2626 = vst.msk [vmem:[#allocation3 + $0x118] sm:$0xf] %vm1608_vm1, %v2554_v43  ;;  %2374 = vrot.lane.b32.xlu0 %v2310_v39, %s5284_s20  ;;  %v927_v43 = vld [vmem:[#allocation2 + $0xb4] sm:$0xf]  ;;  %v1348_v34 = vld [vmem:[#allocation2 + $0xbc] sm:$0x3]  ;;  %v2839_v39 = vsel %vm5432_vm4, %v4636_v1, %v2838_v2 }
 0x28d   : > { %v4018_v55 = vmax.f32 %v3949_v7, 0.0  ;;  %2962 = vst.msk [vmem:[#allocation3 + $0x118] sm:$0xf] %vm1801_vm2, %v6704_v37  ;;  %3802 = vmatmul.bf16.gmra.mxu1 %v4776_v11  ;;  %v2474_v37 = vld [vmem:[#allocation2 + $0xe8] sm:$0xf]  ;;  %v2025_v29 = vrot.slane %v2023_v21, 4  ;;  %v1508_v2 = vsel %vm5456_vm8, %v4588_v31, %v1507_v36 }
 0x28e   : > { %v1217_v6 = vpop.permute.xlu0 %1216  ;;  %959 = vst.msk [vmem:[#allocation3 + $0x168] sm:$0xf] %vm627_vm0, %v927_v43  ;;  %v2026_v7 = vrot.slane %v1875_v32, 5 }
 0x28f   : > { %1291 = vst.msk [vmem:[#allocation3 + $0x108] sm:$0xf] %vm1268_vm15, %v1217_v6  ;;  %v4046_v44 = vpack.c.bf16 %v4018_v55, %v4017_v41  ;;  %v1509_v55 = vrot.slane %v1507_v36, 4  ;;  %v1510_v6 = vrot.slane %v1348_v34, 6  ;;  %v6807_v52 = vpop.f32.mrf.mxu3  ;;  %v6840_v34 = vld [vmem:[%s7057_s6] ss:$0 sm:$0xff] }
 0x290   : > { %1631 = vst.msk [vmem:[#allocation3 + $0x108] sm:$0xf] %vm1608_vm1, %v6722_v25  ;;  %1761 = vrot.lane.b32.xlu1 %v1669_v0, %s5286_s29  ;;  %v2312_v25 = vrot.slane %v2153_v15, 6  ;;  %v2027_v41 = vsel %vm5432_vm4, %v2025_v29, %v2026_v7  ;;  %v3951_v0 = vpop.f32.mrf.mxu0  ;;  %v1876_v29 = vld [vmem:[#allocation2 + $0xc0] sm:$0xe] }
 0x291   : > { %4944 = vmatmul.msk.bf16.gmra.mxu3 %vm3695_vm14, %v4046_v44  ;;  %2100 = vst.msk [vmem:[#allocation3 + $0x13c] sm:$0xf] %vm627_vm0, %v2024_v38  ;;  %v1008_v44 = vld [vmem:[#allocation2 + $0xbc] sm:$0x1]  ;;  %v278_v38 = vld [vmem:[%s5405_s19] sm:$0xff]  }
 0x292   : > { %2567 = vrot.lane.b32.xlu2 %v2473_v49, %s5285_s21  ;;  %v2888_v60 = vpop.permute.xlu1 %2887  ;;  %v2313_v62 = vsel %vm5456_vm8, %v2311_v26, %v2312_v25  ;;  %v928_v49 = vld [vmem:[#allocation2 + $0xb8] sm:$0xf]  ;;  %2101 = vst.msk [vmem:[#allocation3 + $0x148] sm:$0xf] %vm627_vm0, %v2027_v41  ;;  %v1170_v48 = vrot.slane %v1008_v44, 5 }
 0x293   : > { %2961 = vst.msk [vmem:[#allocation3 + $0x10c] sm:$0xf] %vm1801_vm2, %v2888_v60  ;;  %v1511_v60 = vsel %vm5456_vm8, %v1509_v55, %v1510_v6  ;;  %v1877_v7 = vld [vmem:[#allocation2 + $0xc4] sm:$0xf]  ;;  %v4603_v55 = vrot.slane %v1876_v29, 9 }
 0x294   : > { %v6772_v51 = vpop.permute.xlu2 %2893  ;;  %2569 = vrot.lane.b32.xlu0 %v2474_v37, %s5285_s21  ;;  %v4780_v37 = vor.u32 %v5017_v14, %v4777_v28  ;;  %960 = vst.msk [vmem:[#allocation3 + $0x174] sm:$0xf] %vm627_vm0, %v928_v49  ;;  %v1171_v57 = vsel %vm5432_vm4, %v1169_v13, %v1170_v48  ;;  %v4789_v31 = vld [vmem:[#allocation3 + $0x114] sm:$0xf0]  ;;  %v4216_v28 = vunpack.c.l.bf16 %v278_v38  ;;  %v2030_v6 = vrot.slane %v1877_v7, 5 }
 0x295   : > { %3886 = vmatmul.bf16.gmra.mxu2 %v4768_v45  ;;  %v3775_v45 = vpop.f32.mrf.mxu1  ;;  %v1878_v49 = vld [vmem:[#allocation2 + $0xc8] sm:$0x1] }
 0x296   : > { %v1559_v50 = vpop.permute.xlu0 %1558  ;;  %v3776_v40 = vadd.f32 %v6537_v54, %v3775_v45  ;;  %v2033_v44 = vrot.slane %v1878_v49, 5  ;;  %v1880_v49 = vld [vmem:[#allocation2 + $0xd0] sm:$0xf] }
 0x298   : > { %2376 = vrot.lane.b32.xlu1 %v2313_v62, %s5284_s20  ;;  %v3953_v62 = vpop.f32.mrf.mxu0 }
 0x29a   : > { %2905 = vrot.lane.b32.xlu2 %v2842_v18, %s5286_s29  ;;  %v1219_v16 = vpop.permute.xlu1 %1218  ;;  %v5020_v21 = vld [vmem:[#allocation3 + $0x10c] sm:$0xf] }
 0x29b   : > { %1292 = vst.msk [vmem:[#allocation3 + $0x114] sm:$0xf] %vm1268_vm15, %v1219_v16  ;;  %v1671_v16 = vld [vmem:[#allocation2 + $0xcc] sm:$0xf] }
 0x29c   : > { %v6787_v24 = vpop.permute.xlu2 %1560  ;;  %1632 = vst.msk [vmem:[#allocation3 + $0x114] sm:$0xf] %vm1608_vm1, %v1559_v50  ;;  %1232 = vrot.lane.b32.xlu0 %v1168_v56, %s5284_s20 }
 0x29d   : > { %1825 = vst.msk [vmem:[#allocation3 + $0x114] sm:$0xf] %vm1801_vm2, %v6741_v63 }
 0x29e   : > { %v2363_v11 = vpop.permute.xlu0 %2362 }
 0x29f   : > { %2434 = vst.msk [vmem:[#allocation3 + $0x124] sm:$0xf] %vm1268_vm15, %v2363_v11 }
 0x2a0   : > { %2627 = vst.msk [vmem:[#allocation3 + $0x124] sm:$0xf] %vm1608_vm1, %v6754_v35  ;;  %2903 = vrot.lane.b32.xlu1 %v2839_v39, %s5286_s29  ;;  %v3862_v63 = vpop.f32.mrf.mxu2  ;;  %v3774_v35 = vadd.f32 %v6537_v54, %v3773_v10  ;;  %v6824_v54 = vpop.f32.mrf.mxu3 }
 0x2a1   : > { %v3778_v39 = vpop.f32.mrf.mxu1  ;;  %v3956_v48 = vpop.f32.mrf.mxu0 }
 0x2a2   : > { %1572 = vrot.lane.b32.xlu2 %v1508_v2, %s5285_s21  ;;  %v1750_v15 = vpop.permute.xlu1 %1749  ;;  %v3863_v26 = vadd.f32 %v3862_v63, %v3774_v35  ;;  %v2031_v63 = vsel %vm5432_vm4, %v4603_v55, %v2030_v6  ;;  %v2032_v2 = vrot.slane %v2030_v6, 4  ;;  %v1879_v6 = vld [vmem:[#allocation2 + $0xcc] sm:$0xe] }
 0x2a3   : > { %1824 = vst.msk [vmem:[#allocation3 + $0x108] sm:$0xf] %vm1801_vm2, %v1750_v15 }
 0x2a4   : > { %v6815_v59 = vpop.permute.xlu2 %1755  ;;  %1574 = vrot.lane.b32.xlu0 %v1511_v60, %s5285_s21  ;;  %v3952_v50 = vadd.f32 %v3951_v0, %v3863_v26  ;;  %v5021_v1 = vld [vmem:[#allocation3 + $0x110] sm:$0xf0]  ;;  %v4217_v0 = vunpack.c.h.bf16 %v278_v38  ;;  %2102 = vst.msk [vmem:[#allocation3 + $0x154] sm:$0xf] %vm627_vm0, %v2031_v63  ;;  %v2034_v60 = vsel %vm5432_vm4, %v2032_v2, %v2033_v44  ;;  %v4604_v44 = vrot.slane %v1879_v6, 9 }
 0x2a5   : > { %3891 = vmatmul.bf16.gmra.mxu2 %v4780_v37  ;;  %2103 = vst.msk [vmem:[#allocation3 + $0x160] sm:$0xf] %vm627_vm0, %v2034_v60  ;;  %v1881_v60 = vld [vmem:[#allocation2 + $0xd4] sm:$0x1] }
 0x2a6   : > { %v2558_v25 = vpop.permute.xlu0 %2557  ;;  %v4019_v12 = vmax.f32 %v3952_v50, 0.0 }
 0x2a8   : > { %1234 = vrot.lane.b32.xlu1 %v1171_v57, %s5284_s20  ;;  %v3864_v46 = vpop.f32.mrf.mxu2  ;;  %s4391_s20 = sshll.u32 %s4388_s15, 4  ;;  %s4392_s20 = int_to_ptr.hbm [resolvable:$true] %s4391_s20 }
 0x2a9   : > { %v3865_v18 = vadd.f32 %v3864_v46, %v3776_v40 }
 0x2aa   : > { %1767 = vrot.lane.b32.xlu2 %v1672_v30, %s5286_s29  ;;  %v2365_v58 = vpop.permute.xlu1 %2364  ;;  %v4787_v47 = vld [vmem:[#allocation3 + $0x108] sm:$0xf]  ;;  %v6863_v30 = vld [vmem:[%s7055_s4] ss:$0 sm:$0xff] }
 0x2ab   : > { %v3954_v3 = vadd.f32 %v3953_v62, %v3865_v18  ;;  %2435 = vst.msk [vmem:[#allocation3 + $0x130] sm:$0xf] %vm1268_vm15, %v2365_v58  ;;  %v4788_v4 = vor.u32 %v5021_v1, %v4787_v47  ;;  %v3779_v50 = vadd.f32 %v6863_v30, %v3778_v39  ;;  %v3780_v62 = vpop.f32.mrf.mxu1 }
 0x2ac   : > { %v2560_v22 = vpop.permute.xlu2 %2559  ;;  %2628 = vst.msk [vmem:[#allocation3 + $0x130] sm:$0xf] %vm1608_vm1, %v2558_v25 }
 0x2ad   : > { %v4020_v43 = vmax.f32 %v3954_v3, 0.0  ;;  %2964 = vst.msk [vmem:[#allocation3 + $0x130] sm:$0xf] %vm1801_vm2, %v6772_v51  ;;  %3807 = vmatmul.bf16.gmra.mxu1 %v4788_v4  ;;  %v4792_v51 = vor.u32 %v5020_v21, %v4789_v31  ;;  %v3781_v3 = vadd.f32 %v6863_v30, %v3780_v62 }
 0x2ae   : > { %v1221_v10 = vpop.permute.xlu0 %1220 }
 0x2af   : > { %1293 = vst.msk [vmem:[#allocation3 + $0x120] sm:$0xf] %vm1268_vm15, %v1221_v10  ;;  %v4047_v19 = vpack.c.bf16 %v4020_v43, %v4019_v12  ;;  %v3958_v10 = vpop.f32.mrf.mxu0 }
 0x2b0   : > { %1633 = vst.msk [vmem:[#allocation3 + $0x120] sm:$0xf] %vm1608_vm1, %v6787_v24  ;;  %1765 = vrot.lane.b32.xlu1 %v1671_v16, %s5286_s29  ;;  %s269_s29 = sand.u32 1, %s5273_s25  }
 0x2b1   : > { %4945 = vmatmul.msk.bf16.gmra.mxu3 %vm3695_vm14, %v4047_v19  ;;  %s4458_s18 = sshll.u32 %s269_s29, 7  ;;  %s4377_s28 = scalar_lea.sflag [#allocation5], %s269_s29 }
 0x2b2   : > { %v2892_v56 = vpop.permute.xlu1 %2891  ;;  %s6867_s8 = scalar_lea.vmem [#allocation4], %s4458_s18 }
 0x2b3   : > { %2963 = vst.msk [vmem:[#allocation3 + $0x124] sm:$0xf] %vm1801_vm2, %v2892_v56  ;;  %s4389_s16 = sshll.u32 %s6867_s8, 4  ;;  %s4390_s16 = int_to_ptr.vmem [resolvable:$true] %s4389_s16 }
 0x2b4   : > { %v6835_v32 = vpop.permute.xlu2 %2897  ;;  %v4801_v46 = vld [vmem:[#allocation3 + $0x12c] sm:$0xf0] }
 0x2b5   : > { %3896 = vmatmul.bf16.gmra.mxu2 %v4792_v51  ;;  %v4136_v36 = vpop.f32.mrf.mxu3 }
 0x2b6   : > { %v1563_v24 = vpop.permute.xlu0 %1562  ;;  %v4137_v11 = vadd.f32 %v6840_v34, %v4136_v36 }
 0x2b8   : > { %v4248_v15 = vadd.f32 %v4216_v28, %v4137_v11  ;;  %v280_v11 = vld [vmem:[%s5405_s19 + $0x8] sm:$0xff]  }
 0x2ba   : > { %v1223_v41 = vpop.permute.xlu1 %1222  ;;  %v5023_v26 = vld [vmem:[#allocation3 + $0x124] sm:$0xf]  ;;  %v4280_v25 = vmax.f32 %v4248_v15, 0.0  ;;  %v3961_v15 = vpop.f32.mrf.mxu0 }
 0x2bb   : > { %1294 = vst.msk [vmem:[#allocation3 + $0x12c] sm:$0xf] %vm1268_vm15, %v1223_v41  ;;  %v4804_v18 = vor.u32 %v5023_v26, %v4801_v46  ;;  %v3783_v41 = vpop.f32.mrf.mxu1 }
 0x2bc   : > { %1634 = vst.msk [vmem:[#allocation3 + $0x12c] sm:$0xf] %vm1608_vm1, %v1563_v24  ;;  %v1565_v13 = vpop.permute.xlu2 %1564 }
 0x2bd   : > { %1827 = vst.msk [vmem:[#allocation3 + $0x12c] sm:$0xf] %vm1801_vm2, %v6815_v59  ;;  %v4138_v14 = vpop.f32.mrf.mxu3 }
 0x2be   : > { %v4139_v37 = vadd.f32 %v6840_v34, %v4138_v14  ;;  %v2367_v35 = vpop.permute.xlu0 %2366  ;;  %v2037_v14 = vrot.slane %v1880_v49, 5  ;;  %v282_v49 = vld [vmem:[%s5405_s19 + $0x10] sm:$0xff]  }
 0x2bf   : > { %2436 = vst.msk [vmem:[#allocation3 + $0x13c] sm:$0xf] %vm1268_vm15, %v2367_v35 }
 0x2c0   : > { %v4249_v45 = vadd.f32 %v4217_v0, %v4139_v37  ;;  %2629 = vst.msk [vmem:[#allocation3 + $0x13c] sm:$0xf] %vm1608_vm1, %v2560_v22  ;;  %v3867_v59 = vpop.f32.mrf.mxu2  ;;  %v4219_v37 = vunpack.c.h.bf16 %v280_v11 }
 0x2c1   : > { %v3868_v47 = vadd.f32 %v3867_v59, %v3779_v50  ;;  %v2040_v59 = vrot.slane %v1881_v60, 5 }
 0x2c2   : > { %v4281_v40 = vmax.f32 %v4249_v45, 0.0  ;;  %v1754_v57 = vpop.permute.xlu1 %1753  ;;  %v2039_v45 = vrot.slane %v2037_v14, 4 }
 0x2c3   : > { %1826 = vst.msk [vmem:[#allocation3 + $0x120] sm:$0xf] %vm1801_vm2, %v1754_v57  ;;  %v3957_v22 = vadd.f32 %v3956_v48, %v3868_v47  ;;  %v2038_v48 = vsel %vm5432_vm4, %v4604_v44, %v2037_v14  ;;  %v3785_v47 = vpop.f32.mrf.mxu1 }
 0x2c4   : > { %v5059_v58 = vpack.c.bf16 %v4281_v40, %v4280_v25  ;;  %v1760_v12 = vpop.permute.xlu2 %1759  ;;  %v5024_v21 = vld [vmem:[#allocation3 + $0x128] sm:$0xf0]  ;;  %2104 = vst.msk [vmem:[#allocation3 + $0x16c] sm:$0xf] %vm627_vm0, %v2038_v48  ;;  %v2041_v46 = vsel %vm5432_vm4, %v2039_v45, %v2040_v59  ;;  %v4221_v48 = vunpack.c.h.bf16 %v282_v49 }
 0x2c5   : > { %3901 = vmatmul.bf16.gmra.mxu2 %v4804_v18  ;;  %v4021_v51 = vmax.f32 %v3957_v22, 0.0  ;;  %2105 = vst.msk [vmem:[#allocation3 + $0x178] sm:$0xf] %vm627_vm0, %v2041_v46  ;;  %v3963_v22 = vpop.f32.mrf.mxu0 }
 0x2c6   : > { %5060 = vst [vmem:[%s6867_s8] sm:$0xff] %v5059_v58   ;;  %v2562_v1 = vpop.permute.xlu0 %2561 }
 0x2c8   : > { %v3869_v4 = vpop.f32.mrf.mxu2 }
 0x2c9   : > { %v3870_v43 = vadd.f32 %v3869_v4, %v3781_v3  ;;  %v3784_v3 = vadd.f32 %v6863_v30, %v3783_v41 }
 0x2ca   : > { %v2369_v16 = vpop.permute.xlu1 %2368  ;;  %v4799_v19 = vld [vmem:[#allocation3 + $0x120] sm:$0xf] }
 0x2cb   : > { %v3959_v56 = vadd.f32 %v3958_v10, %v3870_v43  ;;  %2437 = vst.msk [vmem:[#allocation3 + $0x148] sm:$0xf] %vm1268_vm15, %v2369_v16  ;;  %v4800_v31 = vor.u32 %v5024_v21, %v4799_v19  ;;  %v3786_v43 = vadd.f32 %v6863_v30, %v3785_v47 }
 0x2cc   : > { %2630 = vst.msk [vmem:[#allocation3 + $0x148] sm:$0xf] %vm1608_vm1, %v2562_v1  ;;  %v2564_v7 = vpop.permute.xlu2 %2563 }
 0x2cd   : > { %v4022_v36 = vmax.f32 %v3959_v56, 0.0  ;;  %2966 = vst.msk [vmem:[#allocation3 + $0x148] sm:$0xf] %vm1801_vm2, %v6835_v32  ;;  %3812 = vmatmul.bf16.gmra.mxu1 %v4800_v31  ;;  %v4218_v32 = vunpack.c.l.bf16 %v280_v11  ;;  %v3788_v56 = vpop.f32.mrf.mxu1  ;;  %v3966_v11 = vpop.f32.mrf.mxu0 }
 0x2ce   : > { %v1225_v24 = vpop.permute.xlu0 %1224  ;;  %v3789_v60 = vadd.f32 %v6863_v30, %v3788_v56 }
 0x2cf   : > { %1295 = vst.msk [vmem:[#allocation3 + $0x138] sm:$0xf] %vm1268_vm15, %v1225_v24  ;;  %v4048_v38 = vpack.c.bf16 %v4022_v36, %v4021_v51 }
 0x2d0   : > { %1635 = vst.msk [vmem:[#allocation3 + $0x138] sm:$0xf] %vm1608_vm1, %v1565_v13 }
 0x2d1   : > { %4946 = vmatmul.msk.bf16.gmra.mxu3 %vm3695_vm14, %v4048_v38 }
 0x2d2   : > { %v2896_v29 = vpop.permute.xlu1 %2895 }
 0x2d3   : > { %2965 = vst.msk [vmem:[#allocation3 + $0x13c] sm:$0xf] %vm1801_vm2, %v2896_v29 }
 0x2d4   : > { %v4141_v39 = vpop.f32.mrf.mxu3  ;;  %v4813_v2 = vld [vmem:[#allocation3 + $0x144] sm:$0xf0]  ;;  %v2902_v25 = vpop.permute.xlu2 %2901 }
 0x2d5   : > { %v4142_v55 = vadd.f32 %v6840_v34, %v4141_v39  ;;  %v3968_v44 = vpop.f32.mrf.mxu0 }
 0x2d6   : > { %v1567_v28 = vpop.permute.xlu0 %1566 }
 0x2d7   : > { %v4250_v26 = vadd.f32 %v4218_v32, %v4142_v55  ;;  %v3790_v32 = vpop.f32.mrf.mxu1 }
 0x2d9   : > { %v4282_v62 = vmax.f32 %v4250_v26, 0.0 }
 0x2da   : > { %v1227_v0 = vpop.permute.xlu1 %1226  ;;  %v5026_v63 = vld [vmem:[#allocation3 + $0x13c] sm:$0xf] }
 0x2db   : > { %1296 = vst.msk [vmem:[#allocation3 + $0x144] sm:$0xf] %vm1268_vm15, %v1227_v0  ;;  %v4816_v35 = vor.u32 %v5026_v63, %v4813_v2 }
 0x2dc   : > { %1636 = vst.msk [vmem:[#allocation3 + $0x144] sm:$0xf] %vm1608_vm1, %v1567_v28  ;;  %v4143_v13 = vpop.f32.mrf.mxu3  ;;  %v1569_v10 = vpop.permute.xlu2 %1568 }
 0x2dd   : > { %1829 = vst.msk [vmem:[#allocation3 + $0x144] sm:$0xf] %vm1801_vm2, %v1760_v12  ;;  %v4144_v40 = vadd.f32 %v6840_v34, %v4143_v13  ;;  %3906 = vmatmul.bf16.gmra.mxu2 %v4816_v35 }
 0x2de   : > { %v2371_v57 = vpop.permute.xlu0 %2370 }
 0x2df   : > { %v4251_v50 = vadd.f32 %v4219_v37, %v4144_v40  ;;  %2438 = vst.msk [vmem:[#allocation3 + $0x154] sm:$0xf] %vm1268_vm15, %v2371_v57  ;;  %v3793_v59 = vpop.f32.mrf.mxu1 }
 0x2e0   : > { %2631 = vst.msk [vmem:[#allocation3 + $0x154] sm:$0xf] %vm1608_vm1, %v2564_v7  ;;  %v3872_v18 = vpop.f32.mrf.mxu2 }
 0x2e1   : > { %v4283_v58 = vmax.f32 %v4251_v50, 0.0  ;;  %v3873_v20 = vadd.f32 %v3872_v18, %v3784_v3  ;;  %v3791_v50 = vadd.f32 %v6863_v30, %v3790_v32 }
 0x2e2   : > { %v1758_v1 = vpop.permute.xlu1 %1757 }
 0x2e3   : > { %v5064_v4 = vpack.c.bf16 %v4283_v58, %v4282_v62  ;;  %1828 = vst.msk [vmem:[#allocation3 + $0x138] sm:$0xf] %vm1801_vm2, %v1758_v1  ;;  %v3962_v19 = vadd.f32 %v3961_v15, %v3873_v20  ;;  %v4220_v15 = vunpack.c.l.bf16 %v282_v49 }
 0x2e4   : > { %v5027_v36 = vld [vmem:[#allocation3 + $0x140] sm:$0xf0]  ;;  %v1764_v41 = vpop.permute.xlu2 %1763 }
 0x2e5   : > { %5136 = vst [vmem:[%s6867_s8 + $0x8] sm:$0xff] %v5064_v4   ;;  %v4023_v29 = vmax.f32 %v3962_v19, 0.0 }
 0x2e6   : > { %v2566_v12 = vpop.permute.xlu0 %2565 }
 0x2e7   : > { %v3795_v19 = vpop.f32.mrf.mxu1 }
 0x2e8   : > { %v3874_v16 = vpop.f32.mrf.mxu2 }
 0x2e9   : > { %v3875_v21 = vadd.f32 %v3874_v16, %v3786_v43 }
 0x2ea   : > { %v2373_v31 = vpop.permute.xlu1 %2372  ;;  %v4811_v51 = vld [vmem:[#allocation3 + $0x138] sm:$0xf] }
 0x2eb   : > { %v3964_v24 = vadd.f32 %v3963_v22, %v3875_v21  ;;  %2439 = vst.msk [vmem:[#allocation3 + $0x160] sm:$0xf] %vm1268_vm15, %v2373_v31  ;;  %v4812_v38 = vor.u32 %v5027_v36, %v4811_v51  ;;  %v3971_v22 = vpop.f32.mrf.mxu0 }
 0x2ec   : > { %2632 = vst.msk [vmem:[#allocation3 + $0x160] sm:$0xf] %vm1608_vm1, %v2566_v12  ;;  %v2568_v13 = vpop.permute.xlu2 %2567 }
 0x2ed   : > { %v4024_v7 = vmax.f32 %v3964_v24, 0.0  ;;  %2968 = vst.msk [vmem:[#allocation3 + $0x160] sm:$0xf] %vm1801_vm2, %v2902_v25  ;;  %3817 = vmatmul.bf16.gmra.mxu1 %v4812_v38  ;;  %v3794_v38 = vadd.f32 %v6863_v30, %v3793_v59 }
 0x2ee   : > { %v1229_v39 = vpop.permute.xlu0 %1228 }
 0x2ef   : > { %v4049_v28 = vpack.c.bf16 %v4024_v7, %v4023_v29  ;;  %1297 = vst.msk [vmem:[#allocation3 + $0x150] sm:$0xf] %vm1268_vm15, %v1229_v39 }
 0x2f0   : > { %1637 = vst.msk [vmem:[#allocation3 + $0x150] sm:$0xf] %vm1608_vm1, %v1569_v10 }
 0x2f1   : > { %4947 = vmatmul.msk.bf16.gmra.mxu3 %vm3695_vm14, %v4049_v28 }
 0x2f2   : > { %v2900_v55 = vpop.permute.xlu1 %2899 }
 0x2f3   : > { %2967 = vst.msk [vmem:[#allocation3 + $0x154] sm:$0xf] %vm1801_vm2, %v2900_v55  ;;  %v3973_v7 = vpop.f32.mrf.mxu0 }
 0x2f4   : > { %v4146_v6 = vpop.f32.mrf.mxu3  ;;  %v4825_v2 = vld [vmem:[#allocation3 + $0x15c] sm:$0xf0]  ;;  %v2906_v43 = vpop.permute.xlu2 %2905 }
 0x2f5   : > { %v4147_v14 = vadd.f32 %v6840_v34, %v4146_v6 }
 0x2f6   : > { %v1571_v0 = vpop.permute.xlu0 %1570 }
 0x2f7   : > { %v4252_v25 = vadd.f32 %v4220_v15, %v4147_v14  ;;  %v284_v15 = vld [vmem:[%s5405_s19 + $0x18] sm:$0xff]  }
 0x2f8   : > { %v3877_v63 = vpop.f32.mrf.mxu2  ;;  %v4222_v59 = vunpack.c.l.bf16 %v284_v15 }
 0x2f9   : > { %v3878_v40 = vadd.f32 %v3877_v63, %v3789_v60  ;;  %v4284_v58 = vmax.f32 %v4252_v25, 0.0 }
 0x2fa   : > { %v1231_v37 = vpop.permute.xlu1 %1230  ;;  %v5029_v35 = vld [vmem:[#allocation3 + $0x154] sm:$0xf] }
 0x2fb   : > { %1298 = vst.msk [vmem:[#allocation3 + $0x15c] sm:$0xf] %vm1268_vm15, %v1231_v37  ;;  %v4828_v45 = vor.u32 %v5029_v35, %v4825_v2  ;;  %v3967_v47 = vadd.f32 %v3966_v11, %v3878_v40  ;;  %v3798_v11 = vpop.f32.mrf.mxu1  ;;  %v3976_v37 = vpop.f32.mrf.mxu0 }
 0x2fc   : > { %1638 = vst.msk [vmem:[#allocation3 + $0x15c] sm:$0xf] %vm1608_vm1, %v1571_v0  ;;  %v4148_v26 = vpop.f32.mrf.mxu3  ;;  %v1573_v55 = vpop.permute.xlu2 %1572  ;;  %v3799_v40 = vadd.f32 %v6863_v30, %v3798_v11 }
 0x2fd   : > { %1831 = vst.msk [vmem:[#allocation3 + $0x15c] sm:$0xf] %vm1801_vm2, %v1764_v41  ;;  %v4149_v57 = vadd.f32 %v6840_v34, %v4148_v26  ;;  %3911 = vmatmul.bf16.gmra.mxu2 %v4828_v45  ;;  %v4025_v10 = vmax.f32 %v3967_v47, 0.0  ;;  %v3796_v41 = vadd.f32 %v6863_v30, %v3795_v19 }
 0x2fe   : > { %v2375_v46 = vpop.permute.xlu0 %2374 }
 0x2ff   : > { %v4253_v18 = vadd.f32 %v4221_v48, %v4149_v57  ;;  %2440 = vst.msk [vmem:[#allocation3 + $0x16c] sm:$0xf] %vm1268_vm15, %v2375_v46  ;;  %v4223_v46 = vunpack.c.h.bf16 %v284_v15  ;;  %v286_v15 = vld [vmem:[%s5405_s19 + $0x20] sm:$0xff]  }
 0x300   : > { %2633 = vst.msk [vmem:[#allocation3 + $0x16c] sm:$0xf] %vm1608_vm1, %v2568_v13  ;;  %v3879_v62 = vpop.f32.mrf.mxu2 }
 0x301   : > { %v4285_v1 = vmax.f32 %v4253_v18, 0.0  ;;  %v3880_v3 = vadd.f32 %v3879_v62, %v3791_v50 }
 0x302   : > { %v1762_v4 = vpop.permute.xlu1 %1761 }
 0x303   : > { %v5069_v20 = vpack.c.bf16 %v4285_v1, %v4284_v58  ;;  %v3969_v12 = vadd.f32 %v3968_v44, %v3880_v3  ;;  %1830 = vst.msk [vmem:[#allocation3 + $0x150] sm:$0xf] %vm1801_vm2, %v1762_v4  ;;  %v3800_v60 = vpop.f32.mrf.mxu1  ;;  %v3978_v19 = vpop.f32.mrf.mxu0 }
 0x304   : > { %v5030_v24 = vld [vmem:[#allocation3 + $0x158] sm:$0xf0]  ;;  %v1768_v18 = vpop.permute.xlu2 %1767  ;;  %v3801_v3 = vadd.f32 %v6863_v30, %v3800_v60 }
 0x305   : > { %5137 = vst [vmem:[%s6867_s8 + $0x10] sm:$0xff] %v5069_v20   ;;  %v4026_v16 = vmax.f32 %v3969_v12, 0.0 }
 0x306   : > { %v2570_v21 = vpop.permute.xlu0 %2569 }
 0x307   : > { %v4050_v56 = vpack.c.bf16 %v4026_v16, %v4025_v10 }
 0x308   : > { %v3882_v31 = vpop.f32.mrf.mxu2 }
 0x309   : > { %4948 = vmatmul.msk.bf16.gmra.mxu3 %vm3695_vm14, %v4050_v56  ;;  %v3883_v39 = vadd.f32 %v3882_v31, %v3794_v38 }
 0x30a   : > { %v2377_v51 = vpop.permute.xlu1 %2376  ;;  %v4823_v36 = vld [vmem:[#allocation3 + $0x150] sm:$0xf] }
 0x30b   : > { %2441 = vst.msk [vmem:[#allocation3 + $0x178] sm:$0xf] %vm1268_vm15, %v2377_v51  ;;  %v4824_v29 = vor.u32 %v5030_v24, %v4823_v36  ;;  %v3972_v6 = vadd.f32 %v3971_v22, %v3883_v39  ;;  %v3803_v22 = vpop.f32.mrf.mxu1 }
 0x30c   : > { %2634 = vst.msk [vmem:[#allocation3 + $0x178] sm:$0xf] %vm1608_vm1, %v2570_v21  ;;  %v3804_v11 = vadd.f32 %v6863_v30, %v3803_v22 }
 0x30d   : > { %2970 = vst.msk [vmem:[#allocation3 + $0x178] sm:$0xf] %vm1801_vm2, %v2906_v43  ;;  %3822 = vmatmul.bf16.gmra.mxu1 %v4824_v29  ;;  %v4027_v44 = vmax.f32 %v3972_v6, 0.0 }
 0x30e   : > { %v1233_v28 = vpop.permute.xlu0 %1232 }
 0x30f   : > { %1299 = vst.msk [vmem:[#allocation3 + $0x168] sm:$0xf] %vm1268_vm15, %v1233_v28 }
 0x310   : > { %1639 = vst.msk [vmem:[#allocation3 + $0x168] sm:$0xf] %vm1608_vm1, %v1573_v55  ;;  %v3884_v32 = vpop.f32.mrf.mxu2 }
 0x311   : > { %v3885_v49 = vadd.f32 %v3884_v32, %v3796_v41 }
 0x312   : > { %v2904_v0 = vpop.permute.xlu1 %2903 }
 0x313   : > { %v3974_v63 = vadd.f32 %v3973_v7, %v3885_v49  ;;  %2969 = vst.msk [vmem:[#allocation3 + $0x16c] sm:$0xf] %vm1801_vm2, %v2904_v0  ;;  %v3805_v29 = vpop.f32.mrf.mxu1 }
 0x314   : > { %v4151_v2 = vpop.f32.mrf.mxu3  ;;  %v4837_v48 = vld [vmem:[#allocation3 + $0x174] sm:$0xf0]  ;;  %v3806_v55 = vadd.f32 %v6863_v30, %v3805_v29 }
 0x315   : > { %v4028_v14 = vmax.f32 %v3974_v63, 0.0  ;;  %v4152_v45 = vadd.f32 %v6840_v34, %v4151_v2 }
 0x316   : > { %v1575_v57 = vpop.permute.xlu0 %1574 }
 0x317   : > { %v4051_v35 = vpack.c.bf16 %v4028_v14, %v4027_v44  ;;  %v4254_v58 = vadd.f32 %v4222_v59, %v4152_v45  ;;  %v4225_v45 = vunpack.c.h.bf16 %v286_v15 }
 0x318   : > { %v3887_v13 = vpop.f32.mrf.mxu2 }
 0x319   : > { %4949 = vmatmul.msk.bf16.gmra.mxu3 %vm3695_vm14, %v4051_v35  ;;  %v3888_v47 = vadd.f32 %v3887_v13, %v3799_v40  ;;  %v4286_v12 = vmax.f32 %v4254_v58, 0.0  ;;  %v4224_v13 = vunpack.c.l.bf16 %v286_v15 }
 0x31a   : > { %v1235_v26 = vpop.permute.xlu1 %1234  ;;  %v5032_v25 = vld [vmem:[#allocation3 + $0x16c] sm:$0xf] }
 0x31b   : > { %1300 = vst.msk [vmem:[#allocation3 + $0x174] sm:$0xf] %vm1268_vm15, %v1235_v26  ;;  %v4840_v50 = vor.u32 %v5032_v25, %v4837_v48  ;;  %v3977_v43 = vadd.f32 %v3976_v37, %v3888_v47 }
 0x31c   : > { %1640 = vst.msk [vmem:[#allocation3 + $0x174] sm:$0xf] %vm1608_vm1, %v1575_v57  ;;  %v4153_v62 = vpop.f32.mrf.mxu3 }
 0x31d   : > { %1833 = vst.msk [vmem:[#allocation3 + $0x174] sm:$0xf] %vm1801_vm2, %v1768_v18  ;;  %v4154_v1 = vadd.f32 %v6840_v34, %v4153_v62  ;;  %3916 = vmatmul.bf16.gmra.mxu2 %v4840_v50  ;;  %v4029_v51 = vmax.f32 %v3977_v43, 0.0 }
 0x31f   : > { %v4255_v4 = vadd.f32 %v4223_v46, %v4154_v1 }
 0x320   : > { %v3889_v20 = vpop.f32.mrf.mxu2 }
 0x321   : > { %v4287_v10 = vmax.f32 %v4255_v4, 0.0  ;;  %v3890_v16 = vadd.f32 %v3889_v20, %v3801_v3 }
 0x322   : > { %v1766_v21 = vpop.permute.xlu1 %1765 }
 0x323   : > { %v5074_v56 = vpack.c.bf16 %v4287_v10, %v4286_v12  ;;  %v3979_v31 = vadd.f32 %v3978_v19, %v3890_v16  ;;  %1832 = vst.msk [vmem:[#allocation3 + $0x168] sm:$0xf] %vm1801_vm2, %v1766_v21 }
 0x324   : > { %v5033_v39 = vld [vmem:[#allocation3 + $0x170] sm:$0xf0] }
 0x325   : > { %5138 = vst [vmem:[%s6867_s8 + $0x18] sm:$0xff] %v5074_v56   ;;  %v4030_v36 = vmax.f32 %v3979_v31, 0.0  ;;  %v288_v31 = vld [vmem:[%s5405_s19 + $0x28] sm:$0xff]  }
 0x326   : > { %v4226_v29 = vunpack.c.l.bf16 %v288_v31 }
 0x327   : > { %v4052_v24 = vpack.c.bf16 %v4030_v36, %v4029_v51 }
 0x328   : > { %v3892_v38 = vpop.f32.mrf.mxu2 }
 0x329   : > { %4950 = vmatmul.msk.bf16.gmra.mxu3 %vm3695_vm14, %v4052_v24  ;;  %v3893_v41 = vadd.f32 %v3892_v38, %v3804_v11 }
 0x32a   : > { %v4835_v7 = vld [vmem:[#allocation3 + $0x168] sm:$0xf]  ;;  %v3808_v0 = vpop.f32.mrf.mxu1 }
 0x32b   : > { %v4836_v28 = vor.u32 %v5033_v39, %v4835_v7  ;;  %v3982_v6 = vadd.f32 %v6604_v9, %v3893_v41  ;;  %v3809_v48 = vadd.f32 %v6863_v30, %v3808_v0  ;;  %v4227_v39 = vunpack.c.h.bf16 %v288_v31 }
 0x32d   : > { %3827 = vmatmul.bf16.gmra.mxu1 %v4836_v28  ;;  %v4031_v44 = vmax.f32 %v3982_v6, 0.0 }
 0x330   : > { %v3894_v32 = vpop.f32.mrf.mxu2 }
 0x331   : > { %v3895_v49 = vadd.f32 %v3894_v32, %v3806_v55 }
 0x332   : > { %v3810_v9 = vpop.f32.mrf.mxu1 }
 0x333   : > { %v3984_v63 = vadd.f32 %v6619_v23, %v3895_v49  ;;  %v3811_v40 = vadd.f32 %v6863_v30, %v3810_v9 }
 0x334   : > { %v4156_v2 = vpop.f32.mrf.mxu3 }
 0x335   : > { %v4032_v14 = vmax.f32 %v3984_v63, 0.0  ;;  %v4157_v60 = vadd.f32 %v6840_v34, %v4156_v2 }
 0x337   : > { %v4053_v37 = vpack.c.bf16 %v4032_v14, %v4031_v44  ;;  %v4256_v26 = vadd.f32 %v4224_v13, %v4157_v60  ;;  %v290_v60 = vld [vmem:[%s5405_s19 + $0x30] sm:$0xff]  }
 0x338   : > { %v3897_v35 = vpop.f32.mrf.mxu2 }
 0x339   : > { %4951 = vmatmul.msk.bf16.gmra.mxu3 %vm3695_vm14, %v4053_v37  ;;  %v3898_v25 = vadd.f32 %v3897_v35, %v3809_v48  ;;  %v4288_v50 = vmax.f32 %v4256_v26, 0.0 }
 0x33b   : > { %v3987_v18 = vadd.f32 %v6636_v61, %v3898_v25  ;;  %v4229_v25 = vunpack.c.h.bf16 %v290_v60 }
 0x33c   : > { %v4158_v59 = vpop.f32.mrf.mxu3 }
 0x33d   : > { %v4159_v23 = vadd.f32 %v6840_v34, %v4158_v59  ;;  %v4033_v3 = vmax.f32 %v3987_v18, 0.0  ;;  %v4228_v59 = vunpack.c.l.bf16 %v290_v60 }
 0x33f   : > { %v4257_v57 = vadd.f32 %v4225_v45, %v4159_v23 }
 0x340   : > { %v3899_v46 = vpop.f32.mrf.mxu2 }
 0x341   : > { %v4289_v62 = vmax.f32 %v4257_v57, 0.0  ;;  %v3900_v58 = vadd.f32 %v3899_v46, %v3811_v40 }
 0x343   : > { %v5079_v47 = vpack.c.bf16 %v4289_v62, %v4288_v50  ;;  %v3989_v1 = vadd.f32 %v6655_v33, %v3900_v58 }
 0x345   : > { %5139 = vst [vmem:[%s6867_s8 + $0x20] sm:$0xff] %v5079_v47   ;;  %v4034_v4 = vmax.f32 %v3989_v1, 0.0  ;;  %v292_v1 = vld [vmem:[%s5405_s19 + $0x38] sm:$0xff]  }
 0x347   : > { %v4054_v22 = vpack.c.bf16 %v4034_v4, %v4033_v3 }
 0x348   : > { %v3902_v20 = vpop.f32.mrf.mxu2 }
 0x349   : > { %4952 = vmatmul.msk.bf16.gmra.mxu3 %vm3695_vm14, %v4054_v22  ;;  %v4230_v22 = vunpack.c.l.bf16 %v292_v1 }
 0x34a   : > { %v3813_v12 = vpop.f32.mrf.mxu1 }
 0x34b   : > { %v3814_v43 = vadd.f32 %v6863_v30, %v3813_v12 }
 0x34d   : > { %v3903_v10 = vadd.f32 %v3902_v20, %v3814_v43  ;;  %v4231_v43 = vunpack.c.h.bf16 %v292_v1 }
 0x34f   : > { %v3992_v56 = vadd.f32 %v6677_v27, %v3903_v10 }
 0x350   : > { %v3904_v19 = vpop.f32.mrf.mxu2 }
 0x351   : > { %v4035_v36 = vmax.f32 %v3992_v56, 0.0 }
 0x352   : > { %v3815_v16 = vpop.f32.mrf.mxu1 }
 0x353   : > { %v3816_v61 = vadd.f32 %v6863_v30, %v3815_v16 }
 0x354   : > { %v4161_v21 = vpop.f32.mrf.mxu3 }
 0x355   : > { %v3905_v33 = vadd.f32 %v3904_v19, %v3816_v61  ;;  %v4162_v38 = vadd.f32 %v6840_v34, %v4161_v21 }
 0x357   : > { %v3994_v51 = vadd.f32 %v6696_v17, %v3905_v33  ;;  %v4258_v28 = vadd.f32 %v4226_v29, %v4162_v38 }
 0x359   : > { %v4036_v24 = vmax.f32 %v3994_v51, 0.0  ;;  %v4290_v55 = vmax.f32 %v4258_v28, 0.0 }
 0x35b   : > { %v4055_v7 = vpack.c.bf16 %v4036_v24, %v4035_v36 }
 0x35c   : > { %v4163_v11 = vpop.f32.mrf.mxu3 }
 0x35d   : > { %v4164_v41 = vadd.f32 %v6840_v34, %v4163_v11  ;;  %4953 = vmatmul.msk.bf16.gmra.mxu3 %vm3695_vm14, %v4055_v7  ;;  %v294_v11 = vld [vmem:[%s5405_s19 + $0x40] sm:$0xff]  }
 0x35e   : > { %v4232_v28 = vunpack.c.l.bf16 %v294_v11 }
 0x35f   : > { %v4259_v27 = vadd.f32 %v4227_v39, %v4164_v41  ;;  %v4233_v41 = vunpack.c.h.bf16 %v294_v11 }
 0x360   : > { %v3907_v17 = vpop.f32.mrf.mxu2 }
 0x361   : > { %v4291_v32 = vmax.f32 %v4259_v27, 0.0 }
 0x363   : > { %v5084_v6 = vpack.c.bf16 %v4291_v32, %v4290_v55 }
 0x365   : > { %5140 = vst [vmem:[%s6867_s8 + $0x28] sm:$0xff] %v5084_v6  }
 0x368   : > { %v3909_v14 = vpop.f32.mrf.mxu2 }
 0x36a   : > { %v3818_v49 = vpop.f32.mrf.mxu1 }
 0x36b   : > { %v3819_v0 = vadd.f32 %v6863_v30, %v3818_v49 }
 0x36d   : > { %v3908_v63 = vadd.f32 %v3907_v17, %v3819_v0 }
 0x36f   : > { %v3997_v37 = vadd.f32 %v6717_v5, %v3908_v63 }
 0x371   : > { %v4037_v48 = vmax.f32 %v3997_v37, 0.0 }
 0x372   : > { %v3820_v2 = vpop.f32.mrf.mxu1 }
 0x373   : > { %v3821_v44 = vadd.f32 %v6863_v30, %v3820_v2 }
 0x374   : > { %v4166_v15 = vpop.f32.mrf.mxu3 }
 0x375   : > { %v3910_v35 = vadd.f32 %v3909_v14, %v3821_v44  ;;  %v4167_v9 = vadd.f32 %v6840_v34, %v4166_v15  ;;  %v296_v14 = vld [vmem:[%s5405_s19 + $0x48] sm:$0xff]  }
 0x377   : > { %v3999_v13 = vadd.f32 %v6743_v53, %v3910_v35  ;;  %v4260_v40 = vadd.f32 %v4228_v59, %v4167_v9  ;;  %v4234_v35 = vunpack.c.l.bf16 %v296_v14 }
 0x379   : > { %v4038_v45 = vmax.f32 %v3999_v13, 0.0  ;;  %v4292_v46 = vmax.f32 %v4260_v40, 0.0 }
 0x37b   : > { %v4056_v26 = vpack.c.bf16 %v4038_v45, %v4037_v48  ;;  %v4235_v48 = vunpack.c.h.bf16 %v296_v14 }
 0x37c   : > { %v4168_v23 = vpop.f32.mrf.mxu3 }
 0x37d   : > { %v4169_v57 = vadd.f32 %v6840_v34, %v4168_v23  ;;  %4954 = vmatmul.msk.bf16.gmra.mxu3 %vm3695_vm14, %v4056_v26 }
 0x37f   : > { %v4261_v5 = vadd.f32 %v4229_v25, %v4169_v57 }
 0x380   : > { %v3912_v53 = vpop.f32.mrf.mxu2 }
 0x381   : > { %v4293_v50 = vmax.f32 %v4261_v5, 0.0 }
 0x383   : > { %v5089_v18 = vpack.c.bf16 %v4293_v50, %v4292_v46 }
 0x385   : > { %5141 = vst [vmem:[%s6867_s8 + $0x30] sm:$0xff] %v5089_v18  }
 0x388   : > { %v3914_v10 = vpop.f32.mrf.mxu2 }
 0x38a   : > { %v3823_v62 = vpop.f32.mrf.mxu1 }
 0x38b   : > { %v3824_v47 = vadd.f32 %v6863_v30, %v3823_v62 }
 0x38c   : > { %v4171_v58 = vpop.f32.mrf.mxu3 }
 0x38d   : > { %v3913_v3 = vadd.f32 %v3912_v53, %v3824_v47  ;;  %v4172_v4 = vadd.f32 %v6840_v34, %v4171_v58 }
 0x38f   : > { %v4002_v61 = vadd.f32 %v6762_v42, %v3913_v3  ;;  %v4262_v19 = vadd.f32 %v4230_v22, %v4172_v4 }
 0x391   : > { %v4039_v51 = vmax.f32 %v4002_v61, 0.0  ;;  %v4294_v36 = vmax.f32 %v4262_v19, 0.0 }
 0x392   : > { %v3825_v20 = vpop.f32.mrf.mxu1 }
 0x393   : > { %v3826_v12 = vadd.f32 %v6863_v30, %v3825_v20 }
 0x394   : > { %v4173_v16 = vpop.f32.mrf.mxu3 }
 0x395   : > { %v3915_v21 = vadd.f32 %v3914_v10, %v3826_v12  ;;  %v4174_v56 = vadd.f32 %v6840_v34, %v4173_v16  ;;  %v300_v16 = vld [vmem:[%s5405_s19 + $0x58] sm:$0xff]  }
 0x396   : > { %v4238_v19 = vunpack.c.l.bf16 %v300_v16 }
 0x397   : > { %v4004_v33 = vadd.f32 %v6779_v8, %v3915_v21  ;;  %v4263_v31 = vadd.f32 %v4231_v43, %v4174_v56  ;;  %v4239_v21 = vunpack.c.h.bf16 %v300_v16 }
 0x399   : > { %v4040_v24 = vmax.f32 %v4004_v33, 0.0  ;;  %v4295_v38 = vmax.f32 %v4263_v31, 0.0 }
 0x39b   : > { %v4057_v29 = vpack.c.bf16 %v4040_v24, %v4039_v51  ;;  %v5094_v7 = vpack.c.bf16 %v4295_v38, %v4294_v36 }
 0x39c   : > { %v4176_v39 = vpop.f32.mrf.mxu3 }
 0x39d   : > { %5142 = vst [vmem:[%s6867_s8 + $0x38] sm:$0xff] %v5094_v7   ;;  %4955 = vmatmul.msk.bf16.gmra.mxu3 %vm3695_vm14, %v4057_v29  ;;  %v4177_v42 = vadd.f32 %v6840_v34, %v4176_v39  ;;  %v302_v7 = vld [vmem:[%s5405_s19 + $0x60] sm:$0xff]  }
 0x39e   : > { %v4240_v11 = vunpack.c.l.bf16 %v302_v7 }
 0x39f   : > { %v4264_v8 = vadd.f32 %v4232_v28, %v4177_v42  ;;  %v4241_v42 = vunpack.c.h.bf16 %v302_v7 }
 0x3a0   : > { %v3917_v49 = vpop.f32.mrf.mxu2 }
 0x3a1   : > { %v4296_v6 = vmax.f32 %v4264_v8, 0.0 }
 0x3a4   : > { %v4178_v27 = vpop.f32.mrf.mxu3 }
 0x3a5   : > { %v4179_v55 = vadd.f32 %v6840_v34, %v4178_v27 }
 0x3a7   : > { %v4265_v32 = vadd.f32 %v4233_v41, %v4179_v55 }
 0x3a8   : > { %v3919_v45 = vpop.f32.mrf.mxu2 }
 0x3a9   : > { %v4297_v17 = vmax.f32 %v4265_v32, 0.0 }
 0x3aa   : > { %v3828_v0 = vpop.f32.mrf.mxu1 }
 0x3ab   : > { %v5099_v63 = vpack.c.bf16 %v4297_v17, %v4296_v6  ;;  %v3829_v44 = vadd.f32 %v6863_v30, %v3828_v0 }
 0x3ac   : > { %v4181_v2 = vpop.f32.mrf.mxu3 }
 0x3ad   : > { %5143 = vst [vmem:[%s6867_s8 + $0x40] sm:$0xff] %v5099_v63   ;;  %v3918_v15 = vadd.f32 %v3917_v49, %v3829_v44  ;;  %v4182_v37 = vadd.f32 %v6840_v34, %v4181_v2  ;;  %v304_v49 = vld [vmem:[%s5405_s19 + $0x68] sm:$0xff]  }
 0x3ae   : > { %v4242_v63 = vunpack.c.l.bf16 %v304_v49  ;;  %v4243_v2 = vunpack.c.h.bf16 %v304_v49 }
 0x3af   : > { %v4007_v59 = vadd.f32 %v6807_v52, %v3918_v15  ;;  %v4266_v26 = vadd.f32 %v4234_v35, %v4182_v37  ;;  %v298_v52 = vld [vmem:[%s5405_s19 + $0x50] sm:$0xff]  }
 0x3b0   : > { %v4236_v47 = vunpack.c.l.bf16 %v298_v52  ;;  %v4237_v1 = vunpack.c.h.bf16 %v298_v52 }
 0x3b1   : > { %v4041_v5 = vmax.f32 %v4007_v59, 0.0  ;;  %v4298_v46 = vmax.f32 %v4266_v26, 0.0 }
 0x3b2   : > { %v3830_v60 = vpop.f32.mrf.mxu1 }
 0x3b3   : > { %v3831_v13 = vadd.f32 %v6863_v30, %v3830_v60 }
 0x3b4   : > { %v4183_v9 = vpop.f32.mrf.mxu3 }
 0x3b5   : > { %v3920_v25 = vadd.f32 %v3919_v45, %v3831_v13  ;;  %v4184_v23 = vadd.f32 %v6840_v34, %v4183_v9  ;;  %v306_v45 = vld [vmem:[%s5405_s19 + $0x70] sm:$0xff]  }
 0x3b6   : > { %v4244_v59 = vunpack.c.l.bf16 %v306_v45  ;;  %v4245_v26 = vunpack.c.h.bf16 %v306_v45 }
 0x3b7   : > { %v4009_v40 = vadd.f32 %v6824_v54, %v3920_v25  ;;  %v4267_v57 = vadd.f32 %v4235_v48, %v4184_v23 }
 0x3b9   : > { %v4042_v50 = vmax.f32 %v4009_v40, 0.0  ;;  %v4299_v18 = vmax.f32 %v4267_v57, 0.0 }
 0x3bb   : > { %v4058_v53 = vpack.c.bf16 %v4042_v50, %v4041_v5  ;;  %v5104_v30 = vpack.c.bf16 %v4299_v18, %v4298_v46 }
 0x3bc   : > { %v4186_v62 = vpop.f32.mrf.mxu3 }
 0x3bd   : > { %5144 = vst [vmem:[%s6867_s8 + $0x48] sm:$0xff] %v5104_v30   ;;  %4956 = vmatmul.msk.bf16.gmra.mxu3 %vm3695_vm14, %v4058_v53  ;;  %v4187_v58 = vadd.f32 %v6840_v34, %v4186_v62  ;;  %v308_v53 = vld [vmem:[%s5405_s19 + $0x78] sm:$0xff]   ;;  %s5233_s19 = sshra.s32 %s4392_s20, 4  ;;  %s5234_s19 = int_to_ptr.hbm [resolvable:$true] %s5233_s19 }
 0x3be   : > { %v4246_v62 = vunpack.c.l.bf16 %v308_v53  ;;  %v4247_v52 = vunpack.c.h.bf16 %v308_v53  ;;  %s5235_s17 = scalar_lea.hbm %s5234_s19, 128  ;;  %p5240_p0 = scmp.lt.s32.totalorder %s5234_s19, %s7058_s7 }
 0x3bf   : > { %v4268_v54 = vadd.f32 %v4236_v47, %v4187_v58  ;;  %p5236_p11 = scmp.ne.s32.totalorder %s5234_s19, %s5235_s17  ;;  %p5241_p1 = scmp.lt.s32.totalorder %s5239_s23, %s5235_s17 }
 0x3c1   : > { %v4300_v20 = vmax.f32 %v4268_v54, 0.0  ;;  %p5237_p12 = pnand %p5236_p11, %p5366_p5  ;;  %p5242_p2 = por %p5241_p1, %p5240_p0 }
 0x3c3   : > { %p5238_p13 = pneg %p5237_p12 }
 0x3c4   : > { %v4188_v3 = vpop.f32.mrf.mxu3 }
 0x3c5   : > { %v4189_v4 = vadd.f32 %v6840_v34, %v4188_v3  ;;  %p5243_p3 = pnand %p5242_p2, %p5238_p13 }
 0x3c7   : > { %v4269_v22 = vadd.f32 %v4237_v1, %v4189_v4 }
 0x3c9   : > { %v4301_v12 = vmax.f32 %v4269_v22, 0.0 }
 0x3cb   : > { %v5109_v43 = vpack.c.bf16 %v4301_v12, %v4300_v20 }
 0x3cc   : > { %v4191_v10 = vpop.f32.mrf.mxu3 }
 0x3cd   : > { %5145 = vst [vmem:[%s6867_s8 + $0x50] sm:$0xff] %v5109_v43   ;;  %v4192_v61 = vadd.f32 %v6840_v34, %v4191_v10 }
 0x3cf   : > { %v4270_v33 = vadd.f32 %v4238_v19, %v4192_v61 }
 0x3d1   : > { %v4302_v36 = vmax.f32 %v4270_v33, 0.0 }
 0x3d4   : > { %v4193_v56 = vpop.f32.mrf.mxu3 }
 0x3d5   : > { %v4194_v31 = vadd.f32 %v6840_v34, %v4193_v56 }
 0x3d7   : > { %v4271_v51 = vadd.f32 %v4239_v21, %v4194_v31 }
 0x3d9   : > { %v4303_v24 = vmax.f32 %v4271_v51, 0.0 }
 0x3db   : > { %v5114_v38 = vpack.c.bf16 %v4303_v24, %v4302_v36 }
 0x3dd   : > { %5146 = vst [vmem:[%s6867_s8 + $0x58] sm:$0xff] %v5114_v38  }
 0x3e0   : > { %v4196_v29 = vpop.f32.mrf.mxu3 }
 0x3e1   : > { %v4197_v39 = vadd.f32 %v6840_v34, %v4196_v29 }
 0x3e3   : > { %v4272_v41 = vadd.f32 %v4240_v11, %v4197_v39 }
 0x3e5   : > { %v4304_v55 = vmax.f32 %v4272_v41, 0.0 }
 0x3e8   : > { %v4198_v28 = vpop.f32.mrf.mxu3 }
 0x3e9   : > { %v4199_v27 = vadd.f32 %v6840_v34, %v4198_v28 }
 0x3eb   : > { %v4273_v8 = vadd.f32 %v4241_v42, %v4199_v27 }
 0x3ed   : > { %v4305_v32 = vmax.f32 %v4273_v8, 0.0 }
 0x3ef   : > { %v5119_v6 = vpack.c.bf16 %v4305_v32, %v4304_v55 }
 0x3f1   : > { %5147 = vst [vmem:[%s6867_s8 + $0x60] sm:$0xff] %v5119_v6  }
 0x400   : > { %v4201_v17 = vpop.f32.mrf.mxu3 }
 0x401   : > { %v4202_v0 = vadd.f32 %v6840_v34, %v4201_v17 }
 0x403   : > { %v4274_v14 = vadd.f32 %v4242_v63, %v4202_v0 }
 0x405   : > { %v4306_v35 = vmax.f32 %v4274_v14, 0.0 }
 0x408   : > { %v4203_v44 = vpop.f32.mrf.mxu3 }
 0x409   : > { %v4204_v15 = vadd.f32 %v6840_v34, %v4203_v44 }
 0x40b   : > { %v4275_v37 = vadd.f32 %v4243_v2, %v4204_v15 }
 0x40d   : > { %v4307_v60 = vmax.f32 %v4275_v37, 0.0 }
 0x40f   : > { %v5124_v13 = vpack.c.bf16 %v4307_v60, %v4306_v35 }
 0x411   : > { %5148 = vst [vmem:[%s6867_s8 + $0x68] sm:$0xff] %v5124_v13  }
 0x420   : > { %v4206_v48 = vpop.f32.mrf.mxu3 }
 0x421   : > { %v4207_v9 = vadd.f32 %v6840_v34, %v4206_v48 }
 0x423   : > { %v4276_v23 = vadd.f32 %v4244_v59, %v4207_v9 }
 0x425   : > { %v4308_v5 = vmax.f32 %v4276_v23, 0.0 }
 0x428   : > { %v4208_v25 = vpop.f32.mrf.mxu3 }
 0x429   : > { %v4209_v40 = vadd.f32 %v6840_v34, %v4208_v25 }
 0x42b   : > { %v4277_v57 = vadd.f32 %v4245_v26, %v4209_v40 }
 0x42d   : > { %v4309_v46 = vmax.f32 %v4277_v57, 0.0 }
 0x42f   : > { %v5129_v50 = vpack.c.bf16 %v4309_v46, %v4308_v5 }
 0x431   : > { %5149 = vst [vmem:[%s6867_s8 + $0x70] sm:$0xff] %v5129_v50  }
 0x440   : > { %v4211_v18 = vpop.f32.mrf.mxu3 }
 0x441   : > { %v4212_v30 = vadd.f32 %v6840_v34, %v4211_v18 }
 0x443   : > { %v4278_v47 = vadd.f32 %v4246_v62, %v4212_v30 }
 0x445   : > { %v4310_v54 = vmax.f32 %v4278_v47, 0.0 }
 0x448   : > { %v4213_v58 = vpop.f32.mrf.mxu3 }
 0x449   : > { %v4214_v1 = vadd.f32 %v6840_v34, %v4213_v58 }
 0x44b   : > { %v4279_v3 = vadd.f32 %v4247_v52, %v4214_v1 }
 0x44d   : > { %v4311_v4 = vmax.f32 %v4279_v3, 0.0 }
 0x44f   : > { %v5134_v22 = vpack.c.bf16 %v4311_v4, %v4310_v54 }
 0x451   : > { %5150 = vst [vmem:[%s6867_s8 + $0x78] sm:$0xff] %v5134_v22  }
 0x452   : > { %5246 = shalt.err (!%p5243_p3)
}
 0x453   : > { %s5287_s29 = smov 4  }
 0x454   : > { %5169 = dma.vmem_to_hbm [thread:$0]  (%p5366_p5), %s4390_s16, 2048, %s4392_s20, %s4377_s28, %s5285_s21, %s5285_s21, %s5287_s29  }
 0x455 PF: > { %p5175_p4 = scmp.ge.s32.totalorder %s5281_s27, 2  ;;  %s4406_s8 = sand.u32 1, %s5269_s24  }
 0x456   : > { %s4407_s14 = scalar_lea.sflag [#allocation5], %s4406_s8 }
 0x457   : > { %p5172_p7 = pnand %p5175_p4, %p5370_p6 }
 0x459   : > { %p5173_p8 = pneg %p5172_p7 }
 0x45b   : > { %5264 = dma.done.wait (%p5173_p8), %s4407_s14, 2048  }
 0x45c   : > { %5266 = vsyncadd (%p5173_p8), %s4407_s14, 4294965248  ;;  %p17_p9 = scmp.ge.s32.totalorder %s5353_s30, 4   ;;  %s7067_s24 = smov %s5273_s25 }
 0x45d   : > { %s7068_s25 = smov %s5277_s26  ;;  %s7069_s26 = smov %s5364_s10 }
 0x45e   : > { %s7070_s27 = smov %s5353_s30  ;;  %19 = sbr.rel (!%p17_p9) target bundleno = 3 (0x3), region = 86 }
 0x463   :  { %4413 = vsyncpa [#allocation5], 1 }
 0x464   :  { %4415 = vsyncpa [#allocation5 + $0x1], 1 }

</bundles_post_ra>
